<compile_context>
chip_gen: v6e
topology: v6e:2x2x1
jax: 0.10.0
libtpu: 0.0.40
codegen_flags: <defaults>
</compile_context>

<pallas_src>
import functools

import jax
import jax.numpy as jnp
from jax.experimental import pallas as pl
from jax.experimental.pallas import tpu as pltpu

_BN_EPS = 1e-5


# ------------------------------ fused kernel ------------------------------- #

def _residual_block_kernel(x_ref, w1_ref, s1_ref, b1_ref,
                           w2_ref, s2_ref, b2_ref,
                           *rest, stride, has_projection):
    """Fused ResidualBlock forward for B_tile images (NHWC tiles in VMEM).

    x_ref : (B_tile, H, W, Cin)          input tile
    w1_ref: (9*Cin, Cout)                conv1 weights, im2col order (dy,dx,ci)
    w2_ref: (9*Cout, Cout)               conv2 weights, im2col order
    s*_ref, b*_ref: (1, Cout)            folded BN scale / bias
    [ws_ref: (Cin, Cout), ss_ref, bs_ref]  projection shortcut (optional)
    o_ref : (B_tile, Ho*Wo, Cout)        output tile (natural layout)
    xpad_ref: (B_tile, H+2,  W+2,  Cin)  VMEM scratch, zero halo
    ypad_ref: (B_tile, Ho+2, Wo+2, Cout) VMEM scratch, zero halo
    """
    if has_projection:
        ws_ref, ss_ref, bs_ref, o_ref, xpad_ref, ypad_ref = rest
    else:
        o_ref, xpad_ref, ypad_ref = rest

    bt, H, W, cin = x_ref.shape
    cout = w2_ref.shape[-1]
    ho = (H - 1) // stride + 1
    wo = (W - 1) // stride + 1
    m = bt * ho * wo

    # ---- stage input: zero ONLY the halo strips, then write the interior ----
    # Halos must be re-zeroed every step (scratch is uninitialized and the grid
    # may be partitioned across TensorCores); the interior is fully overwritten
    # so a full-scratch zero fill would be redundant vst work.
    xpad_ref[:, pl.ds(0, 1), :, :] = jnp.zeros((bt, 1, W + 2, cin), jnp.float32)
    xpad_ref[:, pl.ds(H + 1, 1), :, :] = jnp.zeros((bt, 1, W + 2, cin), jnp.float32)
    xpad_ref[:, :, pl.ds(0, 1), :] = jnp.zeros((bt, H + 2, 1, cin), jnp.float32)
    xpad_ref[:, :, pl.ds(W + 1, 1), :] = jnp.zeros((bt, H + 2, 1, cin), jnp.float32)
    xpad_ref[:, pl.ds(1, H), pl.ds(1, W), :] = x_ref[...]

    # ---- conv1: 3x3 / stride, as ONE im2col GEMM, then BN1 + ReLU ----
    taps1 = []
    center = None
    for dy in range(3):
        for dx in range(3):
            if stride == 1:
                win = xpad_ref[:, pl.ds(dy, ho), pl.ds(dx, wo), :]
            else:
                win = xpad_ref[:, pl.ds(dy, ho, stride=stride),
                               pl.ds(dx, wo, stride=stride), :]
            patch = win.reshape(m, cin)        # layout-free: wo % 8 == 0
            if dy == 1 and dx == 1:
                center = patch                 # == x[:, ::stride, ::stride, :]
            taps1.append(patch)
    p1 = jnp.concatenate(taps1, axis=1)        # (m, 9*cin)
    y = jnp.dot(p1, w1_ref[...], preferred_element_type=jnp.float32)
    y = jnp.maximum(y * s1_ref[...] + b1_ref[...], 0.0)

    # ---- stage conv1 output into the second zero-halo scratch (stays in VMEM)
    ypad_ref[:, pl.ds(0, 1), :, :] = jnp.zeros((bt, 1, wo + 2, cout), jnp.float32)
    ypad_ref[:, pl.ds(ho + 1, 1), :, :] = jnp.zeros((bt, 1, wo + 2, cout), jnp.float32)
    ypad_ref[:, :, pl.ds(0, 1), :] = jnp.zeros((bt, ho + 2, 1, cout), jnp.float32)
    ypad_ref[:, :, pl.ds(wo + 1, 1), :] = jnp.zeros((bt, ho + 2, 1, cout), jnp.float32)
    ypad_ref[:, pl.ds(1, ho), pl.ds(1, wo), :] = y.reshape(bt, ho, wo, cout)

    # ---- conv2: 3x3 / stride 1, as ONE im2col GEMM, then BN2 ----
    taps2 = []
    for dy in range(3):
        for dx in range(3):
            win = ypad_ref[:, pl.ds(dy, ho), pl.ds(dx, wo), :]
            taps2.append(win.reshape(m, cout))
    p2 = jnp.concatenate(taps2, axis=1)        # (m, 9*cout)
    out = jnp.dot(p2, w2_ref[...], preferred_element_type=jnp.float32)
    out = out * s2_ref[...] + b2_ref[...]

    # ---- shortcut + residual add + final ReLU ----
    if has_projection:
        sc = jnp.dot(center, ws_ref[...], preferred_element_type=jnp.float32)
        sc = sc * ss_ref[...] + bs_ref[...]
    else:
        sc = center                            # identity: stride==1, Cin==Cout

    out = jnp.maximum(out + sc, 0.0)

    # Natural-layout store: (B_tile, Ho*Wo, Cout), no lane-flatten relayout.
    o_ref[...] = out.reshape(bt, ho * wo, cout).astype(o_ref.dtype)


# --------------------------- pallas_call glue ------------------------------ #

def _pick_b_tile(n):
    """Images per grid step: amortize per-step overhead while keeping
    >= 2 grid steps (v7x has 2 TensorCores) and a small per-step VMEM
    footprint (cap of 8 keeps blocks << 1 MiB even at CIFAR widths)."""
    cap = min(8, max(1, n // 2))
    for bt in range(cap, 0, -1):
        if n % bt == 0:
            return bt
    return 1


def _residual_block_call(x, w1, s1, b1, w2, s2, b2, proj, *, stride, b_tile=None):
    N, H, W, cin = x.shape
    cout = w1.shape[-1]
    ho = (H - 1) // stride + 1
    wo = (W - 1) // stride + 1
    bt = _pick_b_tile(N) if b_tile is None else b_tile
    assert N % bt == 0, (N, bt)

    def _const_spec(shape):
        return pl.BlockSpec(shape, lambda n, _s=len(shape): (0,) * _s)

    in_specs = [
        pl.BlockSpec((bt, H, W, cin), lambda n: (n, 0, 0, 0)),
        _const_spec((9 * cin, cout)),
        _const_spec((1, cout)),
        _const_spec((1, cout)),
        _const_spec((9 * cout, cout)),
        _const_spec((1, cout)),
        _const_spec((1, cout)),
    ]
    args = [x, w1, s1, b1, w2, s2, b2]

    has_projection = proj is not None
    if has_projection:
        ws, ss, bs = proj
        in_specs += [_const_spec((cin, cout)), _const_spec((1, cout)),
                     _const_spec((1, cout))]
        args += [ws, ss, bs]

    kernel = functools.partial(_residual_block_kernel, stride=stride,
                               has_projection=has_projection)

    out = pl.pallas_call(
        kernel,
        out_shape=jax.ShapeDtypeStruct((N, ho * wo, cout), jnp.float32),
        grid=(N // bt,),
        in_specs=in_specs,
        out_specs=pl.BlockSpec((bt, ho * wo, cout), lambda n: (n, 0, 0)),
        scratch_shapes=[
            pltpu.VMEM((bt, H + 2, W + 2, cin), jnp.float32),
            pltpu.VMEM((bt, ho + 2, wo + 2, cout), jnp.float32),
        ],
        compiler_params=pltpu.CompilerParams(
            dimension_semantics=("parallel",),     # batch steps independent
            vmem_limit_bytes=32 * 1024 * 1024,
        ),
    )(*args)
    return out                                     # (N, Ho*Wo, Cout)


def _fold_bn(gamma, beta, mean, var):
    scale = gamma / jnp.sqrt(var + _BN_EPS)
    bias = beta - mean * scale
    return (scale.reshape(1, -1).astype(jnp.float32),
            bias.reshape(1, -1).astype(jnp.float32))


def residual_block_forward_nhwc(x_nhwc, params, *, stride=1, b_tile=None):
    """NHWC entry point: zero wrapper transposes (keep whole net NHWC)."""
    N, H, W, cin = x_nhwc.shape
    cout = params["conv1_w"].shape[-1]
    ho = (H - 1) // stride + 1
    wo = (W - 1) // stride + 1

    s1, b1 = _fold_bn(params["bn1_gamma"], params["bn1_beta"],
                      params["bn1_mean"], params["bn1_var"])
    s2, b2 = _fold_bn(params["bn2_gamma"], params["bn2_beta"],
                      params["bn2_mean"], params["bn2_var"])
    w1 = params["conv1_w"].astype(jnp.float32).reshape(9 * cin, cout)
    w2 = params["conv2_w"].astype(jnp.float32).reshape(9 * cout, cout)

    if stride != 1 or cin != cout:
        ss, bs = _fold_bn(params["bns_gamma"], params["bns_beta"],
                          params["bns_mean"], params["bns_var"])
        proj = (params["convs_w"].astype(jnp.float32).reshape(cin, cout), ss, bs)
    else:
        proj = None

    out = _residual_block_call(x_nhwc.astype(jnp.float32), w1, s1, b1,
                               w2, s2, b2, proj, stride=stride, b_tile=b_tile)
    return out.reshape(N, ho, wo, cout)            # NHWC, free reshape


def residual_block_forward(x_nchw, params, *, stride=1, b_tile=None):
    """PyTorch-parity wrapper (NCHW in / NCHW out, eval-mode BN)."""
    x = jnp.transpose(x_nchw, (0, 2, 3, 1))
    out = residual_block_forward_nhwc(x, params, stride=stride, b_tile=b_tile)
    return jnp.transpose(out, (0, 3, 1, 2))


# ----------------------------- reference ----------------------------------- #

def _reference_forward(x_nchw, params, *, stride=1):
    inchannel = x_nchw.shape[1]
    outchannel = params["conv1_w"].shape[-1]
    x = jnp.transpose(x_nchw, (0, 2, 3, 1)).astype(jnp.float32)
    dn = ("NHWC", "HWIO", "NHWC")

    def bn(y, g, b, m, v):
        return (y - m) * (g / jnp.sqrt(v + _BN_EPS)) + b

    y = jax.lax.conv_general_dilated(x, params["conv1_w"], (stride, stride),
                                     ((1, 1), (1, 1)), dimension_numbers=dn)
    y = jax.nn.relu(bn(y, params["bn1_gamma"], params["bn1_beta"],
                       params["bn1_mean"], params["bn1_var"]))
    y = jax.lax.conv_general_dilated(y, params["conv2_w"], (1, 1),
                                     ((1, 1), (1, 1)), dimension_numbers=dn)
    y = bn(y, params["bn2_gamma"], params["bn2_beta"],
           params["bn2_mean"], params["bn2_var"])
    if stride != 1 or inchannel != outchannel:
        s = jax.lax.conv_general_dilated(x, params["convs_w"], (stride, stride),
                                         ((0, 0), (0, 0)), dimension_numbers=dn)
        s = bn(s, params["bns_gamma"], params["bns_beta"],
               params["bns_mean"], params["bns_var"])
    else:
        s = x
    return jnp.transpose(jax.nn.relu(y + s), (0, 3, 1, 2))


# ------------------------------- main -------------------------------------- #

def _make_block_params(key, cin, cout, *, with_shortcut):
    ks = jax.random.split(key, 6)

    def bn_params(k, c):
        k1, k2, k3, k4 = jax.random.split(k, 4)
        return (1.0 + 0.1 * jax.random.normal(k1, (c,), jnp.float32),
                0.1 * jax.random.normal(k2, (c,), jnp.float32),
                0.1 * jax.random.normal(k3, (c,), jnp.float32),
                0.5 + jnp.abs(jax.random.normal(k4, (c,), jnp.float32)))

    g1, b1, m1, v1 = bn_params(ks[1], cout)
    g2, b2, m2, v2 = bn_params(ks[3], cout)
    params = {
        "conv1_w": 0.2 * jax.random.normal(ks[0], (3, 3, cin, cout), jnp.float32),
        "bn1_gamma": g1, "bn1_beta": b1, "bn1_mean": m1, "bn1_var": v1,
        "conv2_w": 0.2 * jax.random.normal(ks[2], (3, 3, cout, cout), jnp.float32),
        "bn2_gamma": g2, "bn2_beta": b2, "bn2_mean": m2, "bn2_var": v2,
    }
    if with_shortcut:
        gs, bs_, ms, vs = bn_params(ks[5], cout)
        params.update({
            "convs_w": 0.2 * jax.random.normal(ks[4], (1, 1, cin, cout), jnp.float32),
            "bns_gamma": gs, "bns_beta": bs_, "bns_mean": ms, "bns_var": vs,
        })
    return params


if __name__ == "__main__":
    key = jax.random.PRNGKey(0)
    k_proj, k_id, kx1, kx2 = jax.random.split(key, 4)

    # Tolerance: observed error is ~1e-5..1e-4; headroom covers the f32 MXU
    # multi-pass matmul rounding differences across TPU generations.
    TOL = 1e-3

    # Case 1: projection block (stride=2, 4 -> 8 channels), N=4
    # -> B_tile=2 per grid step, grid length 2 (exercises batched path).
    N, Cin, Cout, H, W, STRIDE = 4, 4, 8, 16, 16, 2
    params_p = _make_block_params(k_proj, Cin, Cout, with_shortcut=True)
    x_p = jax.random.normal(kx1, (N, Cin, H, W), jnp.float32)  # PyTorch NCHW
    out_p = jax.block_until_ready(
        residual_block_forward(x_p, params_p, stride=STRIDE))
    ref_p = _reference_forward(x_p, params_p, stride=STRIDE)
    assert out_p.shape == (N, Cout, H // STRIDE, W // STRIDE), out_p.shape
    err_p = float(jnp.max(jnp.abs(out_p - ref_p)))
    assert jnp.allclose(out_p, ref_p, atol=TOL, rtol=TOL), err_p

    # Case 2: identity-shortcut block (stride=1, 8 -> 8 channels), N=2
    # -> B_tile=1, grid length 2.
    N2, C = 2, 8
    params_i = _make_block_params(k_id, C, C, with_shortcut=False)
    x_i = jax.random.normal(kx2, (N2, C, H, W), jnp.float32)
    out_i = jax.block_until_ready(
        residual_block_forward(x_i, params_i, stride=1))
    ref_i = _reference_forward(x_i, params_i, stride=1)
    assert out_i.shape == (N2, C, H, W), out_i.shape
    err_i = float(jnp.max(jnp.abs(out_i - ref_i)))
    assert jnp.allclose(out_i, ref_i, atol=TOL, rtol=TOL), err_i

    print("KERNEL_OK")
</pallas_src>

<mosaic_0001>
module attributes {stable_mosaic.version = 11 : i64} {
  func.func @_residual_block_kernel(%arg0: i32, %arg1: memref<2x16x16x4xf32, #tpu.memory_space<vmem>>, %arg2: memref<36x8xf32, #tpu.memory_space<vmem>>, %arg3: memref<1x8xf32, #tpu.memory_space<vmem>>, %arg4: memref<1x8xf32, #tpu.memory_space<vmem>>, %arg5: memref<72x8xf32, #tpu.memory_space<vmem>>, %arg6: memref<1x8xf32, #tpu.memory_space<vmem>>, %arg7: memref<1x8xf32, #tpu.memory_space<vmem>>, %arg8: memref<4x8xf32, #tpu.memory_space<vmem>>, %arg9: memref<1x8xf32, #tpu.memory_space<vmem>>, %arg10: memref<1x8xf32, #tpu.memory_space<vmem>>, %arg11: memref<2x64x8xf32, #tpu.memory_space<vmem>>, %arg12: memref<2x18x18x4xf32, #tpu.memory_space<vmem>>, %arg13: memref<2x10x10x8xf32, #tpu.memory_space<vmem>>) attributes {dimension_semantics = [#tpu.dimension_semantics<parallel>], iteration_bounds = array<i64: 2>, scalar_prefetch = 0 : i64, scratch_operands = 2 : i64, tpu.core_type = #tpu.core_type<tc>, window_params = [{transform_indices = @transform_0, window_bounds = array<i64: 2, 16, 16, 4>}, {pipeline_mode = #tpu.pipeline_mode<synchronous>, transform_indices = @transform_1, window_bounds = array<i64: 36, 8>}, {pipeline_mode = #tpu.pipeline_mode<synchronous>, transform_indices = @transform_2, window_bounds = array<i64: 1, 8>}, {pipeline_mode = #tpu.pipeline_mode<synchronous>, transform_indices = @transform_3, window_bounds = array<i64: 1, 8>}, {pipeline_mode = #tpu.pipeline_mode<synchronous>, transform_indices = @transform_4, window_bounds = array<i64: 72, 8>}, {pipeline_mode = #tpu.pipeline_mode<synchronous>, transform_indices = @transform_5, window_bounds = array<i64: 1, 8>}, {pipeline_mode = #tpu.pipeline_mode<synchronous>, transform_indices = @transform_6, window_bounds = array<i64: 1, 8>}, {pipeline_mode = #tpu.pipeline_mode<synchronous>, transform_indices = @transform_7, window_bounds = array<i64: 4, 8>}, {pipeline_mode = #tpu.pipeline_mode<synchronous>, transform_indices = @transform_8, window_bounds = array<i64: 1, 8>}, {pipeline_mode = #tpu.pipeline_mode<synchronous>, transform_indices = @transform_9, window_bounds = array<i64: 1, 8>}, {transform_indices = @transform_10, window_bounds = array<i64: 2, 64, 8>}]} {
    %cst = arith.constant 0.000000e+00 : f32
    %0 = vector.broadcast %cst : f32 to vector<2x1x18x4xf32>
    %c0 = arith.constant 0 : index
    %c0_0 = arith.constant 0 : index
    %c0_1 = arith.constant 0 : index
    %c0_2 = arith.constant 0 : index
    %1 = vector.load %arg12[%c0, %c0_0, %c0_1, %c0_2] : memref<2x18x18x4xf32, #tpu.memory_space<vmem>>, vector<2x1x18x4xf32>
    tpu.vector_store %arg12[%c0, %c0_0, %c0_1, %c0_2], %0 {strides = array<i32>} : memref<2x18x18x4xf32, #tpu.memory_space<vmem>>, vector<2x1x18x4xf32>,
    %cst_3 = arith.constant 0.000000e+00 : f32
    %2 = vector.broadcast %cst_3 : f32 to vector<2x1x18x4xf32>
    %c0_4 = arith.constant 0 : index
    %c17 = arith.constant 17 : index
    %c0_5 = arith.constant 0 : index
    %c0_6 = arith.constant 0 : index
    %3 = vector.load %arg12[%c0_4, %c17, %c0_5, %c0_6] : memref<2x18x18x4xf32, #tpu.memory_space<vmem>>, vector<2x1x18x4xf32>
    tpu.vector_store %arg12[%c0_4, %c17, %c0_5, %c0_6], %2 {strides = array<i32>} : memref<2x18x18x4xf32, #tpu.memory_space<vmem>>, vector<2x1x18x4xf32>,
    %cst_7 = arith.constant 0.000000e+00 : f32
    %4 = vector.broadcast %cst_7 : f32 to vector<2x18x1x4xf32>
    %c0_8 = arith.constant 0 : index
    %c0_9 = arith.constant 0 : index
    %c0_10 = arith.constant 0 : index
    %c0_11 = arith.constant 0 : index
    %5 = vector.load %arg12[%c0_8, %c0_9, %c0_10, %c0_11] : memref<2x18x18x4xf32, #tpu.memory_space<vmem>>, vector<2x18x1x4xf32>
    tpu.vector_store %arg12[%c0_8, %c0_9, %c0_10, %c0_11], %4 {strides = array<i32>} : memref<2x18x18x4xf32, #tpu.memory_space<vmem>>, vector<2x18x1x4xf32>,
    %cst_12 = arith.constant 0.000000e+00 : f32
    %6 = vector.broadcast %cst_12 : f32 to vector<2x18x1x4xf32>
    %c0_13 = arith.constant 0 : index
    %c0_14 = arith.constant 0 : index
    %c17_15 = arith.constant 17 : index
    %c0_16 = arith.constant 0 : index
    %7 = vector.load %arg12[%c0_13, %c0_14, %c17_15, %c0_16] : memref<2x18x18x4xf32, #tpu.memory_space<vmem>>, vector<2x18x1x4xf32>
    tpu.vector_store %arg12[%c0_13, %c0_14, %c17_15, %c0_16], %6 {strides = array<i32>} : memref<2x18x18x4xf32, #tpu.memory_space<vmem>>, vector<2x18x1x4xf32>,
    %c0_17 = arith.constant 0 : index
    %c0_18 = arith.constant 0 : index
    %c0_19 = arith.constant 0 : index
    %c0_20 = arith.constant 0 : index
    %8 = vector.load %arg1[%c0_17, %c0_18, %c0_19, %c0_20] : memref<2x16x16x4xf32, #tpu.memory_space<vmem>>, vector<2x16x16x4xf32>
    %c0_21 = arith.constant 0 : index
    %c1 = arith.constant 1 : index
    %c1_22 = arith.constant 1 : index
    %c0_23 = arith.constant 0 : index
    %9 = vector.load %arg12[%c0_21, %c1, %c1_22, %c0_23] : memref<2x18x18x4xf32, #tpu.memory_space<vmem>>, vector<2x16x16x4xf32>
    tpu.vector_store %arg12[%c0_21, %c1, %c1_22, %c0_23], %8 {strides = array<i32>} : memref<2x18x18x4xf32, #tpu.memory_space<vmem>>, vector<2x16x16x4xf32>,
    %c0_24 = arith.constant 0 : index
    %c0_25 = arith.constant 0 : index
    %c0_26 = arith.constant 0 : index
    %c0_27 = arith.constant 0 : index
    %10 = tpu.strided_load %arg12[%c0_24, %c0_25, %c0_26, %c0_27] {strides = array<i32: 1, 2, 2, 1>} : memref<2x18x18x4xf32, #tpu.memory_space<vmem>>, vector<2x8x8x4xf32>
    %11 = vector.shape_cast %10 : vector<2x8x8x4xf32> to vector<128x4xf32>
    %c0_28 = arith.constant 0 : index
    %c0_29 = arith.constant 0 : index
    %c1_30 = arith.constant 1 : index
    %c0_31 = arith.constant 0 : index
    %12 = tpu.strided_load %arg12[%c0_28, %c0_29, %c1_30, %c0_31] {strides = array<i32: 1, 2, 2, 1>} : memref<2x18x18x4xf32, #tpu.memory_space<vmem>>, vector<2x8x8x4xf32>
    %13 = vector.shape_cast %12 : vector<2x8x8x4xf32> to vector<128x4xf32>
    %c0_32 = arith.constant 0 : index
    %c0_33 = arith.constant 0 : index
    %c2 = arith.constant 2 : index
    %c0_34 = arith.constant 0 : index
    %14 = tpu.strided_load %arg12[%c0_32, %c0_33, %c2, %c0_34] {strides = array<i32: 1, 2, 2, 1>} : memref<2x18x18x4xf32, #tpu.memory_space<vmem>>, vector<2x8x8x4xf32>
    %15 = vector.shape_cast %14 : vector<2x8x8x4xf32> to vector<128x4xf32>
    %c0_35 = arith.constant 0 : index
    %c1_36 = arith.constant 1 : index
    %c0_37 = arith.constant 0 : index
    %c0_38 = arith.constant 0 : index
    %16 = tpu.strided_load %arg12[%c0_35, %c1_36, %c0_37, %c0_38] {strides = array<i32: 1, 2, 2, 1>} : memref<2x18x18x4xf32, #tpu.memory_space<vmem>>, vector<2x8x8x4xf32>
    %17 = vector.shape_cast %16 : vector<2x8x8x4xf32> to vector<128x4xf32>
    %c0_39 = arith.constant 0 : index
    %c1_40 = arith.constant 1 : index
    %c1_41 = arith.constant 1 : index
    %c0_42 = arith.constant 0 : index
    %18 = tpu.strided_load %arg12[%c0_39, %c1_40, %c1_41, %c0_42] {strides = array<i32: 1, 2, 2, 1>} : memref<2x18x18x4xf32, #tpu.memory_space<vmem>>, vector<2x8x8x4xf32>
    %19 = vector.shape_cast %18 : vector<2x8x8x4xf32> to vector<128x4xf32>
    %c0_43 = arith.constant 0 : index
    %c1_44 = arith.constant 1 : index
    %c2_45 = arith.constant 2 : index
    %c0_46 = arith.constant 0 : index
    %20 = tpu.strided_load %arg12[%c0_43, %c1_44, %c2_45, %c0_46] {strides = array<i32: 1, 2, 2, 1>} : memref<2x18x18x4xf32, #tpu.memory_space<vmem>>, vector<2x8x8x4xf32>
    %21 = vector.shape_cast %20 : vector<2x8x8x4xf32> to vector<128x4xf32>
    %c0_47 = arith.constant 0 : index
    %c2_48 = arith.constant 2 : index
    %c0_49 = arith.constant 0 : index
    %c0_50 = arith.constant 0 : index
    %22 = tpu.strided_load %arg12[%c0_47, %c2_48, %c0_49, %c0_50] {strides = array<i32: 1, 2, 2, 1>} : memref<2x18x18x4xf32, #tpu.memory_space<vmem>>, vector<2x8x8x4xf32>
    %23 = vector.shape_cast %22 : vector<2x8x8x4xf32> to vector<128x4xf32>
    %c0_51 = arith.constant 0 : index
    %c2_52 = arith.constant 2 : index
    %c1_53 = arith.constant 1 : index
    %c0_54 = arith.constant 0 : index
    %24 = tpu.strided_load %arg12[%c0_51, %c2_52, %c1_53, %c0_54] {strides = array<i32: 1, 2, 2, 1>} : memref<2x18x18x4xf32, #tpu.memory_space<vmem>>, vector<2x8x8x4xf32>
    %25 = vector.shape_cast %24 : vector<2x8x8x4xf32> to vector<128x4xf32>
    %c0_55 = arith.constant 0 : index
    %c2_56 = arith.constant 2 : index
    %c2_57 = arith.constant 2 : index
    %c0_58 = arith.constant 0 : index
    %26 = tpu.strided_load %arg12[%c0_55, %c2_56, %c2_57, %c0_58] {strides = array<i32: 1, 2, 2, 1>} : memref<2x18x18x4xf32, #tpu.memory_space<vmem>>, vector<2x8x8x4xf32>
    %27 = vector.shape_cast %26 : vector<2x8x8x4xf32> to vector<128x4xf32>
    %28 = tpu.concatenate %11, %13, %15, %17, %19, %21, %23, %25, %27 in 1 : vector<128x4xf32>, vector<128x4xf32>, vector<128x4xf32>, vector<128x4xf32>, vector<128x4xf32>, vector<128x4xf32>, vector<128x4xf32>, vector<128x4xf32>, vector<128x4xf32> -> vector<128x36xf32>
    %c0_59 = arith.constant 0 : index
    %c0_60 = arith.constant 0 : index
    %29 = vector.load %arg2[%c0_59, %c0_60] : memref<36x8xf32, #tpu.memory_space<vmem>>, vector<36x8xf32>
    %cst_61 = arith.constant dense<0.000000e+00> : vector<128x8xf32>
    %30 = tpu.matmul %28, %29, %cst_61 {dimension_numbers = #tpu.dot_dimension_numbers<[1], [0], [0], [1], [0, 0, 1, 1], [], []>} : vector<128x36xf32>, vector<36x8xf32>, vector<128x8xf32> -> vector<128x8xf32>
    %c0_62 = arith.constant 0 : index
    %c0_63 = arith.constant 0 : index
    %31 = vector.load %arg3[%c0_62, %c0_63] : memref<1x8xf32, #tpu.memory_space<vmem>>, vector<1x8xf32>
    %32 = vector.broadcast %31 : vector<1x8xf32> to vector<128x8xf32>
    %33 = arith.mulf %30, %32 : vector<128x8xf32>
    %c0_64 = arith.constant 0 : index
    %c0_65 = arith.constant 0 : index
    %34 = vector.load %arg4[%c0_64, %c0_65] : memref<1x8xf32, #tpu.memory_space<vmem>>, vector<1x8xf32>
    %35 = vector.broadcast %34 : vector<1x8xf32> to vector<128x8xf32>
    %36 = arith.addf %33, %35 : vector<128x8xf32>
    %cst_66 = arith.constant 0.000000e+00 : f32
    %37 = vector.broadcast %cst_66 : f32 to vector<128x8xf32>
    %38 = arith.maximumf %36, %37 : vector<128x8xf32>
    %cst_67 = arith.constant 0.000000e+00 : f32
    %39 = vector.broadcast %cst_67 : f32 to vector<2x1x10x8xf32>
    %c0_68 = arith.constant 0 : index
    %c0_69 = arith.constant 0 : index
    %c0_70 = arith.constant 0 : index
    %c0_71 = arith.constant 0 : index
    %40 = vector.load %arg13[%c0_68, %c0_69, %c0_70, %c0_71] : memref<2x10x10x8xf32, #tpu.memory_space<vmem>>, vector<2x1x10x8xf32>
    tpu.vector_store %arg13[%c0_68, %c0_69, %c0_70, %c0_71], %39 {strides = array<i32>} : memref<2x10x10x8xf32, #tpu.memory_space<vmem>>, vector<2x1x10x8xf32>,
    %cst_72 = arith.constant 0.000000e+00 : f32
    %41 = vector.broadcast %cst_72 : f32 to vector<2x1x10x8xf32>
    %c0_73 = arith.constant 0 : index
    %c9 = arith.constant 9 : index
    %c0_74 = arith.constant 0 : index
    %c0_75 = arith.constant 0 : index
    %42 = vector.load %arg13[%c0_73, %c9, %c0_74, %c0_75] : memref<2x10x10x8xf32, #tpu.memory_space<vmem>>, vector<2x1x10x8xf32>
    tpu.vector_store %arg13[%c0_73, %c9, %c0_74, %c0_75], %41 {strides = array<i32>} : memref<2x10x10x8xf32, #tpu.memory_space<vmem>>, vector<2x1x10x8xf32>,
    %cst_76 = arith.constant 0.000000e+00 : f32
    %43 = vector.broadcast %cst_76 : f32 to vector<2x10x1x8xf32>
    %c0_77 = arith.constant 0 : index
    %c0_78 = arith.constant 0 : index
    %c0_79 = arith.constant 0 : index
    %c0_80 = arith.constant 0 : index
    %44 = vector.load %arg13[%c0_77, %c0_78, %c0_79, %c0_80] : memref<2x10x10x8xf32, #tpu.memory_space<vmem>>, vector<2x10x1x8xf32>
    tpu.vector_store %arg13[%c0_77, %c0_78, %c0_79, %c0_80], %43 {strides = array<i32>} : memref<2x10x10x8xf32, #tpu.memory_space<vmem>>, vector<2x10x1x8xf32>,
    %cst_81 = arith.constant 0.000000e+00 : f32
    %45 = vector.broadcast %cst_81 : f32 to vector<2x10x1x8xf32>
    %c0_82 = arith.constant 0 : index
    %c0_83 = arith.constant 0 : index
    %c9_84 = arith.constant 9 : index
    %c0_85 = arith.constant 0 : index
    %46 = vector.load %arg13[%c0_82, %c0_83, %c9_84, %c0_85] : memref<2x10x10x8xf32, #tpu.memory_space<vmem>>, vector<2x10x1x8xf32>
    tpu.vector_store %arg13[%c0_82, %c0_83, %c9_84, %c0_85], %45 {strides = array<i32>} : memref<2x10x10x8xf32, #tpu.memory_space<vmem>>, vector<2x10x1x8xf32>,
    %47 = vector.shape_cast %38 : vector<128x8xf32> to vector<2x8x8x8xf32>
    %c0_86 = arith.constant 0 : index
    %c1_87 = arith.constant 1 : index
    %c1_88 = arith.constant 1 : index
    %c0_89 = arith.constant 0 : index
    %48 = vector.load %arg13[%c0_86, %c1_87, %c1_88, %c0_89] : memref<2x10x10x8xf32, #tpu.memory_space<vmem>>, vector<2x8x8x8xf32>
    tpu.vector_store %arg13[%c0_86, %c1_87, %c1_88, %c0_89], %47 {strides = array<i32>} : memref<2x10x10x8xf32, #tpu.memory_space<vmem>>, vector<2x8x8x8xf32>,
    %c0_90 = arith.constant 0 : index
    %c0_91 = arith.constant 0 : index
    %c0_92 = arith.constant 0 : index
    %c0_93 = arith.constant 0 : index
    %49 = vector.load %arg13[%c0_90, %c0_91, %c0_92, %c0_93] : memref<2x10x10x8xf32, #tpu.memory_space<vmem>>, vector<2x8x8x8xf32>
    %50 = vector.shape_cast %49 : vector<2x8x8x8xf32> to vector<128x8xf32>
    %c0_94 = arith.constant 0 : index
    %c0_95 = arith.constant 0 : index
    %c1_96 = arith.constant 1 : index
    %c0_97 = arith.constant 0 : index
    %51 = vector.load %arg13[%c0_94, %c0_95, %c1_96, %c0_97] : memref<2x10x10x8xf32, #tpu.memory_space<vmem>>, vector<2x8x8x8xf32>
    %52 = vector.shape_cast %51 : vector<2x8x8x8xf32> to vector<128x8xf32>
    %c0_98 = arith.constant 0 : index
    %c0_99 = arith.constant 0 : index
    %c2_100 = arith.constant 2 : index
    %c0_101 = arith.constant 0 : index
    %53 = vector.load %arg13[%c0_98, %c0_99, %c2_100, %c0_101] : memref<2x10x10x8xf32, #tpu.memory_space<vmem>>, vector<2x8x8x8xf32>
    %54 = vector.shape_cast %53 : vector<2x8x8x8xf32> to vector<128x8xf32>
    %c0_102 = arith.constant 0 : index
    %c1_103 = arith.constant 1 : index
    %c0_104 = arith.constant 0 : index
    %c0_105 = arith.constant 0 : index
    %55 = vector.load %arg13[%c0_102, %c1_103, %c0_104, %c0_105] : memref<2x10x10x8xf32, #tpu.memory_space<vmem>>, vector<2x8x8x8xf32>
    %56 = vector.shape_cast %55 : vector<2x8x8x8xf32> to vector<128x8xf32>
    %c0_106 = arith.constant 0 : index
    %c1_107 = arith.constant 1 : index
    %c1_108 = arith.constant 1 : index
    %c0_109 = arith.constant 0 : index
    %57 = vector.load %arg13[%c0_106, %c1_107, %c1_108, %c0_109] : memref<2x10x10x8xf32, #tpu.memory_space<vmem>>, vector<2x8x8x8xf32>
    %58 = vector.shape_cast %57 : vector<2x8x8x8xf32> to vector<128x8xf32>
    %c0_110 = arith.constant 0 : index
    %c1_111 = arith.constant 1 : index
    %c2_112 = arith.constant 2 : index
    %c0_113 = arith.constant 0 : index
    %59 = vector.load %arg13[%c0_110, %c1_111, %c2_112, %c0_113] : memref<2x10x10x8xf32, #tpu.memory_space<vmem>>, vector<2x8x8x8xf32>
    %60 = vector.shape_cast %59 : vector<2x8x8x8xf32> to vector<128x8xf32>
    %c0_114 = arith.constant 0 : index
    %c2_115 = arith.constant 2 : index
    %c0_116 = arith.constant 0 : index
    %c0_117 = arith.constant 0 : index
    %61 = vector.load %arg13[%c0_114, %c2_115, %c0_116, %c0_117] : memref<2x10x10x8xf32, #tpu.memory_space<vmem>>, vector<2x8x8x8xf32>
    %62 = vector.shape_cast %61 : vector<2x8x8x8xf32> to vector<128x8xf32>
    %c0_118 = arith.constant 0 : index
    %c2_119 = arith.constant 2 : index
    %c1_120 = arith.constant 1 : index
    %c0_121 = arith.constant 0 : index
    %63 = vector.load %arg13[%c0_118, %c2_119, %c1_120, %c0_121] : memref<2x10x10x8xf32, #tpu.memory_space<vmem>>, vector<2x8x8x8xf32>
    %64 = vector.shape_cast %63 : vector<2x8x8x8xf32> to vector<128x8xf32>
    %c0_122 = arith.constant 0 : index
    %c2_123 = arith.constant 2 : index
    %c2_124 = arith.constant 2 : index
    %c0_125 = arith.constant 0 : index
    %65 = vector.load %arg13[%c0_122, %c2_123, %c2_124, %c0_125] : memref<2x10x10x8xf32, #tpu.memory_space<vmem>>, vector<2x8x8x8xf32>
    %66 = vector.shape_cast %65 : vector<2x8x8x8xf32> to vector<128x8xf32>
    %67 = tpu.concatenate %50, %52, %54, %56, %58, %60, %62, %64, %66 in 1 : vector<128x8xf32>, vector<128x8xf32>, vector<128x8xf32>, vector<128x8xf32>, vector<128x8xf32>, vector<128x8xf32>, vector<128x8xf32>, vector<128x8xf32>, vector<128x8xf32> -> vector<128x72xf32>
    %c0_126 = arith.constant 0 : index
    %c0_127 = arith.constant 0 : index
    %68 = vector.load %arg5[%c0_126, %c0_127] : memref<72x8xf32, #tpu.memory_space<vmem>>, vector<72x8xf32>
    %cst_128 = arith.constant dense<0.000000e+00> : vector<128x8xf32>
    %69 = tpu.matmul %67, %68, %cst_128 {dimension_numbers = #tpu.dot_dimension_numbers<[1], [0], [0], [1], [0, 0, 1, 1], [], []>} : vector<128x72xf32>, vector<72x8xf32>, vector<128x8xf32> -> vector<128x8xf32>
    %c0_129 = arith.constant 0 : index
    %c0_130 = arith.constant 0 : index
    %70 = vector.load %arg6[%c0_129, %c0_130] : memref<1x8xf32, #tpu.memory_space<vmem>>, vector<1x8xf32>
    %71 = vector.broadcast %70 : vector<1x8xf32> to vector<128x8xf32>
    %72 = arith.mulf %69, %71 : vector<128x8xf32>
    %c0_131 = arith.constant 0 : index
    %c0_132 = arith.constant 0 : index
    %73 = vector.load %arg7[%c0_131, %c0_132] : memref<1x8xf32, #tpu.memory_space<vmem>>, vector<1x8xf32>
    %74 = vector.broadcast %73 : vector<1x8xf32> to vector<128x8xf32>
    %75 = arith.addf %72, %74 : vector<128x8xf32>
    %c0_133 = arith.constant 0 : index
    %c0_134 = arith.constant 0 : index
    %76 = vector.load %arg8[%c0_133, %c0_134] : memref<4x8xf32, #tpu.memory_space<vmem>>, vector<4x8xf32>
    %cst_135 = arith.constant dense<0.000000e+00> : vector<128x8xf32>
    %77 = tpu.matmul %19, %76, %cst_135 {dimension_numbers = #tpu.dot_dimension_numbers<[1], [0], [0], [1], [0, 0, 1, 1], [], []>} : vector<128x4xf32>, vector<4x8xf32>, vector<128x8xf32> -> vector<128x8xf32>
    %c0_136 = arith.constant 0 : index
    %c0_137 = arith.constant 0 : index
    %78 = vector.load %arg9[%c0_136, %c0_137] : memref<1x8xf32, #tpu.memory_space<vmem>>, vector<1x8xf32>
    %79 = vector.broadcast %78 : vector<1x8xf32> to vector<128x8xf32>
    %80 = arith.mulf %77, %79 : vector<128x8xf32>
    %c0_138 = arith.constant 0 : index
    %c0_139 = arith.constant 0 : index
    %81 = vector.load %arg10[%c0_138, %c0_139] : memref<1x8xf32, #tpu.memory_space<vmem>>, vector<1x8xf32>
    %82 = vector.broadcast %81 : vector<1x8xf32> to vector<128x8xf32>
    %83 = arith.addf %80, %82 : vector<128x8xf32>
    %84 = arith.addf %75, %83 : vector<128x8xf32>
    %cst_140 = arith.constant 0.000000e+00 : f32
    %85 = vector.broadcast %cst_140 : f32 to vector<128x8xf32>
    %86 = arith.maximumf %84, %85 : vector<128x8xf32>
    %87 = vector.shape_cast %86 : vector<128x8xf32> to vector<2x64x8xf32>
    %c0_141 = arith.constant 0 : index
    %c0_142 = arith.constant 0 : index
    %c0_143 = arith.constant 0 : index
    %88 = vector.load %arg11[%c0_141, %c0_142, %c0_143] : memref<2x64x8xf32, #tpu.memory_space<vmem>>, vector<2x64x8xf32>
    tpu.vector_store %arg11[%c0_141, %c0_142, %c0_143], %87 {strides = array<i32>} : memref<2x64x8xf32, #tpu.memory_space<vmem>>, vector<2x64x8xf32>,
    return
  }
  func.func @transform_0(%arg0: i32) -> (i32, i32, i32, i32) {
    %c0_i32 = arith.constant 0 : i32
    %c0_i32_0 = arith.constant 0 : i32
    %c0_i32_1 = arith.constant 0 : i32
    %c0_i32_2 = arith.constant 0 : i32
    return %arg0, %c0_i32, %c0_i32_0, %c0_i32_1 : i32, i32, i32, i32
  }
  func.func @transform_1(%arg0: i32) -> (i32, i32) {
    %c0_i32 = arith.constant 0 : i32
    %c0_i32_0 = arith.constant 0 : i32
    %c0_i32_1 = arith.constant 0 : i32
    return %c0_i32, %c0_i32_0 : i32, i32
  }
  func.func @transform_2(%arg0: i32) -> (i32, i32) {
    %c0_i32 = arith.constant 0 : i32
    %c0_i32_0 = arith.constant 0 : i32
    %c0_i32_1 = arith.constant 0 : i32
    return %c0_i32, %c0_i32_0 : i32, i32
  }
  func.func @transform_3(%arg0: i32) -> (i32, i32) {
    %c0_i32 = arith.constant 0 : i32
    %c0_i32_0 = arith.constant 0 : i32
    %c0_i32_1 = arith.constant 0 : i32
    return %c0_i32, %c0_i32_0 : i32, i32
  }
  func.func @transform_4(%arg0: i32) -> (i32, i32) {
    %c0_i32 = arith.constant 0 : i32
    %c0_i32_0 = arith.constant 0 : i32
    %c0_i32_1 = arith.constant 0 : i32
    return %c0_i32, %c0_i32_0 : i32, i32
  }
  func.func @transform_5(%arg0: i32) -> (i32, i32) {
    %c0_i32 = arith.constant 0 : i32
    %c0_i32_0 = arith.constant 0 : i32
    %c0_i32_1 = arith.constant 0 : i32
    return %c0_i32, %c0_i32_0 : i32, i32
  }
  func.func @transform_6(%arg0: i32) -> (i32, i32) {
    %c0_i32 = arith.constant 0 : i32
    %c0_i32_0 = arith.constant 0 : i32
    %c0_i32_1 = arith.constant 0 : i32
    return %c0_i32, %c0_i32_0 : i32, i32
  }
  func.func @transform_7(%arg0: i32) -> (i32, i32) {
    %c0_i32 = arith.constant 0 : i32
    %c0_i32_0 = arith.constant 0 : i32
    %c0_i32_1 = arith.constant 0 : i32
    return %c0_i32, %c0_i32_0 : i32, i32
  }
  func.func @transform_8(%arg0: i32) -> (i32, i32) {
    %c0_i32 = arith.constant 0 : i32
    %c0_i32_0 = arith.constant 0 : i32
    %c0_i32_1 = arith.constant 0 : i32
    return %c0_i32, %c0_i32_0 : i32, i32
  }
  func.func @transform_9(%arg0: i32) -> (i32, i32) {
    %c0_i32 = arith.constant 0 : i32
    %c0_i32_0 = arith.constant 0 : i32
    %c0_i32_1 = arith.constant 0 : i32
    return %c0_i32, %c0_i32_0 : i32, i32
  }
  func.func @transform_10(%arg0: i32) -> (i32, i32, i32) {
    %c0_i32 = arith.constant 0 : i32
    %c0_i32_0 = arith.constant 0 : i32
    %c0_i32_1 = arith.constant 0 : i32
    return %arg0, %c0_i32, %c0_i32_0 : i32, i32, i32
  }
}

</mosaic_0001>

<bundles_post_ra>
// kernel: tpu_custom_call.1
= control target key start
LH: loop header
LB: loop body
LE: loop exit
PB: predicated region body
PF: predicated region fallthrough
CT: control target
= control target key end

     0   :  { %s3667_s13 = smov 0   ;;  %s5013_s0 = inlined_call_operand.vmem [shape: f32[4,16,16,4], index: 0, kind: input, shape index: {}]   ;;  %s5014_s1 = inlined_call_operand.vmem [shape: f32[36,8], index: 1, kind: input, shape index: {}]   ;;  %s5015_s2 = inlined_call_operand.vmem [shape: f32[1,8], index: 2, kind: input, shape index: {}]   ;;  %s5016_s3 = inlined_call_operand.vmem [shape: f32[1,8], index: 3, kind: input, shape index: {}]   ;;  %s5017_s4 = inlined_call_operand.vmem [shape: f32[72,8], index: 4, kind: input, shape index: {}]   ;;  %s5018_s5 = inlined_call_operand.vmem [shape: f32[1,8], index: 5, kind: input, shape index: {}]   ;;  %s5019_s6 = inlined_call_operand.vmem [shape: f32[1,8], index: 6, kind: input, shape index: {}]   ;;  %s5020_s7 = inlined_call_operand.vmem [shape: f32[4,8], index: 7, kind: input, shape index: {}]   ;;  %s5021_s8 = inlined_call_operand.vmem [shape: f32[1,8], index: 8, kind: input, shape index: {}]   ;;  %s5022_s9 = inlined_call_operand.vmem [shape: f32[1,8], index: 9, kind: input, shape index: {}]   ;;  %s5023_s10 = inlined_call_operand.vmem [shape: f32[4,64,8], index: 10, kind: output, shape index: {}]  }
   0x1 LB: > { %s3316_s14 = sadd.s32 4294967295, %s3597_s13   ;;  %p3320_p0 = scmp.ge.s32.totalorder %s3597_s13, 1  ;;  %s3597_s13 = sphi %s3667_s13, %s20_s13  }
   0x2   : > { %p314_p1 = scmp.lt.s32.totalorder %s3597_s13, 3 }
   0x4   : > { %p315_p2 = pnand %p3320_p0, %p314_p1 }
   0x5   : > { %s3321_s15 = sshll.u32 (!%p315_p2), %s3316_s14, 1  ;;  %s3600_s20 = smov (!%p315_p2), 4  }
   0x6   : > { %318 = sbr.rel (%p315_p2) target bundleno = 1010 (0x3f2), region = 60  ;;  %p355_p3 = scmp.lt.s32.totalorder (!%p315_p2), %s3321_s15, 3 }
   0x7   : > { %s3601_s21 = smov (!%p315_p2), 8   ;;  %s3602_s22 = smov (!%p315_p2), 12  }
   0x8   : > { %s3603_s23 = smov (!%p315_p2), 16   ;;  %s3604_s24 = smov (!%p315_p2), 20  }
   0x9   : > { %s3605_s25 = smov (!%p315_p2), 24   ;;  %s3606_s26 = smov (!%p315_p2), 28  }
   0xa   : > { %s3607_s17 = smov (!%p315_p2), 32   ;;  %s3609_s28 = smov (!%p315_p2), 48  }
   0xb   : > { %vm368_vm0 = vcmask 31744   ;;  %vm371_vm1 = vcmask 25600   ;;  %vm383_vm2 = vcmask 24576   ;;  %v3599_v0 = vmov 0.0   ;;  %s5025_s15 = smov (!%p355_p3, %s3321_s15), 3  ;;  %s3610_s29 = smov 56  }
   0xc   : > { %369 = vst.msk [vmem:[#allocation2] sm:$0xff] %vm368_vm0, %v3599_v0  ;;  %370 = vst.msk [vmem:[#allocation2 + $0x8] sm:$0xff] %vm368_vm0, %v3599_v0  ;;  %vm1399_vm3 = vcmask 64512   ;;  %s3385_s16 = sshll.u32 %s5025_s15, 8  ;;  %vm1572_vm4 = vcmask 1043456   ;;  %vm1416_vm5 = vcmask 97280  }
   0xd   : > { %373 = vst.msk [vmem:[#allocation2 + $0x1b0] sm:$0xff] %vm368_vm0, %v3599_v0  ;;  %374 = vst.msk [vmem:[#allocation2 + $0x1b8] sm:$0xff] %vm368_vm0, %v3599_v0  ;;  %s3769_s19 = scalar_lea.vmem %s5013_s0, %s3385_s16  ;;  %v1522_v63 = vld [vmem:[%s5014_s1 + $0x20] sm:$0xf]  ;;  %vm1433_vm6 = vcmask 130048   ;;  %vm1450_vm7 = vcmask 162816  }
   0xe   : > { %372 = vst.msk [vmem:[#allocation2 + $0x10] sm:$0x3] %vm371_vm1, %v3599_v0  ;;  %375 = vst.msk [vmem:[#allocation2 + $0x1c0] sm:$0x3] %vm371_vm1, %v3599_v0  ;;  %v458_v3 = vld [vmem:[%s3769_s19 + $0x10] sm:$0xff]  ;;  %v459_v4 = vld [vmem:[%s3769_s19 + $0x18] sm:$0xff]  ;;  %3450 = vmatprep.subr.msk.mxu0 %vm1572_vm4, %v1522_v63 }
   0xf   : > { %385 = vst.msk [vmem:[#allocation2 + $0x18] sm:$0x1] %vm383_vm2, %v3599_v0  ;;  %386 = vst.msk [vmem:[#allocation2 + $0x30] sm:$0x1] %vm383_vm2, %v3599_v0  ;;  %v460_v5 = vld [vmem:[%s3769_s19 + $0x20] sm:$0xff]  ;;  %v461_v6 = vld [vmem:[%s3769_s19 + $0x28] sm:$0xff]  ;;  %3451 = vmatpush3.msk.msra.mxu0 %vm1572_vm4, %v1522_v63 }
  0x10   : > { %387 = vst.msk [vmem:[#allocation2 + $0x48] sm:$0x1] %vm383_vm2, %v3599_v0  ;;  %388 = vst.msk [vmem:[#allocation2 + $0x60] sm:$0x1] %vm383_vm2, %v3599_v0  ;;  %v456_v7 = vld [vmem:[%s3769_s19] sm:$0xff]  ;;  %v457_v8 = vld [vmem:[%s3769_s19 + $0x8] sm:$0xff] }
  0x11   : > { %389 = vst.msk [vmem:[#allocation2 + $0x78] sm:$0x1] %vm383_vm2, %v3599_v0  ;;  %390 = vst.msk [vmem:[#allocation2 + $0x90] sm:$0x1] %vm383_vm2, %v3599_v0  ;;  %v462_v9 = vld [vmem:[%s3769_s19 + $0x30] sm:$0xff]  ;;  %v463_v10 = vld [vmem:[%s3769_s19 + $0x38] sm:$0xff] }
  0x12   : > { %391 = vst.msk [vmem:[#allocation2 + $0xa8] sm:$0x1] %vm383_vm2, %v3599_v0  ;;  %392 = vst.msk [vmem:[#allocation2 + $0xc0] sm:$0x1] %vm383_vm2, %v3599_v0  ;;  %v466_v11 = vld [vmem:[%s3769_s19 + $0x50] sm:$0xff]  ;;  %v467_v12 = vld [vmem:[%s3769_s19 + $0x58] sm:$0xff] }
  0x13   : > { %393 = vst.msk [vmem:[#allocation2 + $0xd8] sm:$0x1] %vm383_vm2, %v3599_v0  ;;  %394 = vst.msk [vmem:[#allocation2 + $0xf0] sm:$0x1] %vm383_vm2, %v3599_v0  ;;  %v617_v1 = vld [vmem:[#allocation2 + $0x1] ss:$2 sm:$0xff] }
  0x14   : > { %395 = vst.msk [vmem:[#allocation2 + $0x108] sm:$0x1] %vm383_vm2, %v3599_v0  ;;  %396 = vst.msk [vmem:[#allocation2 + $0x120] sm:$0x1] %vm383_vm2, %v3599_v0  ;;  %887 = vrot.lane.b32.xlu0 %v617_v1, %s3600_s20  ;;  %v464_v13 = vld [vmem:[%s3769_s19 + $0x40] sm:$0xff]  ;;  %v465_v14 = vld [vmem:[%s3769_s19 + $0x48] sm:$0xff] }
  0x15   : > { %397 = vst.msk [vmem:[#allocation2 + $0x138] sm:$0x1] %vm383_vm2, %v3599_v0  ;;  %398 = vst.msk [vmem:[#allocation2 + $0x150] sm:$0x1] %vm383_vm2, %v3599_v0  ;;  %v649_v2 = vld [vmem:[#allocation2 + $0x2] ss:$2 sm:$0xff] }
  0x16   : > { %399 = vst.msk [vmem:[#allocation2 + $0x168] sm:$0x1] %vm383_vm2, %v3599_v0  ;;  %400 = vst.msk [vmem:[#allocation2 + $0x180] sm:$0x1] %vm383_vm2, %v3599_v0  ;;  %951 = vrot.lane.b32.xlu1 %v649_v2, %s3601_s21  ;;  %v468_v15 = vld [vmem:[%s3769_s19 + $0x60] sm:$0xff]  ;;  %v469_v16 = vld [vmem:[%s3769_s19 + $0x68] sm:$0xff] }
  0x17   : > { %403 = vst.msk [vmem:[#allocation2 + $0x1c8] sm:$0x1] %vm383_vm2, %v3599_v0  ;;  %404 = vst.msk [vmem:[#allocation2 + $0x1e0] sm:$0x1] %vm383_vm2, %v3599_v0  ;;  %v470_v17 = vld [vmem:[%s3769_s19 + $0x70] sm:$0xff]  ;;  %v471_v18 = vld [vmem:[%s3769_s19 + $0x78] sm:$0xff] }
  0x18   : > { %405 = vst.msk [vmem:[#allocation2 + $0x1f8] sm:$0x1] %vm383_vm2, %v3599_v0  ;;  %406 = vst.msk [vmem:[#allocation2 + $0x210] sm:$0x1] %vm383_vm2, %v3599_v0  ;;  %v474_v19 = vld [vmem:[%s3769_s19 + $0x90] sm:$0xff]  ;;  %v475_v20 = vld [vmem:[%s3769_s19 + $0x98] sm:$0xff] }
  0x19   : > { %407 = vst.msk [vmem:[#allocation2 + $0x228] sm:$0x1] %vm383_vm2, %v3599_v0  ;;  %408 = vst.msk [vmem:[#allocation2 + $0x240] sm:$0x1] %vm383_vm2, %v3599_v0  ;;  %v472_v21 = vld [vmem:[%s3769_s19 + $0x80] sm:$0xff]  ;;  %v473_v22 = vld [vmem:[%s3769_s19 + $0x88] sm:$0xff] }
  0x1a   : > { %409 = vst.msk [vmem:[#allocation2 + $0x258] sm:$0x1] %vm383_vm2, %v3599_v0  ;;  %410 = vst.msk [vmem:[#allocation2 + $0x270] sm:$0x1] %vm383_vm2, %v3599_v0  ;;  %v476_v23 = vld [vmem:[%s3769_s19 + $0xa0] sm:$0xff]  ;;  %v477_v24 = vld [vmem:[%s3769_s19 + $0xa8] sm:$0xff] }
  0x1b   : > { %411 = vst.msk [vmem:[#allocation2 + $0x288] sm:$0x1] %vm383_vm2, %v3599_v0  ;;  %412 = vst.msk [vmem:[#allocation2 + $0x2a0] sm:$0x1] %vm383_vm2, %v3599_v0  ;;  %v478_v25 = vld [vmem:[%s3769_s19 + $0xb0] sm:$0xff]  ;;  %v479_v26 = vld [vmem:[%s3769_s19 + $0xb8] sm:$0xff] }
  0x1c   : > { %413 = vst.msk [vmem:[#allocation2 + $0x2b8] sm:$0x1] %vm383_vm2, %v3599_v0  ;;  %414 = vst.msk [vmem:[#allocation2 + $0x2d0] sm:$0x1] %vm383_vm2, %v3599_v0  ;;  %v482_v35 = vld [vmem:[%s3769_s19 + $0xd0] sm:$0xff]  ;;  %v483_v38 = vld [vmem:[%s3769_s19 + $0xd8] sm:$0xff] }
  0x1d   : > { %415 = vst.msk [vmem:[#allocation2 + $0x2e8] sm:$0x1] %vm383_vm2, %v3599_v0  ;;  %416 = vst.msk [vmem:[#allocation2 + $0x300] sm:$0x1] %vm383_vm2, %v3599_v0  ;;  %v480_v39 = vld [vmem:[%s3769_s19 + $0xc0] sm:$0xff]  ;;  %v481_v40 = vld [vmem:[%s3769_s19 + $0xc8] sm:$0xff] }
  0x1e   : > { %417 = vst.msk [vmem:[#allocation2 + $0x318] sm:$0x1] %vm383_vm2, %v3599_v0  ;;  %418 = vst.msk [vmem:[#allocation2 + $0x330] sm:$0x1] %vm383_vm2, %v3599_v0  ;;  %v484_v41 = vld [vmem:[%s3769_s19 + $0xe0] sm:$0xff]  ;;  %v485_v42 = vld [vmem:[%s3769_s19 + $0xe8] sm:$0xff] }
  0x1f   : > { %384 = vst.msk [vmem:[#allocation2] sm:$0x1] %vm383_vm2, %v3599_v0  ;;  %402 = vst.msk [vmem:[#allocation2 + $0x1b0] sm:$0x1] %vm383_vm2, %v3599_v0  ;;  %v490_v45 = vld [vmem:[%s3769_s19 + $0x110] sm:$0xff]  ;;  %v491_v46 = vld [vmem:[%s3769_s19 + $0x118] sm:$0xff] }
  0x20   : > { %1783 = vst.msk [vmem:[#allocation3] sm:$0xff] %vm1399_vm3, %v3599_v0  ;;  %1786 = vst.msk [vmem:[#allocation3 + $0xa0] sm:$0xff] %vm1399_vm3, %v3599_v0  ;;  %v488_v47 = vld [vmem:[%s3769_s19 + $0x100] sm:$0xff]  ;;  %v489_v48 = vld [vmem:[%s3769_s19 + $0x108] sm:$0xff]  ;;  %vm1467_vm8 = vcmask 195584   ;;  %vm1484_vm9 = vcmask 228352  }
  0x21   : > { %1789 = vst.msk [vmem:[#allocation3 + $0x90] sm:$0xff] %vm1399_vm3, %v3599_v0  ;;  %1791 = vst.msk [vmem:[#allocation3 + $0x130] sm:$0xff] %vm1399_vm3, %v3599_v0  ;;  %v486_v49 = vld [vmem:[%s3769_s19 + $0xf0] sm:$0xff]  ;;  %v487_v50 = vld [vmem:[%s3769_s19 + $0xf8] sm:$0xff]  ;;  %vm1501_vm10 = vcmask 261120   ;;  %vm1523_vm11 = vcmask 293888  }
  0x22   : > { %523 = vst.msk [vmem:[#allocation2 + $0x31] sm:$0xff] %vm368_vm0, %v458_v3  ;;  %524 = vst.msk [vmem:[#allocation2 + $0x39] sm:$0xff] %vm368_vm0, %v459_v4  ;;  %v492_v51 = vld [vmem:[%s3769_s19 + $0x120] sm:$0xff]  ;;  %v493_v56 = vld [vmem:[%s3769_s19 + $0x128] sm:$0xff]  ;;  %vm1784_vm12 = vcmask 58368   ;;  %vm1793_vm13 = vcmask 57344  }
  0x23   : > { %525 = vst.msk [vmem:[#allocation2 + $0x49] sm:$0xff] %vm368_vm0, %v460_v5  ;;  %526 = vst.msk [vmem:[#allocation2 + $0x51] sm:$0xff] %vm368_vm0, %v461_v6  ;;  %v494_v57 = vld [vmem:[%s3769_s19 + $0x130] sm:$0xff]  ;;  %v495_v58 = vld [vmem:[%s3769_s19 + $0x138] sm:$0xff]  ;;  %s3611_s30 = smov 64   ;;  %vm2572_vm14 = vcmask 326656  }
  0x24   : > { %521 = vst.msk [vmem:[#allocation2 + $0x19] sm:$0xff] %vm368_vm0, %v456_v7  ;;  %522 = vst.msk [vmem:[#allocation2 + $0x21] sm:$0xff] %vm368_vm0, %v457_v8  ;;  %v498_v59 = vld [vmem:[%s3769_s19 + $0x150] sm:$0xff]  ;;  %v499_v60 = vld [vmem:[%s3769_s19 + $0x158] sm:$0xff]  ;;  %vm2589_vm15 = vcmask 392192   ;;  %vm2606_vm1 = vcmask 457728  }
  0x25   : > { %527 = vst.msk [vmem:[#allocation2 + $0x61] sm:$0xff] %vm368_vm0, %v462_v9  ;;  %528 = vst.msk [vmem:[#allocation2 + $0x69] sm:$0xff] %vm368_vm0, %v463_v10  ;;  %v1521_v1 = vld [vmem:[%s5014_s1 + $0x18] sm:$0xff]  ;;  %v496_v2 = vld [vmem:[%s3769_s19 + $0x140] sm:$0xff]  ;;  %vm2623_vm2 = vcmask 523264   ;;  %s3386_s11 = sshll.u32 %s5025_s15, 6 }
  0x26   : > { %531 = vst.msk [vmem:[#allocation2 + $0x91] sm:$0xff] %vm368_vm0, %v466_v11  ;;  %532 = vst.msk [vmem:[#allocation2 + $0x99] sm:$0xff] %vm368_vm0, %v467_v12  ;;  %v497_v3 = vld [vmem:[%s3769_s19 + $0x148] sm:$0xff]  ;;  %v1520_v4 = vld [vmem:[%s5014_s1 + $0x10] sm:$0xff]  ;;  %3452 = vmatprep.subr.mxu0 %v1521_v1  ;;  %s4905_s14 = scalar_lea.vmem %s5023_s10, %s3386_s11 }
  0x27   : > { %529 = vst.msk [vmem:[#allocation2 + $0x79] sm:$0xff] %vm368_vm0, %v464_v13  ;;  %530 = vst.msk [vmem:[#allocation2 + $0x81] sm:$0xff] %vm368_vm0, %v465_v14  ;;  %3453 = vmatpush3.msra.mxu0 %v1521_v1  ;;  %v1519_v7 = vld [vmem:[%s5014_s1 + $0x8] sm:$0xff]  ;;  %v500_v8 = vld [vmem:[%s3769_s19 + $0x160] sm:$0xff] }
  0x28   : > { %533 = vst.msk [vmem:[#allocation2 + $0xa9] sm:$0xff] %vm368_vm0, %v468_v15  ;;  %534 = vst.msk [vmem:[#allocation2 + $0xb1] sm:$0xff] %vm368_vm0, %v469_v16  ;;  %3454 = vmatprep.subr.mxu0 %v1520_v4  ;;  %v501_v9 = vld [vmem:[%s3769_s19 + $0x168] sm:$0xff]  ;;  %v502_v10 = vld [vmem:[%s3769_s19 + $0x170] sm:$0xff] }
  0x29   : > { %535 = vst.msk [vmem:[#allocation2 + $0xc1] sm:$0xff] %vm368_vm0, %v470_v17  ;;  %536 = vst.msk [vmem:[#allocation2 + $0xc9] sm:$0xff] %vm368_vm0, %v471_v18  ;;  %v651_v27 = vld [vmem:[#allocation2 + $0x32] ss:$2 sm:$0xff]  ;;  %v619_v28 = vld [vmem:[#allocation2 + $0x31] ss:$2 sm:$0xff]  ;;  %3455 = vmatpush3.msra.mxu0 %v1520_v4 }
  0x2a   : > { %539 = vst.msk [vmem:[#allocation2 + $0xf1] sm:$0xff] %vm368_vm0, %v474_v19  ;;  %540 = vst.msk [vmem:[#allocation2 + $0xf9] sm:$0xff] %vm368_vm0, %v475_v20  ;;  %953 = vrot.lane.b32.xlu1 %v651_v27, %s3601_s21  ;;  %889 = vrot.lane.b32.xlu0 %v619_v28, %s3600_s20  ;;  %v682_v29 = vld [vmem:[#allocation2 + $0x48] ss:$2 sm:$0xff]  ;;  %v714_v34 = vld [vmem:[#allocation2 + $0x49] ss:$2 sm:$0xff] }
  0x2b   : > { %537 = vst.msk [vmem:[#allocation2 + $0xd9] sm:$0xff] %vm368_vm0, %v472_v21  ;;  %538 = vst.msk [vmem:[#allocation2 + $0xe1] sm:$0xff] %vm368_vm0, %v473_v22  ;;  %v680_v30 = vld [vmem:[#allocation2 + $0x18] ss:$2 sm:$0xff]  ;;  %v712_v32 = vld [vmem:[#allocation2 + $0x19] ss:$2 sm:$0xff]  ;;  %3456 = vmatprep.subr.mxu0 %v1519_v7 }
  0x2c   : > { %541 = vst.msk [vmem:[#allocation2 + $0x109] sm:$0xff] %vm368_vm0, %v476_v23  ;;  %542 = vst.msk [vmem:[#allocation2 + $0x111] sm:$0xff] %vm368_vm0, %v477_v24  ;;  %v621_v31 = vld [vmem:[#allocation2 + $0x61] ss:$2 sm:$0xff]  ;;  %v744_v33 = vld [vmem:[#allocation2 + $0x1a] ss:$2 sm:$0xff]  ;;  %3457 = vmatpush3.msra.mxu0 %v1519_v7 }
  0x2d   : > { %543 = vst.msk [vmem:[#allocation2 + $0x121] sm:$0xff] %vm368_vm0, %v478_v25  ;;  %544 = vst.msk [vmem:[#allocation2 + $0x129] sm:$0xff] %vm368_vm0, %v479_v26  ;;  %v653_v36 = vld [vmem:[#allocation2 + $0x62] ss:$2 sm:$0xff]  ;;  %v623_v37 = vld [vmem:[#allocation2 + $0x91] ss:$2 sm:$0xff] }
  0x2e   : > { %1017 = vrot.lane.b32.xlu1 %v682_v29, %s3602_s22  ;;  %1015 = vrot.lane.b32.xlu0 %v680_v30, %s3602_s22  ;;  %547 = vst.msk [vmem:[#allocation2 + $0x151] sm:$0xff] %vm368_vm0, %v482_v35  ;;  %548 = vst.msk [vmem:[#allocation2 + $0x159] sm:$0xff] %vm368_vm0, %v483_v38  ;;  %v776_v43 = vld [vmem:[#allocation2 + $0x30] ss:$2 sm:$0xff]  ;;  %v808_v54 = vld [vmem:[#allocation2 + $0x31] ss:$2 sm:$0xff] }
  0x2f   : > { %545 = vst.msk [vmem:[#allocation2 + $0x139] sm:$0xff] %vm368_vm0, %v480_v39  ;;  %546 = vst.msk [vmem:[#allocation2 + $0x141] sm:$0xff] %vm368_vm0, %v481_v40  ;;  %v746_v44 = vld [vmem:[#allocation2 + $0x4a] ss:$2 sm:$0xff]  ;;  %v716_v61 = vld [vmem:[#allocation2 + $0x79] ss:$2 sm:$0xff] }
  0x30   : > { %549 = vst.msk [vmem:[#allocation2 + $0x169] sm:$0xff] %vm368_vm0, %v484_v41  ;;  %550 = vst.msk [vmem:[#allocation2 + $0x171] sm:$0xff] %vm368_vm0, %v485_v42  ;;  %v684_v52 = vld [vmem:[#allocation2 + $0x78] ss:$2 sm:$0xff]  ;;  %v686_v62 = vld [vmem:[#allocation2 + $0xa8] ss:$2 sm:$0xff] }
  0x31   : > { %555 = vst.msk [vmem:[#allocation2 + $0x1e1] sm:$0xff] %vm368_vm0, %v490_v45  ;;  %556 = vst.msk [vmem:[#allocation2 + $0x1e9] sm:$0xff] %vm368_vm0, %v491_v46  ;;  %v655_v53 = vld [vmem:[#allocation2 + $0x92] ss:$2 sm:$0xff]  ;;  %v810_v6 = vld [vmem:[#allocation2 + $0x61] ss:$2 sm:$0xff] }
  0x32   : > { %891 = vrot.lane.b32.xlu1 %v621_v31, %s3600_s20  ;;  %1079 = vrot.lane.b32.xlu0 %v712_v32, %s3603_s23  ;;  %553 = vst.msk [vmem:[#allocation2 + $0x1c9] sm:$0xff] %vm368_vm0, %v488_v47  ;;  %554 = vst.msk [vmem:[#allocation2 + $0x1d1] sm:$0xff] %vm368_vm0, %v489_v48  ;;  %v778_v55 = vld [vmem:[#allocation2 + $0x60] ss:$2 sm:$0xff]  ;;  %v718_v11 = vld [vmem:[#allocation2 + $0xa9] ss:$2 sm:$0xff] }
  0x33   : > { %551 = vst.msk [vmem:[#allocation2 + $0x181] sm:$0xff] %vm368_vm0, %v486_v49  ;;  %552 = vst.msk [vmem:[#allocation2 + $0x189] sm:$0xff] %vm368_vm0, %v487_v50  ;;  %v840_v5 = vld [vmem:[#allocation2 + $0x32] ss:$2 sm:$0xff]  ;;  %v625_v12 = vld [vmem:[#allocation2 + $0xc1] ss:$2 sm:$0xff] }
  0x34   : > { %557 = vst.msk [vmem:[#allocation2 + $0x1f9] sm:$0xff] %vm368_vm0, %v492_v51  ;;  %558 = vst.msk [vmem:[#allocation2 + $0x201] sm:$0xff] %vm368_vm0, %v493_v56  ;;  %v503_v13 = vld [vmem:[%s3769_s19 + $0x178] sm:$0xff]  ;;  %v1518_v14 = vld [vmem:[%s5014_s1] sm:$0xff] }
  0x35   : > { %559 = vst.msk [vmem:[#allocation2 + $0x211] sm:$0xff] %vm368_vm0, %v494_v57  ;;  %560 = vst.msk [vmem:[#allocation2 + $0x219] sm:$0xff] %vm368_vm0, %v495_v58  ;;  %v506_v15 = vld [vmem:[%s3769_s19 + $0x190] sm:$0xff]  ;;  %v507_v16 = vld [vmem:[%s3769_s19 + $0x198] sm:$0xff]  ;;  %3458 = vmatprep.subr.mxu0 %v1518_v14 }
  0x36   : > { %1143 = vrot.lane.b32.xlu1 %v744_v33, %s3604_s24  ;;  %1081 = vrot.lane.b32.xlu0 %v714_v34, %s3603_s23  ;;  %563 = vst.msk [vmem:[#allocation2 + $0x241] sm:$0xff] %vm368_vm0, %v498_v59  ;;  %564 = vst.msk [vmem:[#allocation2 + $0x249] sm:$0xff] %vm368_vm0, %v499_v60  ;;  %v842_v17 = vld [vmem:[#allocation2 + $0x62] ss:$2 sm:$0xff]  ;;  %v627_v20 = vld [vmem:[#allocation2 + $0xf1] ss:$2 sm:$0xff] }
  0x37   : > { %561 = vst.msk [vmem:[#allocation2 + $0x229] sm:$0xff] %vm368_vm0, %v496_v2  ;;  %562 = vst.msk [vmem:[#allocation2 + $0x231] sm:$0xff] %vm368_vm0, %v497_v3  ;;  %v748_v18 = vld [vmem:[#allocation2 + $0x7a] ss:$2 sm:$0xff]  ;;  %3459 = vmatpush3.msra.mxu0 %v1518_v14  ;;  %v750_v24 = vld [vmem:[#allocation2 + $0xaa] ss:$2 sm:$0xff] }
  0x38   : > { %565 = vst.msk [vmem:[#allocation2 + $0x259] sm:$0xff] %vm368_vm0, %v500_v8  ;;  %566 = vst.msk [vmem:[#allocation2 + $0x261] sm:$0xff] %vm368_vm0, %v501_v9  ;;  %v657_v19 = vld [vmem:[#allocation2 + $0xc2] ss:$2 sm:$0xff]  ;;  %v659_v26 = vld [vmem:[#allocation2 + $0xf2] ss:$2 sm:$0xff] }
  0x39   : > { %567 = vst.msk [vmem:[#allocation2 + $0x271] sm:$0xff] %vm368_vm0, %v502_v10  ;;  %568 = vst.msk [vmem:[#allocation2 + $0x279] sm:$0xff] %vm368_vm0, %v503_v13  ;;  %v504_v21 = vld [vmem:[%s3769_s19 + $0x180] sm:$0xff]  ;;  %v505_v22 = vld [vmem:[%s3769_s19 + $0x188] sm:$0xff] }
  0x3a   : > { %955 = vrot.lane.b32.xlu1 %v653_v36, %s3601_s21  ;;  %893 = vrot.lane.b32.xlu0 %v623_v37, %s3600_s20  ;;  %571 = vst.msk [vmem:[#allocation2 + $0x2a1] sm:$0xff] %vm368_vm0, %v506_v15  ;;  %572 = vst.msk [vmem:[#allocation2 + $0x2a9] sm:$0xff] %vm368_vm0, %v507_v16  ;;  %v780_v23 = vld [vmem:[#allocation2 + $0x90] ss:$2 sm:$0xff]  ;;  %v508_v27 = vld [vmem:[%s3769_s19 + $0x1a0] sm:$0xff] }
  0x3b   : > { %569 = vst.msk [vmem:[#allocation2 + $0x289] sm:$0xff] %vm368_vm0, %v504_v21  ;;  %570 = vst.msk [vmem:[#allocation2 + $0x291] sm:$0xff] %vm368_vm0, %v505_v22  ;;  %v688_v25 = vld [vmem:[#allocation2 + $0xd8] ss:$2 sm:$0xff]  ;;  %v812_v28 = vld [vmem:[#allocation2 + $0x91] ss:$2 sm:$0xff] }
  0x3c   : > { %v782_v29 = vld [vmem:[#allocation2 + $0xc0] ss:$2 sm:$0xff]  ;;  %573 = vst.msk [vmem:[#allocation2 + $0x2b9] sm:$0xff] %vm368_vm0, %v508_v27  ;;  %v720_v31 = vld [vmem:[#allocation2 + $0xd9] ss:$2 sm:$0xff]  ;;  %v510_v33 = vld [vmem:[%s3769_s19 + $0x1b0] sm:$0xff] }
  0x3d   : > { %v509_v30 = vld [vmem:[%s3769_s19 + $0x1a8] sm:$0xff]  ;;  %v511_v34 = vld [vmem:[%s3769_s19 + $0x1b8] sm:$0xff]  ;;  %575 = vst.msk [vmem:[#allocation2 + $0x2d1] sm:$0xff] %vm368_vm0, %v510_v33  ;;  %v514_v39 = vld [vmem:[%s3769_s19 + $0x1d0] sm:$0xff] }
  0x3e   : > { %1207 = vrot.lane.b32.xlu1 %v776_v43, %s3605_s25  ;;  %1145 = vrot.lane.b32.xlu0 %v746_v44, %s3604_s24  ;;  %574 = vst.msk [vmem:[#allocation2 + $0x2c1] sm:$0xff] %vm368_vm0, %v509_v30  ;;  %v690_v32 = vld [vmem:[#allocation2 + $0x108] ss:$2 sm:$0xff]  ;;  %v814_v36 = vld [vmem:[#allocation2 + $0xc1] ss:$2 sm:$0xff]  ;;  %576 = vst.msk [vmem:[#allocation2 + $0x2d9] sm:$0xff] %vm368_vm0, %v511_v34 }
  0x3f   : > { %v844_v35 = vld [vmem:[#allocation2 + $0x92] ss:$2 sm:$0xff]  ;;  %v722_v37 = vld [vmem:[#allocation2 + $0x109] ss:$2 sm:$0xff]  ;;  %v846_v41 = vld [vmem:[#allocation2 + $0xc2] ss:$2 sm:$0xff] }
  0x40   : > { %v629_v38 = vld [vmem:[#allocation2 + $0x121] ss:$2 sm:$0xff]  ;;  %v515_v40 = vld [vmem:[%s3769_s19 + $0x1d8] sm:$0xff]  ;;  %579 = vst.msk [vmem:[#allocation2 + $0x301] sm:$0xff] %vm368_vm0, %v514_v39  ;;  %v661_v43 = vld [vmem:[#allocation2 + $0x122] ss:$2 sm:$0xff] }
  0x41   : > { %v752_v42 = vld [vmem:[#allocation2 + $0xda] ss:$2 sm:$0xff]  ;;  %580 = vst.msk [vmem:[#allocation2 + $0x309] sm:$0xff] %vm368_vm0, %v515_v40  ;;  %v631_v44 = vld [vmem:[#allocation2 + $0x151] ss:$2 sm:$0xff] }
  0x42   : > { %1019 = vrot.lane.b32.xlu1 %v684_v52, %s3602_s22  ;;  %957 = vrot.lane.b32.xlu0 %v655_v53, %s3601_s21  ;;  %v512_v45 = vld [vmem:[%s3769_s19 + $0x1c0] sm:$0xff]  ;;  %v513_v46 = vld [vmem:[%s3769_s19 + $0x1c8] sm:$0xff]  ;;  %v784_v47 = vld [vmem:[#allocation2 + $0xf0] ss:$2 sm:$0xff]  ;;  %1785 = vst.msk [vmem:[#allocation3 + $0x8] sm:$0x3] %vm1784_vm12, %v3599_v0 }
  0x43   : > { %v754_v48 = vld [vmem:[#allocation2 + $0x10a] ss:$2 sm:$0xff]  ;;  %577 = vst.msk [vmem:[#allocation2 + $0x2e9] sm:$0xff] %vm368_vm0, %v512_v45  ;;  %578 = vst.msk [vmem:[#allocation2 + $0x2f1] sm:$0xff] %vm368_vm0, %v513_v46  ;;  %v516_v51 = vld [vmem:[%s3769_s19 + $0x1e0] sm:$0xff] }
  0x44   : > { %v692_v49 = vld [vmem:[#allocation2 + $0x138] ss:$2 sm:$0xff]  ;;  %v816_v52 = vld [vmem:[#allocation2 + $0xf1] ss:$2 sm:$0xff]  ;;  %581 = vst.msk [vmem:[#allocation2 + $0x319] sm:$0xff] %vm368_vm0, %v516_v51 }
  0x45   : > { %v663_v50 = vld [vmem:[#allocation2 + $0x152] ss:$2 sm:$0xff]  ;;  %v818_v58 = vld [vmem:[#allocation2 + $0x121] ss:$2 sm:$0xff]  ;;  %v633_v60 = vld [vmem:[#allocation2 + $0x1b1] ss:$2 sm:$0xff] }
  0x46   : > { %1271 = vrot.lane.b32.xlu1 %v808_v54, %s3606_s26  ;;  %1209 = vrot.lane.b32.xlu0 %v778_v55, %s3605_s25  ;;  %v786_v53 = vld [vmem:[#allocation2 + $0x120] ss:$2 sm:$0xff]  ;;  %v724_v55 = vld [vmem:[#allocation2 + $0x139] ss:$2 sm:$0xff]  ;;  %v726_v59 = vld [vmem:[#allocation2 + $0x169] ss:$2 sm:$0xff] }
  0x47   : > { %v517_v54 = vld [vmem:[%s3769_s19 + $0x1e8] sm:$0xff]  ;;  %v848_v57 = vld [vmem:[#allocation2 + $0xf2] ss:$2 sm:$0xff]  ;;  %v820_v14 = vld [vmem:[#allocation2 + $0x151] ss:$2 sm:$0xff] }
  0x48   : > { %582 = vst.msk [vmem:[#allocation2 + $0x321] sm:$0xff] %vm368_vm0, %v517_v54  ;;  %v694_v56 = vld [vmem:[#allocation2 + $0x168] ss:$2 sm:$0xff]  ;;  %v637_v27 = vld [vmem:[#allocation2 + $0x211] ss:$2 sm:$0xff] }
  0x49   : > { %v850_v63 = vld [vmem:[#allocation2 + $0x122] ss:$2 sm:$0xff]  ;;  %v665_v4 = vld [vmem:[#allocation2 + $0x1b2] ss:$2 sm:$0xff]  ;;  %1787 = vst.msk [vmem:[#allocation3 + $0xa8] sm:$0x3] %vm1784_vm12, %v3599_v0 }
  0x4a   : > { %1083 = vrot.lane.b32.xlu1 %v716_v61, %s3603_s23  ;;  %1021 = vrot.lane.b32.xlu0 %v686_v62, %s3602_s22  ;;  %v518_v61 = vld [vmem:[%s3769_s19 + $0x1f0] sm:$0xff]  ;;  %v519_v62 = vld [vmem:[%s3769_s19 + $0x1f8] sm:$0xff]  ;;  %v790_v15 = vld [vmem:[#allocation2 + $0x180] ss:$2 sm:$0xff]  ;;  %1790 = vst.msk [vmem:[#allocation3 + $0x98] sm:$0x3] %vm1784_vm12, %v3599_v0 }
  0x4b   : > { %v756_v1 = vld [vmem:[#allocation2 + $0x13a] ss:$2 sm:$0xff]  ;;  %583 = vst.msk [vmem:[#allocation2 + $0x331] sm:$0xff] %vm368_vm0, %v518_v61  ;;  %584 = vst.msk [vmem:[#allocation2 + $0x339] sm:$0xff] %vm368_vm0, %v519_v62  ;;  %v758_v7 = vld [vmem:[#allocation2 + $0x16a] ss:$2 sm:$0xff] }
  0x4c   : > { %v696_v10 = vld [vmem:[#allocation2 + $0x1c8] ss:$2 sm:$0xff]  ;;  %1792 = vst.msk [vmem:[#allocation3 + $0x138] sm:$0x3] %vm1784_vm12, %v3599_v0 }
  0x4d   : > { %v852_v22 = vld [vmem:[#allocation2 + $0x152] ss:$2 sm:$0xff]  ;;  %v854_v30 = vld [vmem:[#allocation2 + $0x182] ss:$2 sm:$0xff]  ;;  %1814 = vst.msk [vmem:[#allocation3 + $0x9] sm:$0x1] %vm1793_vm13, %v3599_v0 }
  0x4e   : > { %1335 = vrot.lane.b32.xlu1 %v840_v5, %s3607_s17  ;;  %1273 = vrot.lane.b32.xlu0 %v810_v6, %s3606_s26  ;;  %v635_v5 = vld [vmem:[#allocation2 + $0x1e1] ss:$2 sm:$0xff]  ;;  %v788_v6 = vld [vmem:[#allocation2 + $0x150] ss:$2 sm:$0xff]  ;;  %v585_v34 = vld [vmem:[#allocation2] ss:$2 sm:$0xff] }
  0x4f   : > { %v587_v46 = vld [vmem:[#allocation2 + $0x30] ss:$2 sm:$0xff]  ;;  %1794 = vst.msk [vmem:[#allocation3] sm:$0x1] %vm1793_vm13, %v3599_v0  ;;  %1795 = vst.msk [vmem:[#allocation3 + $0x10] sm:$0x1] %vm1793_vm13, %v3599_v0 }
  0x50   : > { %v671_v51 = vld [vmem:[#allocation2 + $0x242] ss:$2 sm:$0xff]  ;;  %1796 = vst.msk [vmem:[#allocation3 + $0x20] sm:$0x1] %vm1793_vm13, %v3599_v0  ;;  %1797 = vst.msk [vmem:[#allocation3 + $0x30] sm:$0x1] %vm1793_vm13, %v3599_v0 }
  0x51   : > { %1798 = vst.msk [vmem:[#allocation3 + $0x40] sm:$0x1] %vm1793_vm13, %v3599_v0  ;;  %1799 = vst.msk [vmem:[#allocation3 + $0x50] sm:$0x1] %vm1793_vm13, %v3599_v0 }
  0x52   : > { %1085 = vrot.lane.b32.xlu1 %v718_v11, %s3603_s23  ;;  %895 = vrot.lane.b32.xlu0 %v625_v12, %s3600_s20  ;;  %v667_v11 = vld [vmem:[#allocation2 + $0x1e2] ss:$2 sm:$0xff]  ;;  %1800 = vst.msk [vmem:[#allocation3 + $0x60] sm:$0x1] %vm1793_vm13, %v3599_v0  ;;  %1801 = vst.msk [vmem:[#allocation3 + $0x70] sm:$0x1] %vm1793_vm13, %v3599_v0 }
  0x53   : > { %1802 = vst.msk [vmem:[#allocation3 + $0x80] sm:$0x1] %vm1793_vm13, %v3599_v0  ;;  %1803 = vst.msk [vmem:[#allocation3 + $0x90] sm:$0x1] %vm1793_vm13, %v3599_v0 }
  0x54   : > { %1804 = vst.msk [vmem:[#allocation3 + $0xa0] sm:$0x1] %vm1793_vm13, %v3599_v0  ;;  %1805 = vst.msk [vmem:[#allocation3 + $0xb0] sm:$0x1] %vm1793_vm13, %v3599_v0 }
  0x55   : > { %1806 = vst.msk [vmem:[#allocation3 + $0xc0] sm:$0x1] %vm1793_vm13, %v3599_v0  ;;  %1807 = vst.msk [vmem:[#allocation3 + $0xd0] sm:$0x1] %vm1793_vm13, %v3599_v0 }
  0x56   : > { %1337 = vrot.lane.b32.xlu1 %v842_v17, %s3607_s17  ;;  %1147 = vrot.lane.b32.xlu0 %v748_v18, %s3604_s24  ;;  %v728_v18 = vld [vmem:[#allocation2 + $0x1c9] ss:$2 sm:$0xff]  ;;  %1808 = vst.msk [vmem:[#allocation3 + $0xe0] sm:$0x1] %vm1793_vm13, %v3599_v0  ;;  %1809 = vst.msk [vmem:[#allocation3 + $0xf0] sm:$0x1] %vm1793_vm13, %v3599_v0 }
  0x57   : > { %1810 = vst.msk [vmem:[#allocation3 + $0x100] sm:$0x1] %vm1793_vm13, %v3599_v0  ;;  %1811 = vst.msk [vmem:[#allocation3 + $0x110] sm:$0x1] %vm1793_vm13, %v3599_v0 }
  0x58   : > { %1812 = vst.msk [vmem:[#allocation3 + $0x120] sm:$0x1] %vm1793_vm13, %v3599_v0  ;;  %1813 = vst.msk [vmem:[#allocation3 + $0x130] sm:$0x1] %vm1793_vm13, %v3599_v0 }
  0x59   : > { %1815 = vst.msk [vmem:[#allocation3 + $0x19] sm:$0x1] %vm1793_vm13, %v3599_v0  ;;  %1816 = vst.msk [vmem:[#allocation3 + $0x29] sm:$0x1] %vm1793_vm13, %v3599_v0 }
  0x5a   : > { %959 = vrot.lane.b32.xlu1 %v657_v19, %s3601_s21  ;;  %897 = vrot.lane.b32.xlu0 %v627_v20, %s3600_s20  ;;  %v698_v19 = vld [vmem:[#allocation2 + $0x1f8] ss:$2 sm:$0xff]  ;;  %1817 = vst.msk [vmem:[#allocation3 + $0x39] sm:$0x1] %vm1793_vm13, %v3599_v0  ;;  %1818 = vst.msk [vmem:[#allocation3 + $0x49] sm:$0x1] %vm1793_vm13, %v3599_v0 }
  0x5b   : > { %1819 = vst.msk [vmem:[#allocation3 + $0x59] sm:$0x1] %vm1793_vm13, %v3599_v0  ;;  %1820 = vst.msk [vmem:[#allocation3 + $0x69] sm:$0x1] %vm1793_vm13, %v3599_v0 }
  0x5c   : > { %1821 = vst.msk [vmem:[#allocation3 + $0x79] sm:$0x1] %vm1793_vm13, %v3599_v0  ;;  %1822 = vst.msk [vmem:[#allocation3 + $0x89] sm:$0x1] %vm1793_vm13, %v3599_v0 }
  0x5d   : > { %1823 = vst.msk [vmem:[#allocation3 + $0x99] sm:$0x1] %vm1793_vm13, %v3599_v0  ;;  %1824 = vst.msk [vmem:[#allocation3 + $0xa9] sm:$0x1] %vm1793_vm13, %v3599_v0 }
  0x5e   : > { %1211 = vrot.lane.b32.xlu1 %v780_v23, %s3605_s25  ;;  %1149 = vrot.lane.b32.xlu0 %v750_v24, %s3604_s24  ;;  %v822_v23 = vld [vmem:[#allocation2 + $0x181] ss:$2 sm:$0xff]  ;;  %1825 = vst.msk [vmem:[#allocation3 + $0xb9] sm:$0x1] %vm1793_vm13, %v3599_v0  ;;  %1826 = vst.msk [vmem:[#allocation3 + $0xc9] sm:$0x1] %vm1793_vm13, %v3599_v0 }
  0x5f   : > { %1827 = vst.msk [vmem:[#allocation3 + $0xd9] sm:$0x1] %vm1793_vm13, %v3599_v0  ;;  %1828 = vst.msk [vmem:[#allocation3 + $0xe9] sm:$0x1] %vm1793_vm13, %v3599_v0 }
  0x60   : > { %1829 = vst.msk [vmem:[#allocation3 + $0xf9] sm:$0x1] %vm1793_vm13, %v3599_v0  ;;  %1830 = vst.msk [vmem:[#allocation3 + $0x109] sm:$0x1] %vm1793_vm13, %v3599_v0 }
  0x61   : > { %1831 = vst.msk [vmem:[#allocation3 + $0x119] sm:$0x1] %vm1793_vm13, %v3599_v0  ;;  %1832 = vst.msk [vmem:[#allocation3 + $0x129] sm:$0x1] %vm1793_vm13, %v3599_v0 }
  0x62   : > { %1023 = vrot.lane.b32.xlu1 %v688_v25, %s3602_s22  ;;  %961 = vrot.lane.b32.xlu0 %v659_v26, %s3601_s21  ;;  %v730_v26 = vld [vmem:[#allocation2 + $0x1f9] ss:$2 sm:$0xff]  ;;  %1833 = vst.msk [vmem:[#allocation3 + $0x139] sm:$0x1] %vm1793_vm13, %v3599_v0  ;;  %v804_v0 = vld [vmem:[#allocation2 + $0x300] ss:$2 sm:$0xff] }
  0x66   : > { %1275 = vrot.lane.b32.xlu1 %v812_v28, %s3606_s26  ;;  %1213 = vrot.lane.b32.xlu0 %v782_v29, %s3605_s25 }
  0x6a   : > { %1087 = vrot.lane.b32.xlu1 %v720_v31, %s3603_s23  ;;  %1025 = vrot.lane.b32.xlu0 %v690_v32, %s3602_s22  ;;  %v760_v31 = vld [vmem:[#allocation2 + $0x1ca] ss:$2 sm:$0xff] }
  0x6e   : > { %1339 = vrot.lane.b32.xlu1 %v844_v35, %s3607_s17  ;;  %1277 = vrot.lane.b32.xlu0 %v814_v36, %s3606_s26  ;;  %v669_v35 = vld [vmem:[#allocation2 + $0x212] ss:$2 sm:$0xff]  ;;  %v639_v36 = vld [vmem:[#allocation2 + $0x241] ss:$2 sm:$0xff] }
  0x72   : > { %1089 = vrot.lane.b32.xlu1 %v722_v37, %s3603_s23  ;;  %899 = vrot.lane.b32.xlu0 %v629_v38, %s3600_s20 }
  0x76   : > { %1341 = vrot.lane.b32.xlu1 %v846_v41, %s3607_s17  ;;  %1151 = vrot.lane.b32.xlu0 %v752_v42, %s3604_s24  ;;  %v792_v41 = vld [vmem:[#allocation2 + $0x1e0] ss:$2 sm:$0xff] }
  0x77   : > { %v762_v42 = vld [vmem:[#allocation2 + $0x1fa] ss:$2 sm:$0xff] }
  0x7a   : > { %963 = vrot.lane.b32.xlu1 %v661_v43, %s3601_s21  ;;  %901 = vrot.lane.b32.xlu0 %v631_v44, %s3600_s20 }
  0x7e   : > { %1215 = vrot.lane.b32.xlu1 %v784_v47, %s3605_s25  ;;  %1153 = vrot.lane.b32.xlu0 %v754_v48, %s3604_s24 }
  0x82   : > { %1027 = vrot.lane.b32.xlu1 %v692_v49, %s3602_s22  ;;  %965 = vrot.lane.b32.xlu0 %v663_v50, %s3601_s21  ;;  %v700_v50 = vld [vmem:[#allocation2 + $0x228] ss:$2 sm:$0xff] }
  0x86   : > { %1279 = vrot.lane.b32.xlu1 %v816_v52, %s3606_s26  ;;  %1217 = vrot.lane.b32.xlu0 %v786_v53, %s3605_s25  ;;  %v888_v2 = vpop.permute.xlu0 %887 }
  0x87   : > { %v1383_v37 = vsel %vm368_vm0, %v585_v34, %v888_v2  ;;  %v766_v34 = vld [vmem:[#allocation2 + $0x25a] ss:$2 sm:$0xff] }
  0x88   : > { %v952_v3 = vpop.permute.xlu1 %951 }
  0x89   : > { %v1400_v40 = vsel %vm1399_vm3, %v1383_v37, %v952_v3  ;;  %v732_v3 = vld [vmem:[#allocation2 + $0x229] ss:$2 sm:$0xff] }
  0x8a   : > { %1091 = vrot.lane.b32.xlu1 %v724_v55, %s3603_s23  ;;  %1029 = vrot.lane.b32.xlu0 %v694_v56, %s3602_s22 }
  0x8e   : > { %1343 = vrot.lane.b32.xlu1 %v848_v57, %s3607_s17  ;;  %1281 = vrot.lane.b32.xlu0 %v818_v58, %s3606_s26  ;;  %v824_v58 = vld [vmem:[#allocation2 + $0x1e1] ss:$2 sm:$0xff] }
  0x92   : > { %1093 = vrot.lane.b32.xlu1 %v726_v59, %s3603_s23  ;;  %903 = vrot.lane.b32.xlu0 %v633_v60, %s3600_s20  ;;  %v794_v59 = vld [vmem:[#allocation2 + $0x210] ss:$2 sm:$0xff] }
  0x96   : > { %1345 = vrot.lane.b32.xlu1 %v850_v63, %s3607_s17  ;;  %1155 = vrot.lane.b32.xlu0 %v756_v1, %s3604_s24 }
  0x9a   : > { %967 = vrot.lane.b32.xlu1 %v665_v4, %s3601_s21  ;;  %905 = vrot.lane.b32.xlu0 %v635_v5, %s3600_s20  ;;  %v702_v4 = vld [vmem:[#allocation2 + $0x258] ss:$2 sm:$0xff] }
  0x9c   : > { %v3976_v8 = vpop.permute.xlu1 %953  ;;  %v3978_v9 = vpop.permute.xlu0 %889 }
  0x9d   : > { %v1384_v52 = vsel %vm368_vm0, %v587_v46, %v3978_v9  ;;  %v856_v9 = vld [vmem:[#allocation2 + $0x1e2] ss:$2 sm:$0xff] }
  0x9e   : > { %1219 = vrot.lane.b32.xlu1 %v788_v6, %s3605_s25  ;;  %1157 = vrot.lane.b32.xlu0 %v758_v7, %s3604_s24  ;;  %v1401_v57 = vsel %vm1399_vm3, %v1384_v52, %v3976_v8 }
  0xa0   : > { %v3982_v12 = vpop.permute.xlu1 %1017  ;;  %v1016_v13 = vpop.permute.xlu0 %1015 }
  0xa1   : > { %v1417_v43 = vsel %vm1416_vm5, %v1400_v40, %v1016_v13  ;;  %v1418_v60 = vsel %vm1416_vm5, %v1401_v57, %v3982_v12  ;;  %v734_v13 = vld [vmem:[#allocation2 + $0x259] ss:$2 sm:$0xff]  ;;  %v704_v40 = vld [vmem:[#allocation2 + $0x288] ss:$2 sm:$0xff] }
  0xa2   : > { %1031 = vrot.lane.b32.xlu1 %v696_v10, %s3602_s22  ;;  %969 = vrot.lane.b32.xlu0 %v667_v11, %s3601_s21  ;;  %v826_v10 = vld [vmem:[#allocation2 + $0x211] ss:$2 sm:$0xff] }
  0xa4   : > { %v3986_v16 = vpop.permute.xlu1 %891  ;;  %v1080_v17 = vpop.permute.xlu0 %1079 }
  0xa5   : > { %v1434_v47 = vsel %vm1433_vm6, %v1417_v43, %v1080_v17 }
  0xa6   : > { %1283 = vrot.lane.b32.xlu1 %v820_v14, %s3606_s26  ;;  %1221 = vrot.lane.b32.xlu0 %v790_v15, %s3605_s25  ;;  %v641_v14 = vld [vmem:[#allocation2 + $0x271] ss:$2 sm:$0xff] }
  0xa8   : > { %v1144_v20 = vpop.permute.xlu1 %1143  ;;  %v3990_v21 = vpop.permute.xlu0 %1081 }
  0xa9   : > { %v1451_v48 = vsel %vm1450_vm7, %v1434_v47, %v1144_v20  ;;  %v1435_v63 = vsel %vm1433_vm6, %v1418_v60, %v3990_v21  ;;  %v830_v60 = vld [vmem:[#allocation2 + $0x271] ss:$2 sm:$0xff] }
  0xaa   : > { %1095 = vrot.lane.b32.xlu1 %v728_v18, %s3603_s23  ;;  %1033 = vrot.lane.b32.xlu0 %v698_v19, %s3602_s22  ;;  %v858_v18 = vld [vmem:[#allocation2 + $0x212] ss:$2 sm:$0xff] }
  0xab   : > { %v764_v19 = vld [vmem:[#allocation2 + $0x22a] ss:$2 sm:$0xff] }
  0xac   : > { %v3994_v24 = vpop.permute.xlu1 %955  ;;  %v3996_v25 = vpop.permute.xlu0 %893 }
  0xae   : > { %1347 = vrot.lane.b32.xlu1 %v852_v22, %s3607_s17  ;;  %1285 = vrot.lane.b32.xlu0 %v822_v23, %s3606_s26  ;;  %v589_v22 = vld [vmem:[#allocation2 + $0x60] ss:$2 sm:$0xff] }
  0xaf   : > { %v673_v23 = vld [vmem:[#allocation2 + $0x272] ss:$2 sm:$0xff] }
  0xb0   : > { %v1208_v28 = vpop.permute.xlu1 %1207  ;;  %v1146_v29 = vpop.permute.xlu0 %1145 }
  0xb1   : > { %v1468_v49 = vsel %vm1467_vm8, %v1451_v48, %v1208_v28  ;;  %v1452_v1 = vsel %vm1450_vm7, %v1435_v63, %v1146_v29  ;;  %v1385_v29 = vsel %vm368_vm0, %v589_v22, %v3986_v16  ;;  %v828_v48 = vld [vmem:[#allocation2 + $0x241] ss:$2 sm:$0xff]  ;;  %v770_v22 = vld [vmem:[#allocation2 + $0x2ba] ss:$2 sm:$0xff] }
  0xb2   : > { %1097 = vrot.lane.b32.xlu1 %v730_v26, %s3603_s23  ;;  %907 = vrot.lane.b32.xlu0 %v637_v27, %s3600_s20  ;;  %v643_v26 = vld [vmem:[#allocation2 + $0x2a1] ss:$2 sm:$0xff] }
  0xb4   : > { %v4002_v32 = vpop.permute.xlu1 %1019  ;;  %v4004_v33 = vpop.permute.xlu0 %957 }
  0xb6   : > { %1349 = vrot.lane.b32.xlu1 %v854_v30, %s3607_s17  ;;  %1159 = vrot.lane.b32.xlu0 %v760_v31, %s3604_s24  ;;  %v1402_v30 = vsel %vm1399_vm3, %v1385_v29, %v3994_v24  ;;  %v796_v31 = vld [vmem:[#allocation2 + $0x240] ss:$2 sm:$0xff]  ;;  %v595_v29 = vld [vmem:[#allocation2 + $0xf0] ss:$2 sm:$0xff] }
  0xb8   : > { %v1272_v38 = vpop.permute.xlu1 %1271  ;;  %v1210_v39 = vpop.permute.xlu0 %1209 }
  0xb9   : > { %v1485_v53 = vsel %vm1484_vm9, %v1468_v49, %v1272_v38  ;;  %v1469_v2 = vsel %vm1467_vm8, %v1452_v1, %v1210_v39  ;;  %v591_v39 = vld [vmem:[#allocation2 + $0x90] ss:$2 sm:$0xff]  ;;  %v738_v1 = vld [vmem:[#allocation2 + $0x2b9] ss:$2 sm:$0xff] }
  0xba   : > { %971 = vrot.lane.b32.xlu1 %v669_v35, %s3601_s21  ;;  %909 = vrot.lane.b32.xlu0 %v639_v36, %s3600_s20  ;;  %v1419_v35 = vsel %vm1416_vm5, %v1402_v30, %v4002_v32  ;;  %v798_v49 = vld [vmem:[#allocation2 + $0x270] ss:$2 sm:$0xff] }
  0xbb   : > { %v708_v30 = vld [vmem:[#allocation2 + $0x2e8] ss:$2 sm:$0xff] }
  0xbc   : > { %v4013_v44 = vpop.permute.xlu1 %1083  ;;  %v4015_v45 = vpop.permute.xlu0 %1021 }
  0xbd   : > { %v1436_v38 = vsel %vm1433_vm6, %v1419_v35, %v4013_v44  ;;  %v1386_v44 = vsel %vm368_vm0, %v591_v39, %v3996_v25  ;;  %v832_v39 = vld [vmem:[#allocation2 + $0x2a1] ss:$2 sm:$0xff] }
  0xbe   : > { %1223 = vrot.lane.b32.xlu1 %v792_v41, %s3605_s25  ;;  %1161 = vrot.lane.b32.xlu0 %v762_v42, %s3604_s24  ;;  %v675_v41 = vld [vmem:[#allocation2 + $0x2a2] ss:$2 sm:$0xff]  ;;  %v1403_v47 = vsel %vm1399_vm3, %v1386_v44, %v4004_v33 }
  0xc0   : > { %v1336_v54 = vpop.permute.xlu1 %1335  ;;  %v1274_v55 = vpop.permute.xlu0 %1273 }
  0xc1   : > { %v1502_v56 = vsel %vm1501_vm10, %v1485_v53, %v1336_v54  ;;  %v1486_v5 = vsel %vm1484_vm9, %v1469_v2, %v1274_v55  ;;  %v736_v54 = vld [vmem:[#allocation2 + $0x289] ss:$2 sm:$0xff]  ;;  %v706_v55 = vld [vmem:[#allocation2 + $0x2b8] ss:$2 sm:$0xff] }
  0xc2   : > { %1035 = vrot.lane.b32.xlu1 %v700_v50, %s3602_s22  ;;  %973 = vrot.lane.b32.xlu0 %v671_v51, %s3601_s21  ;;  %v1420_v50 = vsel %vm1416_vm5, %v1403_v47, %v4015_v45  ;;  %v645_v2 = vld [vmem:[#allocation2 + $0x2d1] ss:$2 sm:$0xff] }
  0xc3   : > { %3460 = vmatprep.mubr.msk.f32.mxu0 %vm1523_vm11, %v1502_v56 }
  0xc4   : > { %v4033_v61 = vpop.permute.xlu1 %1085  ;;  %v4035_v62 = vpop.permute.xlu0 %895 }
  0xc5   : > { %v1437_v25 = vsel %vm1433_vm6, %v1420_v50, %v4033_v61  ;;  %v834_v50 = vld [vmem:[#allocation2 + $0x2d1] ss:$2 sm:$0xff] }
  0xc6   : > { %1287 = vrot.lane.b32.xlu1 %v824_v58, %s3606_s26  ;;  %1225 = vrot.lane.b32.xlu0 %v794_v59, %s3605_s25  ;;  %v860_v59 = vld [vmem:[#allocation2 + $0x242] ss:$2 sm:$0xff] }
  0xc8   : > { %v1338_v6 = vpop.permute.xlu1 %1337  ;;  %v1148_v7 = vpop.permute.xlu0 %1147 }
  0xc9   : > { %v1503_v8 = vsel %vm1501_vm10, %v1486_v5, %v1338_v6  ;;  %v1453_v16 = vsel %vm1450_vm7, %v1436_v38, %v1148_v7  ;;  %v862_v5 = vld [vmem:[#allocation2 + $0x272] ss:$2 sm:$0xff] }
  0xca   : > { %1099 = vrot.lane.b32.xlu1 %v732_v3, %s3603_s23  ;;  %1037 = vrot.lane.b32.xlu0 %v702_v4, %s3602_s22  ;;  %v768_v6 = vld [vmem:[#allocation2 + $0x28a] ss:$2 sm:$0xff] }
  0xcb   : > { %3461 = vmatmul.mubr.msk.f32.vlgmr.msra.gmra.mxu0 %vm1523_vm11, %v1503_v8 }
  0xcc   : > { %v4048_v11 = vpop.permute.xlu1 %959  ;;  %v4050_v12 = vpop.permute.xlu0 %897 }
  0xce   : > { %1351 = vrot.lane.b32.xlu1 %v856_v9, %s3607_s17  ;;  %1289 = vrot.lane.b32.xlu0 %v826_v10, %s3606_s26  ;;  %v593_v9 = vld [vmem:[#allocation2 + $0xc0] ss:$2 sm:$0xff] }
  0xcf   : > { %v677_v10 = vld [vmem:[#allocation2 + $0x2d2] ss:$2 sm:$0xff] }
  0xd0   : > { %v1212_v15 = vpop.permute.xlu1 %1211  ;;  %v1150_v17 = vpop.permute.xlu0 %1149 }
  0xd1   : > { %v1470_v24 = vsel %vm1467_vm8, %v1453_v16, %v1212_v15  ;;  %v1454_v53 = vsel %vm1450_vm7, %v1437_v25, %v1150_v17  ;;  %v1387_v17 = vsel %vm368_vm0, %v593_v9, %v4035_v62 }
  0xd2   : > { %1101 = vrot.lane.b32.xlu1 %v734_v13, %s3603_s23  ;;  %911 = vrot.lane.b32.xlu0 %v641_v14, %s3600_s20  ;;  %v647_v13 = vld [vmem:[#allocation2 + $0x301] ss:$2 sm:$0xff] }
  0xd4   : > { %v4056_v20 = vpop.permute.xlu1 %1023  ;;  %v4058_v21 = vpop.permute.xlu0 %961 }
  0xd6   : > { %1353 = vrot.lane.b32.xlu1 %v858_v18, %s3607_s17  ;;  %1163 = vrot.lane.b32.xlu0 %v764_v19, %s3604_s24  ;;  %v1404_v18 = vsel %vm1399_vm3, %v1387_v17, %v4048_v11  ;;  %v800_v19 = vld [vmem:[#allocation2 + $0x2a0] ss:$2 sm:$0xff] }
  0xd7   : > { %v870_v17 = vld [vmem:[#allocation2 + $0x332] ss:$2 sm:$0xff] }
  0xd8   : > { %v1276_v27 = vpop.permute.xlu1 %1275  ;;  %v1214_v28 = vpop.permute.xlu0 %1213 }
  0xd9   : > { %v1487_v32 = vsel %vm1484_vm9, %v1470_v24, %v1276_v27  ;;  %v1471_v33 = vsel %vm1467_vm8, %v1454_v53, %v1214_v28  ;;  %v802_v24 = vld [vmem:[#allocation2 + $0x2d0] ss:$2 sm:$0xff] }
  0xda   : > { %975 = vrot.lane.b32.xlu1 %v673_v23, %s3601_s21  ;;  %913 = vrot.lane.b32.xlu0 %v643_v26, %s3600_s20  ;;  %v1421_v23 = vsel %vm1416_vm5, %v1404_v18, %v4056_v20  ;;  %v772_v53 = vld [vmem:[#allocation2 + $0x2ea] ss:$2 sm:$0xff] }
  0xdb   : > { %v868_v18 = vld [vmem:[#allocation2 + $0x302] ss:$2 sm:$0xff] }
  0xdc   : > { %v4070_v36 = vpop.permute.xlu1 %1087  ;;  %v4072_v37 = vpop.permute.xlu0 %1025 }
  0xdd   : > { %v1438_v28 = vsel %vm1433_vm6, %v1421_v23, %v4070_v36  ;;  %v1388_v36 = vsel %vm368_vm0, %v595_v29, %v4050_v12 }
  0xde   : > { %1227 = vrot.lane.b32.xlu1 %v796_v31, %s3605_s25  ;;  %1165 = vrot.lane.b32.xlu0 %v766_v34, %s3604_s24  ;;  %v679_v31 = vld [vmem:[#allocation2 + $0x302] ss:$2 sm:$0xff]  ;;  %v1405_v16 = vsel %vm1399_vm3, %v1388_v36, %v4058_v21 }
  0xe0   : > { %v1340_v42 = vpop.permute.xlu1 %1339  ;;  %v1278_v43 = vpop.permute.xlu0 %1277 }
  0xe1   : > { %v1504_v46 = vsel %vm1501_vm10, %v1487_v32, %v1340_v42  ;;  %v1488_v56 = vsel %vm1484_vm9, %v1471_v33, %v1278_v43  ;;  %v740_v43 = vld [vmem:[#allocation2 + $0x2e9] ss:$2 sm:$0xff]  ;;  %v742_v33 = vld [vmem:[#allocation2 + $0x319] ss:$2 sm:$0xff] }
  0xe2   : > { %1039 = vrot.lane.b32.xlu1 %v704_v40, %s3602_s22  ;;  %977 = vrot.lane.b32.xlu0 %v675_v41, %s3601_s21  ;;  %v1422_v40 = vsel %vm1416_vm5, %v1405_v16, %v4072_v37 }
  0xe3   : > { %3463 = vmatprep.mubr.msk.f32.mxu0 %vm1523_vm11, %v1504_v46  ;;  %v710_v46 = vld [vmem:[#allocation2 + $0x318] ss:$2 sm:$0xff] }
  0xe4   : > { %v4091_v51 = vpop.permute.xlu1 %1089  ;;  %v4093_v52 = vpop.permute.xlu0 %899 }
  0xe5   : > { %v1439_v12 = vsel %vm1433_vm6, %v1422_v40, %v4091_v51 }
  0xe6   : > { %1291 = vrot.lane.b32.xlu1 %v828_v48, %s3606_s26  ;;  %1229 = vrot.lane.b32.xlu0 %v798_v49, %s3605_s25  ;;  %v864_v49 = vld [vmem:[#allocation2 + $0x2a2] ss:$2 sm:$0xff] }
  0xe8   : > { %v1342_v45 = vpop.permute.xlu1 %1341  ;;  %v1152_v57 = vpop.permute.xlu0 %1151 }
  0xe9   : > { %v1505_v58 = vsel %vm1501_vm10, %v1488_v56, %v1342_v45  ;;  %v1455_v62 = vsel %vm1450_vm7, %v1438_v28, %v1152_v57  ;;  %v774_v56 = vld [vmem:[#allocation2 + $0x31a] ss:$2 sm:$0xff] }
  0xea   : > { %1103 = vrot.lane.b32.xlu1 %v736_v54, %s3603_s23  ;;  %1041 = vrot.lane.b32.xlu0 %v706_v55, %s3602_s22  ;;  %v866_v45 = vld [vmem:[#allocation2 + $0x2d2] ss:$2 sm:$0xff] }
  0xeb   : > { %3464 = vmatmul.mubr.msk.f32.gmra.mxu0 %vm1523_vm11, %v1505_v58 }
  0xec   : > { %v4106_v61 = vpop.permute.xlu1 %963  ;;  %v4108_v63 = vpop.permute.xlu0 %901 }
  0xee   : > { %1355 = vrot.lane.b32.xlu1 %v860_v59, %s3607_s17  ;;  %1293 = vrot.lane.b32.xlu0 %v830_v60, %s3606_s26  ;;  %v597_v59 = vld [vmem:[#allocation2 + $0x120] ss:$2 sm:$0xff]  ;;  %v806_v60 = vld [vmem:[#allocation2 + $0x330] ss:$2 sm:$0xff] }
  0xf0   : > { %v1216_v3 = vpop.permute.xlu1 %1215  ;;  %v1154_v4 = vpop.permute.xlu0 %1153 }
  0xf1   : > { %v1472_v11 = vsel %vm1467_vm8, %v1455_v62, %v1216_v3  ;;  %v1456_v42 = vsel %vm1450_vm7, %v1439_v12, %v1154_v4  ;;  %v1389_v3 = vsel %vm368_vm0, %v597_v59, %v4093_v52  ;;  %v1867_v62 = vld [vmem:[#allocation3 + $0x1] sm:$0xff]  ;;  %v601_v12 = vld [vmem:[#allocation2 + $0x1b0] ss:$2 sm:$0xff] }
  0xf2   : > { %1105 = vrot.lane.b32.xlu1 %v738_v1, %s3603_s23  ;;  %915 = vrot.lane.b32.xlu0 %v645_v2, %s3600_s20  ;;  %v1406_v4 = vsel %vm1399_vm3, %v1389_v3, %v4106_v61 }
  0xf4   : > { %v4114_v7 = vpop.permute.xlu1 %1027  ;;  %v4116_v8 = vpop.permute.xlu0 %965 }
  0xf5   : > { %v1423_v9 = vsel %vm1416_vm5, %v1406_v4, %v4114_v7 }
  0xf6   : > { %1357 = vrot.lane.b32.xlu1 %v862_v5, %s3607_s17  ;;  %1167 = vrot.lane.b32.xlu0 %v768_v6, %s3604_s24  ;;  %v838_v5 = vld [vmem:[#allocation2 + $0x331] ss:$2 sm:$0xff]  ;;  %v836_v6 = vld [vmem:[#allocation2 + $0x301] ss:$2 sm:$0xff] }
  0xf8   : > { %v1280_v14 = vpop.permute.xlu1 %1279  ;;  %v1218_v15 = vpop.permute.xlu0 %1217 }
  0xf9   : > { %v1489_v20 = vsel %vm1484_vm9, %v1472_v11, %v1280_v14  ;;  %v1473_v21 = vsel %vm1467_vm8, %v1456_v42, %v1218_v15  ;;  %v599_v15 = vld [vmem:[#allocation2 + $0x150] ss:$2 sm:$0xff] }
  0xfa   : > { %979 = vrot.lane.b32.xlu1 %v677_v10, %s3601_s21  ;;  %917 = vrot.lane.b32.xlu0 %v647_v13, %s3600_s20 }
  0xfc   : > { %v4128_v26 = vpop.permute.xlu1 %1091  ;;  %v4130_v27 = vpop.permute.xlu0 %1029 }
  0xfd   : > { %v1440_v14 = vsel %vm1433_vm6, %v1423_v9, %v4128_v26  ;;  %v1390_v26 = vsel %vm368_vm0, %v599_v15, %v4108_v63 }
  0xfe   : > { %1231 = vrot.lane.b32.xlu1 %v800_v19, %s3605_s25  ;;  %1169 = vrot.lane.b32.xlu0 %v770_v22, %s3604_s24  ;;  %v1407_v28 = vsel %vm1399_vm3, %v1390_v26, %v4116_v8  ;;  %v607_v26 = vld [vmem:[#allocation2 + $0x240] ss:$2 sm:$0xff] }
  0xff   : > { %v1424_v29 = vsel %vm1416_vm5, %v1407_v28, %v4130_v27 }
 0x100   : > { %v1344_v34 = vpop.permute.xlu1 %1343  ;;  %v1282_v35 = vpop.permute.xlu0 %1281 }
 0x101   : > { %v1506_v38 = vsel %vm1501_vm10, %v1489_v20, %v1344_v34  ;;  %v1490_v44 = vsel %vm1484_vm9, %v1473_v21, %v1282_v35  ;;  %v1883_v34 = vld [vmem:[#allocation3 + $0x2] sm:$0xff] }
 0x102   : > { %1043 = vrot.lane.b32.xlu1 %v708_v30, %s3602_s22  ;;  %981 = vrot.lane.b32.xlu0 %v679_v31, %s3601_s21 }
 0x103   : > { %3466 = vmatprep.mubr.msk.f32.mxu0 %vm1523_vm11, %v1506_v38 }
 0x104   : > { %v4149_v41 = vpop.permute.xlu1 %1093  ;;  %v4151_v32 = vpop.permute.xlu0 %903 }
 0x105   : > { %v1441_v31 = vsel %vm1433_vm6, %v1424_v29, %v4149_v41 }
 0x106   : > { %1295 = vrot.lane.b32.xlu1 %v832_v39, %s3606_s26  ;;  %1233 = vrot.lane.b32.xlu0 %v802_v24, %s3605_s25 }
 0x108   : > { %v1346_v37 = vpop.permute.xlu1 %1345  ;;  %v4160_v47 = vpop.permute.xlu0 %1155 }
 0x109   : > { %v1507_v48 = vsel %vm1501_vm10, %v1490_v44, %v1346_v37  ;;  %v1457_v52 = vsel %vm1450_vm7, %v1440_v14, %v4160_v47  ;;  %v605_v14 = vld [vmem:[#allocation2 + $0x210] ss:$2 sm:$0xff] }
 0x10a   : > { %1107 = vrot.lane.b32.xlu1 %v740_v43, %s3603_s23  ;;  %1045 = vrot.lane.b32.xlu0 %v710_v46, %s3602_s22  ;;  %v1391_v43 = vsel %vm368_vm0, %v601_v12, %v4151_v32 }
 0x10b   : > { %3467 = vmatmul.mubr.msk.f32.gmra.mxu0 %vm1523_vm11, %v1507_v48 }
 0x10c   : > { %v4170_v51 = vpop.permute.xlu1 %967  ;;  %v4172_v25 = vpop.permute.xlu0 %905 }
 0x10d   : > { %v1408_v46 = vsel %vm1399_vm3, %v1391_v43, %v4170_v51 }
 0x10e   : > { %1359 = vrot.lane.b32.xlu1 %v864_v49, %s3607_s17  ;;  %1297 = vrot.lane.b32.xlu0 %v834_v50, %s3606_s26  ;;  %v603_v50 = vld [vmem:[#allocation2 + $0x1e0] ss:$2 sm:$0xff] }
 0x10f   : > { %v1392_v51 = vsel %vm368_vm0, %v603_v50, %v4172_v25 }
 0x110   : > { %v1220_v54 = vpop.permute.xlu1 %1219  ;;  %v1158_v55 = vpop.permute.xlu0 %1157 }
 0x111   : > { %v1474_v61 = vsel %vm1467_vm8, %v1457_v52, %v1220_v54  ;;  %v1458_v63 = vsel %vm1450_vm7, %v1441_v31, %v1158_v55 }
 0x112   : > { %1171 = vrot.lane.b32.xlu1 %v772_v53, %s3604_s24  ;;  %1109 = vrot.lane.b32.xlu0 %v742_v33, %s3603_s23 }
 0x114   : > { %v1032_v57 = vpop.permute.xlu1 %1031  ;;  %v4258_v58 = vpop.permute.xlu0 %969 }
 0x115   : > { %v1425_v44 = vsel %vm1416_vm5, %v1408_v46, %v1032_v57  ;;  %v609_v46 = vld [vmem:[#allocation2 + $0x270] ss:$2 sm:$0xff] }
 0x116   : > { %1173 = vrot.lane.b32.xlu1 %v774_v56, %s3604_s24  ;;  %1361 = vrot.lane.b32.xlu0 %v866_v45, %s3607_s17  ;;  %v1409_v56 = vsel %vm1399_vm3, %v1392_v51, %v4258_v58 }
 0x118   : > { %v1284_v1 = vpop.permute.xlu1 %1283  ;;  %v1222_v2 = vpop.permute.xlu0 %1221 }
 0x119   : > { %v1491_v19 = vsel %vm1484_vm9, %v1474_v61, %v1284_v1  ;;  %v1475_v20 = vsel %vm1467_vm8, %v1458_v63, %v1222_v2 }
 0x11a   : > { %1237 = vrot.lane.b32.xlu1 %v806_v60, %s3605_s25  ;;  %1235 = vrot.lane.b32.xlu0 %v804_v0, %s3605_s25 }
 0x11c   : > { %v1096_v10 = vpop.permute.xlu1 %1095  ;;  %v1034_v13 = vpop.permute.xlu0 %1033 }
 0x11d   : > { %v1442_v48 = vsel %vm1433_vm6, %v1425_v44, %v1096_v10  ;;  %v1426_v45 = vsel %vm1416_vm5, %v1409_v56, %v1034_v13 }
 0x11e   : > { %1301 = vrot.lane.b32.xlu1 %v838_v5, %s3606_s26  ;;  %1299 = vrot.lane.b32.xlu0 %v836_v6, %s3606_s26  ;;  %s3608_s26 = smov 40  }
 0x120   : > { %v1348_v7 = vpop.permute.xlu1 %1347  ;;  %v1286_v22 = vpop.permute.xlu0 %1285 }
 0x121   : > { %v1508_v23 = vsel %vm1501_vm10, %v1491_v19, %v1348_v7  ;;  %v1492_v8 = vsel %vm1484_vm9, %v1475_v20, %v1286_v22 }
 0x122   : > { %1365 = vrot.lane.b32.xlu1 %v870_v17, %s3607_s17  ;;  %1363 = vrot.lane.b32.xlu0 %v868_v18, %s3607_s17 }
 0x123   : > { %3469 = vmatprep.mubr.msk.f32.mxu0 %vm1523_vm11, %v1508_v23 }
 0x124   : > { %v1098_v11 = vpop.permute.xlu1 %1097  ;;  %v908_v30 = vpop.permute.xlu0 %907 }
 0x125   : > { %v1443_v60 = vsel %vm1433_vm6, %v1426_v45, %v1098_v11  ;;  %v1393_v61 = vsel %vm368_vm0, %v605_v14, %v908_v30  ;;  %v615_v14 = vld [vmem:[#allocation2 + $0x300] ss:$2 sm:$0xff] }
 0x126   : > { %2012 = vrot.lane.b32.xlu0 %v1867_v62, %s3601_s21 }
 0x128   : > { %v1350_v35 = vpop.permute.xlu1 %1349  ;;  %v1160_v38 = vpop.permute.xlu0 %1159 }
 0x129   : > { %v1509_v36 = vsel %vm1501_vm10, %v1492_v8, %v1350_v35  ;;  %v1459_v49 = vsel %vm1450_vm7, %v1442_v48, %v1160_v38 }
 0x12a   : > { %3470 = vmatmul.mubr.msk.f32.gmra.mxu0 %vm1523_vm11, %v1509_v36  ;;  %2076 = vrot.lane.b32.xlu0 %v1883_v34, %s3603_s23 }
 0x12c   : > { %v972_v27 = vpop.permute.xlu1 %971  ;;  %v910_v16 = vpop.permute.xlu0 %909 }
 0x12d   : > { %v1410_v17 = vsel %vm1399_vm3, %v1393_v61, %v972_v27  ;;  %v1394_v30 = vsel %vm368_vm0, %v607_v26, %v910_v16 }
 0x130   : > { %v1224_v39 = vpop.permute.xlu1 %1223  ;;  %v1162_v24 = vpop.permute.xlu0 %1161 }
 0x131   : > { %v1476_v53 = vsel %vm1467_vm8, %v1459_v49, %v1224_v39  ;;  %v1460_v0 = vsel %vm1450_vm7, %v1443_v60, %v1162_v24 }
 0x134   : > { %v1036_v40 = vpop.permute.xlu1 %1035  ;;  %v974_v41 = vpop.permute.xlu0 %973 }
 0x135   : > { %v1427_v18 = vsel %vm1416_vm5, %v1410_v17, %v1036_v40  ;;  %v1411_v63 = vsel %vm1399_vm3, %v1394_v30, %v974_v41 }
 0x138   : > { %v1288_v42 = vpop.permute.xlu1 %1287  ;;  %v1226_v21 = vpop.permute.xlu0 %1225 }
 0x139   : > { %v1493_v33 = vsel %vm1484_vm9, %v1476_v53, %v1288_v42  ;;  %v1477_v1 = vsel %vm1467_vm8, %v1460_v0, %v1226_v21 }
 0x13c   : > { %v1100_v37 = vpop.permute.xlu1 %1099  ;;  %v1038_v47 = vpop.permute.xlu0 %1037 }
 0x13d   : > { %v1444_v22 = vsel %vm1433_vm6, %v1427_v18, %v1100_v37  ;;  %v1428_v20 = vsel %vm1416_vm5, %v1411_v63, %v1038_v47 }
 0x140   : > { %v1352_v54 = vpop.permute.xlu1 %1351  ;;  %v1290_v55 = vpop.permute.xlu0 %1289 }
 0x141   : > { %v1510_v32 = vsel %vm1501_vm10, %v1493_v33, %v1352_v54  ;;  %v1494_v2 = vsel %vm1484_vm9, %v1477_v1, %v1290_v55  ;;  %v611_v55 = vld [vmem:[#allocation2 + $0x2a0] ss:$2 sm:$0xff] }
 0x142   : > { %3472 = vmatprep.mubr.msk.f32.mxu0 %vm1523_vm11, %v1510_v32 }
 0x144   : > { %v1102_v57 = vpop.permute.xlu1 %1101  ;;  %v912_v59 = vpop.permute.xlu0 %911 }
 0x145   : > { %v1445_v35 = vsel %vm1433_vm6, %v1428_v20, %v1102_v57  ;;  %v1395_v47 = vsel %vm368_vm0, %v609_v46, %v912_v59 }
 0x148   : > { %v1354_v3 = vpop.permute.xlu1 %1353  ;;  %v1164_v4 = vpop.permute.xlu0 %1163 }
 0x149   : > { %v1511_v25 = vsel %vm1501_vm10, %v1494_v2, %v1354_v3  ;;  %v1461_v23 = vsel %vm1450_vm7, %v1444_v22, %v1164_v4 }
 0x14a   : > { %3473 = vmatmul.mubr.msk.f32.gmra.mxu0 %vm1523_vm11, %v1511_v25 }
 0x14c   : > { %v976_v5 = vpop.permute.xlu1 %975  ;;  %v914_v58 = vpop.permute.xlu0 %913 }
 0x14d   : > { %v1412_v48 = vsel %vm1399_vm3, %v1395_v47, %v976_v5  ;;  %v1396_v59 = vsel %vm368_vm0, %v611_v55, %v914_v58 }
 0x150   : > { %v1228_v6 = vpop.permute.xlu1 %1227  ;;  %v1166_v9 = vpop.permute.xlu0 %1165 }
 0x151   : > { %v1478_v28 = vsel %vm1467_vm8, %v1461_v23, %v1228_v6  ;;  %v1462_v38 = vsel %vm1450_vm7, %v1445_v35, %v1166_v9 }
 0x154   : > { %v1040_v10 = vpop.permute.xlu1 %1039  ;;  %v978_v13 = vpop.permute.xlu0 %977 }
 0x155   : > { %v1429_v49 = vsel %vm1416_vm5, %v1412_v48, %v1040_v10  ;;  %v1413_v60 = vsel %vm1399_vm3, %v1396_v59, %v978_v13  ;;  %v4357_v10 = vld [vmem:[%s5015_s2] ss:$0 sm:$0xff]  ;;  %v613_v13 = vld [vmem:[#allocation2 + $0x2d0] ss:$2 sm:$0xff] }
 0x156   : > { %v2647_v59 = vld [vmem:[%s5017_s4 + $0x38] sm:$0xff] }
 0x158   : > { %v1292_v52 = vpop.permute.xlu1 %1291  ;;  %v1230_v15 = vpop.permute.xlu0 %1229 }
 0x159   : > { %v1495_v62 = vsel %vm1484_vm9, %v1478_v28, %v1292_v52  ;;  %v1479_v36 = vsel %vm1467_vm8, %v1462_v38, %v1230_v15  ;;  %v4363_v15 = vld [vmem:[%s5016_s3] ss:$0 sm:$0xff] }
 0x15c   : > { %v1104_v19 = vpop.permute.xlu1 %1103  ;;  %v1042_v7 = vpop.permute.xlu0 %1041 }
 0x15d   : > { %v1446_v33 = vsel %vm1433_vm6, %v1429_v49, %v1104_v19  ;;  %v1430_v0 = vsel %vm1416_vm5, %v1413_v60, %v1042_v7  ;;  %v2646_v60 = vld [vmem:[%s5017_s4 + $0x30] sm:$0xff] }
 0x160   : > { %v1356_v29 = vpop.permute.xlu1 %1355  ;;  %v1294_v11 = vpop.permute.xlu0 %1293 }
 0x161   : > { %v1512_v31 = vsel %vm1501_vm10, %v1495_v62, %v1356_v29  ;;  %v1496_v27 = vsel %vm1484_vm9, %v1479_v36, %v1294_v11 }
 0x162   : > { %3475 = vmatprep.mubr.msk.f32.mxu0 %vm1523_vm11, %v1512_v31 }
 0x164   : > { %v1106_v34 = vpop.permute.xlu1 %1105  ;;  %v916_v8 = vpop.permute.xlu0 %915 }
 0x165   : > { %v1447_v3 = vsel %vm1433_vm6, %v1430_v0, %v1106_v34  ;;  %v1397_v7 = vsel %vm368_vm0, %v613_v13, %v916_v8  ;;  %v2641_v13 = vld [vmem:[%s5017_s4 + $0x8] sm:$0xff] }
 0x168   : > { %v1358_v39 = vpop.permute.xlu1 %1357  ;;  %v1168_v24 = vpop.permute.xlu0 %1167 }
 0x169   : > { %v1513_v16 = vsel %vm1501_vm10, %v1496_v27, %v1358_v39  ;;  %v1463_v54 = vsel %vm1450_vm7, %v1446_v33, %v1168_v24 }
 0x16a   : > { %3476 = vmatmul.mubr.msk.f32.gmra.mxu0 %vm1523_vm11, %v1513_v16 }
 0x16c   : > { %v980_v40 = vpop.permute.xlu1 %979  ;;  %v918_v41 = vpop.permute.xlu0 %917 }
 0x16d   : > { %v1398_v22 = vsel %vm368_vm0, %v615_v14, %v918_v41  ;;  %v1414_v28 = vsel %vm1399_vm3, %v1397_v7, %v980_v40 }
 0x170   : > { %v1232_v12 = vpop.permute.xlu1 %1231  ;;  %v1170_v42 = vpop.permute.xlu0 %1169 }
 0x171   : > { %v1480_v32 = vsel %vm1467_vm8, %v1463_v54, %v1232_v12  ;;  %v1464_v4 = vsel %vm1450_vm7, %v1447_v3, %v1170_v42 }
 0x174   : > { %v1044_v21 = vpop.permute.xlu1 %1043  ;;  %v982_v43 = vpop.permute.xlu0 %981 }
 0x175   : > { %v1415_v62 = vsel %vm1399_vm3, %v1398_v22, %v982_v43  ;;  %v1431_v29 = vsel %vm1416_vm5, %v1414_v28, %v1044_v21  ;;  %v3575_v21 = vld [vmem:[#allocation2 + $0x19] ss:$2 sm:$0xff]  ;;  %v3578_v28 = vld [vmem:[#allocation2 + $0xa9] ss:$2 sm:$0xff] }
 0x178   : > { %v1296_v44 = vpop.permute.xlu1 %1295  ;;  %v1234_v37 = vpop.permute.xlu0 %1233 }
 0x179   : > { %v1497_v51 = vsel %vm1484_vm9, %v1480_v32, %v1296_v44  ;;  %v1481_v25 = vsel %vm1467_vm8, %v1464_v4, %v1234_v37  ;;  %v2643_v4 = vld [vmem:[%s5017_s4 + $0x18] sm:$0xff] }
 0x17c   : > { %v1108_v50 = vpop.permute.xlu1 %1107  ;;  %v1046_v53 = vpop.permute.xlu0 %1045 }
 0x17d   : > { %v1432_v11 = vsel %vm1416_vm5, %v1415_v62, %v1046_v53  ;;  %v1448_v34 = vsel %vm1433_vm6, %v1431_v29, %v1108_v50  ;;  %v3579_v62 = vld [vmem:[#allocation2 + $0xd9] ss:$2 sm:$0xff]  ;;  %v3580_v29 = vld [vmem:[#allocation2 + $0x109] ss:$2 sm:$0xff]  ;;  %vm2649_vm5 = vcmask 588800  }
 0x180   : > { %v1360_v56 = vpop.permute.xlu1 %1359  ;;  %v1298_v45 = vpop.permute.xlu0 %1297 }
 0x181   : > { %v1514_v57 = vsel %vm1501_vm10, %v1497_v51, %v1360_v56  ;;  %v1498_v5 = vsel %vm1484_vm9, %v1481_v25, %v1298_v45  ;;  %v2648_v45 = vld [vmem:[%s5017_s4 + $0x40] sm:$0xff] }
 0x182   : > { %3478 = vmatprep.mubr.msk.f32.mxu0 %vm1523_vm11, %v1514_v57  ;;  %3484 = vmatprep.subr.mxu1 %v2648_v45 }
 0x183   : > { %3485 = vmatpush3.msra.mxu1 %v2648_v45 }
 0x184   : > { %v1172_v1 = vpop.permute.xlu1 %1171  ;;  %v1110_v2 = vpop.permute.xlu0 %1109  ;;  %3486 = vmatprep.subr.mxu1 %v2647_v59 }
 0x185   : > { %v1449_v8 = vsel %vm1433_vm6, %v1432_v11, %v1110_v2  ;;  %v1465_v35 = vsel %vm1450_vm7, %v1448_v34, %v1172_v1  ;;  %3487 = vmatpush3.msra.mxu1 %v2647_v59  ;;  %v2645_v1 = vld [vmem:[%s5017_s4 + $0x28] sm:$0xff]  ;;  %v2644_v2 = vld [vmem:[%s5017_s4 + $0x20] sm:$0xff] }
 0x186   : > { %3488 = vmatprep.subr.mxu1 %v2646_v60  ;;  %v3581_v11 = vld [vmem:[#allocation2 + $0x139] ss:$2 sm:$0xff] }
 0x187   : > { %3489 = vmatpush3.msra.mxu1 %v2646_v60  ;;  %v3584_v34 = vld [vmem:[#allocation2 + $0x1f9] ss:$2 sm:$0xff] }
 0x188   : > { %v1174_v6 = vpop.permute.xlu1 %1173  ;;  %v1362_v9 = vpop.permute.xlu0 %1361  ;;  %3490 = vmatprep.subr.mxu1 %v2645_v1 }
 0x189   : > { %v1515_v58 = vsel %vm1501_vm10, %v1498_v5, %v1362_v9  ;;  %v1466_v38 = vsel %vm1450_vm7, %v1449_v8, %v1174_v6  ;;  %3491 = vmatpush3.msra.mxu1 %v2645_v1  ;;  %v2642_v5 = vld [vmem:[%s5017_s4 + $0x10] sm:$0xff]  ;;  %v4453_v9 = vld [vmem:[%s5020_s7] sm:$0xf] }
 0x18a   : > { %3479 = vmatmul.mubr.msk.f32.gmra.mxu0 %vm1523_vm11, %v1515_v58  ;;  %3492 = vmatprep.subr.mxu1 %v2644_v2 }
 0x18b   : > { %v3462_v52 = vpop.f32.mrf.mxu0  ;;  %3493 = vmatpush3.msra.mxu1 %v2644_v2  ;;  %3526 = vmatprep.subr.msk.mxu0 %vm1572_vm4, %v4453_v9 }
 0x18c   : > { %v1729_v61 = vmul.f32 %v3462_v52, %v4357_v10  ;;  %v1238_v17 = vpop.permute.xlu1 %1237  ;;  %v1236_v18 = vpop.permute.xlu0 %1235  ;;  %3494 = vmatprep.subr.mxu1 %v2643_v4  ;;  %3527 = vmatpush3.msk.msra.mxu0 %vm1572_vm4, %v4453_v9 }
 0x18d   : > { %v1642_v19 = vpop.f32.mrf.mxu0  ;;  %v1483_v27 = vsel %vm1467_vm8, %v1466_v38, %v1238_v17  ;;  %v1482_v39 = vsel %vm1467_vm8, %v1465_v35, %v1236_v18  ;;  %3495 = vmatpush3.msra.mxu1 %v2643_v4  ;;  %v2640_v18 = vld [vmem:[%s5017_s4] sm:$0xff] }
 0x18e   : > { %v1752_v23 = vadd.f32 %v4363_v15, %v1729_v61  ;;  %v1728_v26 = vmul.f32 %v4357_v10, %v1642_v19  ;;  %3496 = vmatprep.subr.mxu1 %v2642_v5  ;;  %v3576_v19 = vld [vmem:[#allocation2 + $0x49] ss:$2 sm:$0xff] }
 0x18f   : > { %3497 = vmatpush3.msra.mxu1 %v2642_v5 }
 0x190   : > { %v1768_v31 = vmax.f32 %v1752_v23, 0.0  ;;  %v1751_v30 = vadd.f32 %v4363_v15, %v1728_v26  ;;  %v1302_v63 = vpop.permute.xlu1 %1301  ;;  %v1300_v20 = vpop.permute.xlu0 %1299  ;;  %3498 = vmatprep.subr.mxu1 %v2641_v13  ;;  %v3577_v23 = vld [vmem:[#allocation2 + $0x79] ss:$2 sm:$0xff] }
 0x191   : > { %v1500_v24 = vsel %vm1484_vm9, %v1483_v27, %v1302_v63  ;;  %v1499_v16 = vsel %vm1484_vm9, %v1482_v39, %v1300_v20  ;;  %3499 = vmatpush3.msra.mxu1 %v2641_v13  ;;  %v3583_v63 = vld [vmem:[#allocation2 + $0x1c9] ss:$2 sm:$0xff] }
 0x192   : > { %1836 = vst.msk [vmem:[#allocation3 + $0x21] sm:$0xff] %vm1399_vm3, %v1768_v31  ;;  %v1767_v36 = vmax.f32 %v1751_v30, 0.0  ;;  %3500 = vmatprep.subr.mxu1 %v2640_v18  ;;  %v3582_v30 = vld [vmem:[#allocation2 + $0x169] ss:$2 sm:$0xff] }
 0x193   : > { %3501 = vmatpush3.msra.mxu1 %v2640_v18 }
 0x194   : > { %1835 = vst.msk [vmem:[#allocation3 + $0x11] sm:$0xff] %vm1399_vm3, %v1767_v36  ;;  %v1366_v40 = vpop.permute.xlu1 %1365  ;;  %v1364_v41 = vpop.permute.xlu0 %1363  ;;  %3552 = vmatprep.subr.msk.mxu1 %vm1572_vm4, %v4453_v9 }
 0x195   : > { %v1517_v12 = vsel %vm1501_vm10, %v1500_v24, %v1366_v40  ;;  %v1516_v42 = vsel %vm1501_vm10, %v1499_v16, %v1364_v41 }
 0x196   : > { %3481 = vmatprep.mubr.msk.f32.mxu0 %vm1523_vm11, %v1516_v42 }
 0x197   : > { %3482 = vmatmul.mubr.msk.f32.gmra.mxu0 %vm1523_vm11, %v1517_v12 }
 0x198   : > { %3528 = vmatprep.mubr.msk.f32.mxu0 %vm368_vm0, %v3575_v21 }
 0x199   : > { %v4390_v43 = vld [vmem:[#allocation3 + $0x20] sm:$0xff] }
 0x19a   : > { %v1916_v46 = vld [vmem:[#allocation3 + $0x21] sm:$0xff]  ;;  %2142 = vrot.lane.b32.xlu1 %v4390_v43, %s3605_s25 }
 0x19b   : > { %2206 = vrot.lane.b32.xlu0 %v1916_v46, %s3607_s17  ;;  %v1932_v44 = vld [vmem:[#allocation3 + $0x22] sm:$0xff]  ;;  %v4397_v37 = vld [vmem:[#allocation3 + $0x10] sm:$0xff]  ;;  %3529 = vmatmul.mubr.msk.f32.vlgmr.msra.gmra.mxu0 %vm368_vm0, %v3576_v19 }
 0x19c   : > { %v1915_v47 = vld [vmem:[#allocation3 + $0x11] sm:$0xff]  ;;  %3531 = vmatprep.mubr.msk.f32.mxu0 %vm368_vm0, %v3577_v23 }
 0x19d   : > { %v1884_v51 = vld [vmem:[#allocation3 + $0x12] sm:$0xff] }
 0x19e   : > { %2016 = vrot.lane.b32.xlu1 %v1916_v46, %s3601_s21 }
 0x19f   : > { %2270 = vrot.lane.b32.xlu0 %v1932_v44, %s3608_s26  ;;  %3532 = vmatmul.mubr.msk.f32.gmra.mxu0 %vm368_vm0, %v3578_v28 }
 0x1a0   : > { %3534 = vmatprep.mubr.msk.f32.mxu0 %vm368_vm0, %v3579_v62 }
 0x1a2   : > { %2080 = vrot.lane.b32.xlu1 %v1932_v44, %s3603_s23 }
 0x1a3   : > { %2140 = vrot.lane.b32.xlu0 %v4397_v37, %s3605_s25  ;;  %3535 = vmatmul.mubr.msk.f32.gmra.mxu0 %vm368_vm0, %v3580_v29 }
 0x1a4   : > { %3537 = vmatprep.mubr.msk.f32.mxu0 %vm368_vm0, %v3581_v11 }
 0x1a6   : > { %2332 = vrot.lane.b32.xlu1 %v4390_v43, %s3609_s28 }
 0x1a7   : > { %2204 = vrot.lane.b32.xlu0 %v1915_v47, %s3607_s17  ;;  %3538 = vmatmul.mubr.msk.f32.gmra.mxu0 %vm368_vm0, %v3582_v30 }
 0x1a8   : > { %3540 = vmatprep.mubr.msk.f32.mxu0 %vm368_vm0, %v3583_v63 }
 0x1aa   : > { %2396 = vrot.lane.b32.xlu1 %v1916_v46, %s3610_s29 }
 0x1ab   : > { %v3465_v48 = vpop.f32.mrf.mxu0  ;;  %3541 = vmatmul.mubr.msk.f32.gmra.mxu0 %vm368_vm0, %v3584_v34 }
 0x1ac   : > { %v1731_v49 = vmul.f32 %v3465_v48, %v4357_v10 }
 0x1ad   : > { %v1652_v50 = vpop.f32.mrf.mxu0 }
 0x1ae   : > { %v1754_v53 = vadd.f32 %v4363_v15, %v1731_v49  ;;  %v1730_v33 = vmul.f32 %v4357_v10, %v1652_v50  ;;  %2460 = vrot.lane.b32.xlu1 %v1932_v44, %s3611_s30  ;;  %v2013_v49 = vpop.permute.xlu0 %2012 }
 0x1b0   : > { %v1770_v54 = vmax.f32 %v1754_v53, 0.0  ;;  %v1753_v55 = vadd.f32 %v4363_v15, %v1730_v33  ;;  %v1891_v33 = vld [vmem:[#allocation3 + $0xa2] sm:$0xff] }
 0x1b2   : > { %1838 = vst.msk [vmem:[#allocation3 + $0x41] sm:$0xff] %vm1399_vm3, %v1770_v54  ;;  %v1769_v32 = vmax.f32 %v1753_v55, 0.0  ;;  %2014 = vrot.lane.b32.xlu1 %v1915_v47, %s3601_s21  ;;  %v1875_v54 = vld [vmem:[#allocation3 + $0xa1] sm:$0xff]  ;;  %v2077_v59 = vpop.permute.xlu0 %2076 }
 0x1b4   : > { %1837 = vst.msk [vmem:[#allocation3 + $0x31] sm:$0xff] %vm1399_vm3, %v1769_v32 }
 0x1b6   : > { %2078 = vrot.lane.b32.xlu1 %v1884_v51, %s3603_s23 }
 0x1b9   : > { %v4415_v56 = vld [vmem:[#allocation3 + $0x40] sm:$0xff] }
 0x1ba   : > { %2268 = vrot.lane.b32.xlu1 %v1884_v51, %s3608_s26  ;;  %2146 = vrot.lane.b32.xlu0 %v4415_v56, %s3605_s25  ;;  %v1918_v57 = vld [vmem:[#allocation3 + $0x41] sm:$0xff] }
 0x1bb   : > { %v1887_v0 = vld [vmem:[#allocation3 + $0x42] sm:$0xff]  ;;  %v1870_v3 = vld [vmem:[#allocation3 + $0x31] sm:$0xff] }
 0x1bc   : > { %v1886_v25 = vld [vmem:[#allocation3 + $0x32] sm:$0xff] }
 0x1bd   : > { %v4461_v52 = vld [vmem:[#allocation3 + $0x30] sm:$0xff] }
 0x1be   : > { %2210 = vrot.lane.b32.xlu1 %v1918_v57, %s3607_s17  ;;  %2020 = vrot.lane.b32.xlu0 %v1918_v57, %s3601_s21 }
 0x1c2   : > { %2084 = vrot.lane.b32.xlu1 %v1887_v0, %s3603_s23  ;;  %2274 = vrot.lane.b32.xlu0 %v1887_v0, %s3608_s26 }
 0x1c6   : > { %2336 = vrot.lane.b32.xlu1 %v4415_v56, %s3609_s28  ;;  %2018 = vrot.lane.b32.xlu0 %v1870_v3, %s3601_s21 }
 0x1ca   : > { %2400 = vrot.lane.b32.xlu1 %v1918_v57, %s3610_s29  ;;  %2082 = vrot.lane.b32.xlu0 %v1886_v25, %s3603_s23 }
 0x1cb   : > { %v3468_v6 = vpop.f32.mrf.mxu0 }
 0x1cc   : > { %v1733_v58 = vmul.f32 %v3468_v6, %v4357_v10 }
 0x1cd   : > { %v1662_v14 = vpop.f32.mrf.mxu0 }
 0x1ce   : > { %v1756_v61 = vadd.f32 %v4363_v15, %v1733_v58  ;;  %v1732_v17 = vmul.f32 %v4357_v10, %v1662_v14  ;;  %2464 = vrot.lane.b32.xlu1 %v1887_v0, %s3611_s30  ;;  %2334 = vrot.lane.b32.xlu0 %v4461_v52, %s3609_s28 }
 0x1d0   : > { %v1772_v7 = vmax.f32 %v1756_v61, 0.0  ;;  %v1755_v22 = vadd.f32 %v4363_v15, %v1732_v17  ;;  %v1851_v61 = vld [vmem:[#allocation3] sm:$0xff] }
 0x1d2   : > { %1840 = vst.msk [vmem:[#allocation3 + $0x61] sm:$0xff] %vm1399_vm3, %v1772_v7  ;;  %v1771_v26 = vmax.f32 %v1755_v22, 0.0  ;;  %2144 = vrot.lane.b32.xlu1 %v4461_v52, %s3605_s25  ;;  %2398 = vrot.lane.b32.xlu0 %v1870_v3, %s3610_s29  ;;  %v2508_v7 = vsel %vm1399_vm3, %v1851_v61, %v2013_v49  ;;  %v1955_v22 = vld [vmem:[#allocation3 + $0x90] sm:$0xff] }
 0x1d3   : > { %v2524_v23 = vsel %vm1433_vm6, %v2508_v7, %v2077_v59 }
 0x1d4   : > { %1839 = vst.msk [vmem:[#allocation3 + $0x51] sm:$0xff] %vm1399_vm3, %v1771_v26 }
 0x1d6   : > { %2208 = vrot.lane.b32.xlu1 %v1870_v3, %s3607_s17  ;;  %2272 = vrot.lane.b32.xlu0 %v1886_v25, %s3608_s26 }
 0x1d9   : > { %v4489_v31 = vld [vmem:[#allocation3 + $0x60] sm:$0xff] }
 0x1da   : > { %2462 = vrot.lane.b32.xlu1 %v1886_v25, %s3611_s30  ;;  %2150 = vrot.lane.b32.xlu0 %v4489_v31, %s3605_s25  ;;  %v1920_v20 = vld [vmem:[#allocation3 + $0x61] sm:$0xff] }
 0x1db   : > { %v1889_v8 = vld [vmem:[#allocation3 + $0x62] sm:$0xff]  ;;  %v1872_v35 = vld [vmem:[#allocation3 + $0x51] sm:$0xff] }
 0x1dc   : > { %v1888_v38 = vld [vmem:[#allocation3 + $0x52] sm:$0xff] }
 0x1dd   : > { %v4509_v40 = vld [vmem:[#allocation3 + $0x50] sm:$0xff] }
 0x1de   : > { %2214 = vrot.lane.b32.xlu1 %v1920_v20, %s3607_s17  ;;  %2024 = vrot.lane.b32.xlu0 %v1920_v20, %s3601_s21 }
 0x1e2   : > { %2088 = vrot.lane.b32.xlu1 %v1889_v8, %s3603_s23  ;;  %2278 = vrot.lane.b32.xlu0 %v1889_v8, %s3608_s26 }
 0x1e6   : > { %2340 = vrot.lane.b32.xlu1 %v4489_v31, %s3609_s28  ;;  %2022 = vrot.lane.b32.xlu0 %v1872_v35, %s3601_s21 }
 0x1ea   : > { %2404 = vrot.lane.b32.xlu1 %v1920_v20, %s3610_s29  ;;  %2086 = vrot.lane.b32.xlu0 %v1888_v38, %s3603_s23  ;;  %v3471_v36 = vpop.f32.mrf.mxu0 }
 0x1eb   : > { %v1735_v27 = vmul.f32 %v3471_v36, %v4357_v10 }
 0x1ec   : > { %v1672_v39 = vpop.f32.mrf.mxu0 }
 0x1ed   : > { %v1758_v24 = vadd.f32 %v4363_v15, %v1735_v27  ;;  %v1734_v16 = vmul.f32 %v4357_v10, %v1672_v39  ;;  %v1987_v27 = vld [vmem:[#allocation3 + $0x92] sm:$0xff] }
 0x1ee   : > { %2468 = vrot.lane.b32.xlu1 %v1889_v8, %s3611_s30  ;;  %2338 = vrot.lane.b32.xlu0 %v4509_v40, %s3609_s28  ;;  %v1971_v39 = vld [vmem:[#allocation3 + $0x91] sm:$0xff] }
 0x1ef   : > { %v1774_v41 = vmax.f32 %v1758_v24, 0.0  ;;  %v1757_v12 = vadd.f32 %v4363_v15, %v1734_v16 }
 0x1f1   : > { %1842 = vst.msk [vmem:[#allocation3 + $0x81] sm:$0xff] %vm1399_vm3, %v1774_v41  ;;  %v1773_v42 = vmax.f32 %v1757_v12, 0.0 }
 0x1f2   : > { %2148 = vrot.lane.b32.xlu1 %v4509_v40, %s3605_s25  ;;  %2402 = vrot.lane.b32.xlu0 %v1872_v35, %s3610_s29 }
 0x1f3   : > { %1841 = vst.msk [vmem:[#allocation3 + $0x71] sm:$0xff] %vm1399_vm3, %v1773_v42 }
 0x1f6   : > { %2212 = vrot.lane.b32.xlu1 %v1872_v35, %s3607_s17  ;;  %2276 = vrot.lane.b32.xlu0 %v1888_v38, %s3608_s26 }
 0x1f8   : > { %v1906_v21 = vld [vmem:[#allocation3 + $0x80] sm:$0xff] }
 0x1f9   : > { %v1922_v48 = vld [vmem:[#allocation3 + $0x81] sm:$0xff] }
 0x1fa   : > { %2466 = vrot.lane.b32.xlu1 %v1888_v38, %s3611_s30  ;;  %2154 = vrot.lane.b32.xlu0 %v1906_v21, %s3605_s25  ;;  %v4524_v46 = vld [vmem:[#allocation3 + $0x70] sm:$0xff]  ;;  %v1938_v13 = vld [vmem:[#allocation3 + $0x82] sm:$0xff] }
 0x1fb   : > { %v1874_v44 = vld [vmem:[#allocation3 + $0x71] sm:$0xff] }
 0x1fc   : > { %v1890_v47 = vld [vmem:[#allocation3 + $0x72] sm:$0xff] }
 0x1fe   : > { %2152 = vrot.lane.b32.xlu1 %v4524_v46, %s3605_s25  ;;  %2026 = vrot.lane.b32.xlu0 %v1874_v44, %s3601_s21 }
 0x202   : > { %2216 = vrot.lane.b32.xlu1 %v1874_v44, %s3607_s17  ;;  %2090 = vrot.lane.b32.xlu0 %v1890_v47, %s3603_s23 }
 0x206   : > { %2218 = vrot.lane.b32.xlu1 %v1922_v48, %s3607_s17  ;;  %2342 = vrot.lane.b32.xlu0 %v4524_v46, %s3609_s28 }
 0x20a   : > { %2470 = vrot.lane.b32.xlu1 %v1890_v47, %s3611_s30  ;;  %2406 = vrot.lane.b32.xlu0 %v1874_v44, %s3610_s29  ;;  %v3474_v50 = vpop.f32.mrf.mxu0 }
 0x20b   : > { %v1737_v53 = vmul.f32 %v3474_v50, %v4357_v10 }
 0x20c   : > { %v4537_v55 = vpop.permute.xlu1 %2142  ;;  %v1682_v51 = vpop.f32.mrf.mxu0 }
 0x20d   : > { %v1760_v32 = vadd.f32 %v4363_v15, %v1737_v53  ;;  %v1736_v45 = vmul.f32 %v4357_v10, %v1682_v51  ;;  %v4552_v3 = vpop.permute.xlu0 %2206 }
 0x20e   : > { %2092 = vrot.lane.b32.xlu1 %v1891_v33, %s3603_s23  ;;  %2028 = vrot.lane.b32.xlu0 %v1875_v54, %s3601_s21 }
 0x20f   : > { %v1776_v57 = vmax.f32 %v1760_v32, 0.0  ;;  %v1759_v60 = vadd.f32 %v4363_v15, %v1736_v45 }
 0x210   : > { %v4544_v0 = vpop.permute.xlu1 %2016 }
 0x211   : > { %1844 = vst.msk [vmem:[#allocation3 + $0xc1] sm:$0xff] %vm1399_vm3, %v1776_v57  ;;  %v1775_v1 = vmax.f32 %v1759_v60, 0.0  ;;  %v4556_v6 = vpop.permute.xlu0 %2270 }
 0x212   : > { %2344 = vrot.lane.b32.xlu1 %v1906_v21, %s3609_s28  ;;  %2280 = vrot.lane.b32.xlu0 %v1890_v47, %s3608_s26 }
 0x213   : > { %1843 = vst.msk [vmem:[#allocation3 + $0xb1] sm:$0xff] %vm1399_vm3, %v1775_v1 }
 0x214   : > { %v4550_v2 = vpop.permute.xlu1 %2080 }
 0x215   : > { %v2141_v17 = vpop.permute.xlu0 %2140 }
 0x216   : > { %v2540_v29 = vsel %vm1467_vm8, %v2524_v23, %v2141_v17 }
 0x218   : > { %v2333_v4 = vpop.permute.xlu1 %2332  ;;  %v1924_v30 = vld [vmem:[#allocation3 + $0xc1] sm:$0xff] }
 0x219   : > { %v2205_v26 = vpop.permute.xlu0 %2204  ;;  %v4571_v63 = vld [vmem:[#allocation3 + $0xc0] sm:$0xff] }
 0x21a   : > { %v4554_v25 = vld [vmem:[#allocation3 + $0xb0] sm:$0xff]  ;;  %v2556_v20 = vsel %vm1501_vm10, %v2540_v29, %v2205_v26  ;;  %v1893_v49 = vld [vmem:[#allocation3 + $0xc2] sm:$0xff] }
 0x21b   : > { %v1876_v5 = vld [vmem:[#allocation3 + $0xb1] sm:$0xff]  ;;  %2156 = vrot.lane.b32.xlu1 %v4554_v25, %s3605_s25 }
 0x21c   : > { %v2397_v58 = vpop.permute.xlu1 %2396  ;;  %2030 = vrot.lane.b32.xlu0 %v1876_v5, %s3601_s21  ;;  %v1892_v18 = vld [vmem:[#allocation3 + $0xb2] sm:$0xff] }
 0x21f   : > { %2408 = vrot.lane.b32.xlu1 %v1922_v48, %s3610_s29 }
 0x220   : > { %v2461_v14 = vpop.permute.xlu1 %2460  ;;  %2282 = vrot.lane.b32.xlu0 %v1938_v13, %s3608_s26 }
 0x223   : > { %2220 = vrot.lane.b32.xlu1 %v1876_v5, %s3607_s17 }
 0x224   : > { %v2015_v19 = vpop.permute.xlu1 %2014  ;;  %2094 = vrot.lane.b32.xlu0 %v1892_v18, %s3603_s23 }
 0x225   : > { %v2509_v59 = vsel %vm1399_vm3, %v4397_v37, %v2015_v19  ;;  %v2510_v37 = vsel %vm1399_vm3, %v4390_v43, %v4544_v0 }
 0x226   : > { %v2526_v61 = vsel %vm1433_vm6, %v2510_v37, %v4550_v2 }
 0x227   : > { %2472 = vrot.lane.b32.xlu1 %v1938_v13, %s3611_s30 }
 0x228   : > { %v2079_v28 = vpop.permute.xlu1 %2078  ;;  %2346 = vrot.lane.b32.xlu0 %v1955_v22, %s3609_s28 }
 0x22a   : > { %v3477_v62 = vpop.f32.mrf.mxu0 }
 0x22b   : > { %v1739_v11 = vmul.f32 %v3477_v62, %v4357_v10  ;;  %2222 = vrot.lane.b32.xlu1 %v1924_v30, %s3607_s17 }
 0x22c   : > { %v2269_v34 = vpop.permute.xlu1 %2268  ;;  %2158 = vrot.lane.b32.xlu0 %v4571_v63, %s3605_s25  ;;  %v4577_v8 = vpop.permute.xlu0 %2146 }
 0x22d   : > { %v1762_v35 = vadd.f32 %v4363_v15, %v1739_v11  ;;  %v2573_v38 = vsel %vm2572_vm14, %v2556_v20, %v2269_v34  ;;  %v1692_v36 = vpop.f32.mrf.mxu0 }
 0x22e   : > { %v2590_v24 = vsel %vm2589_vm15, %v2573_v38, %v2333_v4  ;;  %v1738_v16 = vmul.f32 %v4357_v10, %v1692_v36  ;;  %v2525_v4 = vsel %vm1433_vm6, %v2509_v59, %v2079_v28 }
 0x22f   : > { %v1778_v41 = vmax.f32 %v1762_v35, 0.0  ;;  %v2607_v12 = vsel %vm2606_vm1, %v2590_v24, %v2397_v58  ;;  %2474 = vrot.lane.b32.xlu1 %v1987_v27, %s3611_s30  ;;  %v2541_v58 = vsel %vm1467_vm8, %v2525_v4, %v4537_v55 }
 0x230   : > { %v1761_v42 = vadd.f32 %v4363_v15, %v1738_v16  ;;  %v4585_v21 = vpop.permute.xlu1 %2210  ;;  %2410 = vrot.lane.b32.xlu0 %v1971_v39, %s3610_s29  ;;  %v4589_v44 = vpop.permute.xlu0 %2020  ;;  %v2624_v47 = vsel %vm2623_vm2, %v2607_v12, %v2461_v14  ;;  %v2557_v17 = vsel %vm1501_vm10, %v2541_v58, %v4552_v3 }
 0x231   : > { %1846 = vst.msk [vmem:[#allocation3 + $0xe1] sm:$0xff] %vm1399_vm3, %v1778_v41  ;;  %3502 = vmatprep.mubr.msk.f32.mxu1 %vm2649_vm5, %v2624_v47  ;;  %v2574_v43 = vsel %vm2572_vm14, %v2557_v17, %v4556_v6 }
 0x232   : > { %v1777_v48 = vmax.f32 %v1761_v42, 0.0 }
 0x233   : > { %2096 = vrot.lane.b32.xlu1 %v1893_v49, %s3603_s23 }
 0x234   : > { %1845 = vst.msk [vmem:[#allocation3 + $0xd1] sm:$0xff] %vm1399_vm3, %v1777_v48  ;;  %v4595_v50 = vpop.permute.xlu1 %2084  ;;  %2032 = vrot.lane.b32.xlu0 %v1924_v30, %s3601_s21  ;;  %v4599_v53 = vpop.permute.xlu0 %2274 }
 0x237   : > { %2348 = vrot.lane.b32.xlu1 %v4571_v63, %s3609_s28 }
 0x238   : > { %v2337_v33 = vpop.permute.xlu1 %2336  ;;  %2284 = vrot.lane.b32.xlu0 %v1892_v18, %s3608_s26  ;;  %v4604_v54 = vpop.permute.xlu0 %2018  ;;  %v1926_v26 = vld [vmem:[#allocation3 + $0xe1] sm:$0xff] }
 0x239   : > { %v4640_v28 = vld [vmem:[#allocation3 + $0xe0] sm:$0xff] }
 0x23a   : > { %v1895_v41 = vld [vmem:[#allocation3 + $0xe2] sm:$0xff] }
 0x23b   : > { %v4606_v32 = vld [vmem:[#allocation3 + $0xd0] sm:$0xff] }
 0x23c   : > { %v1878_v51 = vld [vmem:[#allocation3 + $0xd1] sm:$0xff]  ;;  %v2401_v45 = vpop.permute.xlu1 %2400  ;;  %2160 = vrot.lane.b32.xlu1 %v4606_v32, %s3605_s25  ;;  %v4611_v57 = vpop.permute.xlu0 %2082 }
 0x23d   : > { %2034 = vrot.lane.b32.xlu0 %v1878_v51, %s3601_s21  ;;  %v1894_v5 = vld [vmem:[#allocation3 + $0xd2] sm:$0xff] }
 0x240   : > { %v2465_v60 = vpop.permute.xlu1 %2464  ;;  %2412 = vrot.lane.b32.xlu1 %v1924_v30, %s3610_s29  ;;  %v2335_v1 = vpop.permute.xlu0 %2334 }
 0x241   : > { %2286 = vrot.lane.b32.xlu0 %v1893_v49, %s3608_s26  ;;  %v2591_v22 = vsel %vm2589_vm15, %v2574_v43, %v2335_v1 }
 0x244   : > { %v2145_v13 = vpop.permute.xlu1 %2144  ;;  %2224 = vrot.lane.b32.xlu1 %v1878_v51, %s3607_s17  ;;  %v2399_v14 = vpop.permute.xlu0 %2398 }
 0x245   : > { %2098 = vrot.lane.b32.xlu0 %v1894_v5, %s3603_s23  ;;  %v2542_v18 = vsel %vm1467_vm8, %v2526_v61, %v2145_v13  ;;  %v2608_v62 = vsel %vm2606_vm1, %v2591_v22, %v2399_v14 }
 0x248   : > { %v2209_v19 = vpop.permute.xlu1 %2208  ;;  %2476 = vrot.lane.b32.xlu1 %v1893_v49, %s3611_s30  ;;  %v2273_v55 = vpop.permute.xlu0 %2272 }
 0x249   : > { %2350 = vrot.lane.b32.xlu0 %v4606_v32, %s3609_s28  ;;  %v2558_v7 = vsel %vm1501_vm10, %v2542_v18, %v2209_v19 }
 0x24a   : > { %v2575_v0 = vsel %vm2572_vm14, %v2558_v7, %v2273_v55  ;;  %v3480_v2 = vpop.f32.mrf.mxu0 }
 0x24b   : > { %v2592_v3 = vsel %vm2589_vm15, %v2575_v0, %v2337_v33  ;;  %v1741_v23 = vmul.f32 %v3480_v2, %v4357_v10 }
 0x24c   : > { %v2463_v29 = vpop.permute.xlu1 %2462  ;;  %2226 = vrot.lane.b32.xlu1 %v1926_v26, %s3607_s17  ;;  %v4646_v6 = vpop.permute.xlu0 %2150  ;;  %v2609_v11 = vsel %vm2606_vm1, %v2592_v3, %v2401_v45 }
 0x24d   : > { %2162 = vrot.lane.b32.xlu0 %v4640_v28, %s3605_s25  ;;  %v1764_v30 = vadd.f32 %v4363_v15, %v1741_v23  ;;  %v2625_v20 = vsel %vm2623_vm2, %v2608_v62, %v2463_v29  ;;  %v1702_v34 = vpop.f32.mrf.mxu0  ;;  %v2626_v35 = vsel %vm2623_vm2, %v2609_v11, %v2465_v60 }
 0x24e   : > { %v1740_v38 = vmul.f32 %v4357_v10, %v1702_v34  ;;  %3503 = vmatmul.mubr.msk.f32.vlgmr.msra.gmra.mxu1 %vm2649_vm5, %v2625_v20 }
 0x24f   : > { %v1780_v36 = vmax.f32 %v1764_v30, 0.0  ;;  %3505 = vmatprep.mubr.msk.f32.mxu1 %vm2649_vm5, %v2626_v35  ;;  %3553 = vmatpush3.msk.msra.mxu1 %vm1572_vm4, %v4453_v9 }
 0x250   : > { %v1763_v27 = vadd.f32 %v4363_v15, %v1740_v38  ;;  %v4658_v39 = vpop.permute.xlu1 %2214  ;;  %2478 = vrot.lane.b32.xlu1 %v1894_v5, %s3611_s30  ;;  %v2025_v24 = vpop.permute.xlu0 %2024 }
 0x251   : > { %2414 = vrot.lane.b32.xlu0 %v1878_v51, %s3610_s29  ;;  %1848 = vst.msk [vmem:[#allocation3 + $0x101] sm:$0xff] %vm1399_vm3, %v1780_v36  ;;  %v2514_v12 = vsel %vm1399_vm3, %v4489_v31, %v2025_v24 }
 0x252   : > { %v1779_v16 = vmax.f32 %v1763_v27, 0.0 }
 0x254   : > { %1847 = vst.msk [vmem:[#allocation3 + $0xf1] sm:$0xff] %vm1399_vm3, %v1779_v16  ;;  %v2089_v42 = vpop.permute.xlu1 %2088  ;;  %2100 = vrot.lane.b32.xlu1 %v1895_v41, %s3603_s23  ;;  %v4668_v9 = vpop.permute.xlu0 %2278 }
 0x255   : > { %2036 = vrot.lane.b32.xlu0 %v1926_v26, %s3601_s21  ;;  %v4671_v47 = vsel %vm1433_vm6, %v2514_v12, %v2089_v42 }
 0x257   : > { %v3483_v48 = vpop.f32.mrf.mxu0 }
 0x258   : > { %v2341_v49 = vpop.permute.xlu1 %2340  ;;  %2352 = vrot.lane.b32.xlu1 %v4640_v28, %s3609_s28  ;;  %v1743_v33 = vmul.f32 %v3483_v48, %v4357_v10  ;;  %v2023_v31 = vpop.permute.xlu0 %2022  ;;  %v1928_v2 = vld [vmem:[#allocation3 + $0x101] sm:$0xff] }
 0x259   : > { %2288 = vrot.lane.b32.xlu0 %v1894_v5, %s3608_s26  ;;  %v1712_v51 = vpop.f32.mrf.mxu0  ;;  %v4715_v22 = vld [vmem:[#allocation3 + $0x100] sm:$0xff]  ;;  %v2513_v20 = vsel %vm1399_vm3, %v4509_v40, %v2023_v31 }
 0x25a   : > { %v1766_v45 = vadd.f32 %v4363_v15, %v1743_v33  ;;  %v1742_v59 = vmul.f32 %v4357_v10, %v1712_v51  ;;  %v2511_v10 = vsel %vm1399_vm3, %v4461_v52, %v4604_v54  ;;  %v2512_v54 = vsel %vm1399_vm3, %v4415_v56, %v4589_v44  ;;  %v1897_v35 = vld [vmem:[#allocation3 + $0x102] sm:$0xff] }
 0x25b   : > { %v4679_v60 = vld [vmem:[#allocation3 + $0xf0] sm:$0xff]  ;;  %v2527_v61 = vsel %vm1433_vm6, %v2511_v10, %v4611_v57  ;;  %v2528_v55 = vsel %vm1433_vm6, %v2512_v54, %v4595_v50 }
 0x25c   : > { %v1880_v1 = vld [vmem:[#allocation3 + $0xf1] sm:$0xff]  ;;  %v1782_v4 = vmax.f32 %v1766_v45, 0.0  ;;  %v1765_v58 = vadd.f32 %v4363_v15, %v1742_v59  ;;  %v2405_v13 = vpop.permute.xlu1 %2404  ;;  %2164 = vrot.lane.b32.xlu1 %v4679_v60, %s3605_s25  ;;  %v2087_v5 = vpop.permute.xlu0 %2086  ;;  %v2543_v18 = vsel %vm1467_vm8, %v2527_v61, %v4577_v8 }
 0x25d   : > { %2038 = vrot.lane.b32.xlu0 %v1880_v1, %s3601_s21  ;;  %v1896_v17 = vld [vmem:[#allocation3 + $0xf2] sm:$0xff]  ;;  %v2559_v57 = vsel %vm1501_vm10, %v2543_v18, %v4585_v21  ;;  %v2529_v34 = vsel %vm1433_vm6, %v2513_v20, %v2087_v5  ;;  %v1859_v20 = vld [vmem:[#allocation3 + $0xa0] sm:$0xff] }
 0x25e   : > { %1850 = vst.msk [vmem:[#allocation3 + $0x121] sm:$0xff] %vm1399_vm3, %v1782_v4  ;;  %v1781_v14 = vmax.f32 %v1765_v58, 0.0  ;;  %v2576_v56 = vsel %vm2572_vm14, %v2559_v57, %v4599_v53  ;;  %v2545_v27 = vsel %vm1467_vm8, %v2529_v34, %v4646_v6  ;;  %v1963_v5 = vld [vmem:[#allocation3 + $0x130] sm:$0xff] }
 0x25f   : > { %v2561_v40 = vsel %vm1501_vm10, %v2545_v27, %v4658_v39 }
 0x260   : > { %1849 = vst.msk [vmem:[#allocation3 + $0x111] sm:$0xff] %vm1399_vm3, %v1781_v14  ;;  %v2469_v37 = vpop.permute.xlu1 %2468  ;;  %2416 = vrot.lane.b32.xlu1 %v1926_v26, %s3610_s29  ;;  %v2339_v15 = vpop.permute.xlu0 %2338 }
 0x261   : > { %2290 = vrot.lane.b32.xlu0 %v1895_v41, %s3608_s26  ;;  %v2593_v50 = vsel %vm2589_vm15, %v2576_v56, %v2339_v15 }
 0x264   : > { %v2149_v19 = vpop.permute.xlu1 %2148  ;;  %2228 = vrot.lane.b32.xlu1 %v1880_v1, %s3607_s17  ;;  %v2403_v52 = vpop.permute.xlu0 %2402 }
 0x265   : > { %2102 = vrot.lane.b32.xlu0 %v1896_v17, %s3603_s23  ;;  %v2544_v7 = vsel %vm1467_vm8, %v2528_v55, %v2149_v19  ;;  %v2610_v3 = vsel %vm2606_vm1, %v2593_v50, %v2403_v52  ;;  %v1995_v55 = vld [vmem:[#allocation3 + $0x132] sm:$0xff] }
 0x267   : > { %v4748_v12 = vld [vmem:[#allocation3 + $0x110] sm:$0xff] }
 0x268   : > { %v2213_v43 = vpop.permute.xlu1 %2212  ;;  %2480 = vrot.lane.b32.xlu1 %v1895_v41, %s3611_s30  ;;  %v2277_v8 = vpop.permute.xlu0 %2276  ;;  %v2578_v41 = vsel %vm2572_vm14, %v2561_v40, %v4668_v9  ;;  %v1882_v42 = vld [vmem:[#allocation3 + $0x111] sm:$0xff] }
 0x269   : > { %2354 = vrot.lane.b32.xlu0 %v4679_v60, %s3609_s28  ;;  %v2560_v0 = vsel %vm1501_vm10, %v2544_v7, %v2213_v43  ;;  %v1898_v9 = vld [vmem:[#allocation3 + $0x112] sm:$0xff] }
 0x26a   : > { %v2577_v44 = vsel %vm2572_vm14, %v2560_v0, %v2277_v8 }
 0x26b   : > { %v2594_v21 = vsel %vm2589_vm15, %v2577_v44, %v2341_v49 }
 0x26c   : > { %v2467_v23 = vpop.permute.xlu1 %2466  ;;  %2230 = vrot.lane.b32.xlu1 %v1928_v2, %s3607_s17  ;;  %v4721_v26 = vpop.permute.xlu0 %2154  ;;  %v2611_v53 = vsel %vm2606_vm1, %v2594_v21, %v2405_v13  ;;  %v1946_v13 = vld [vmem:[#allocation3 + $0x122] sm:$0xff] }
 0x26d   : > { %2166 = vrot.lane.b32.xlu0 %v4715_v22, %s3605_s25  ;;  %v2627_v62 = vsel %vm2623_vm2, %v2610_v3, %v2467_v23  ;;  %v2628_v29 = vsel %vm2623_vm2, %v2611_v53, %v2469_v37  ;;  %v1930_v37 = vld [vmem:[#allocation3 + $0x121] sm:$0xff] }
 0x26e   : > { %3506 = vmatmul.mubr.msk.f32.gmra.mxu1 %vm2649_vm5, %v2627_v62 }
 0x26f   : > { %3508 = vmatprep.mubr.msk.f32.mxu1 %vm2649_vm5, %v2628_v29 }
 0x270   : > { %v2153_v11 = vpop.permute.xlu1 %2152  ;;  %2482 = vrot.lane.b32.xlu1 %v1896_v17, %s3611_s30  ;;  %v4730_v30 = vpop.permute.xlu0 %2026 }
 0x271   : > { %2418 = vrot.lane.b32.xlu0 %v1880_v1, %s3610_s29  ;;  %v1914_v1 = vld [vmem:[#allocation3 + $0x120] sm:$0xff]  ;;  %v2546_v15 = vsel %vm1467_vm8, %v4671_v47, %v2153_v11  ;;  %v2515_v43 = vsel %vm1399_vm3, %v4524_v46, %v4730_v30 }
 0x274   : > { %v2217_v38 = vpop.permute.xlu1 %2216  ;;  %2104 = vrot.lane.b32.xlu1 %v1897_v35, %s3603_s23  ;;  %v2091_v36 = vpop.permute.xlu0 %2090 }
 0x275   : > { %2040 = vrot.lane.b32.xlu0 %v1928_v2, %s3601_s21  ;;  %v2562_v61 = vsel %vm1501_vm10, %v2546_v15, %v2217_v38  ;;  %v2531_v0 = vsel %vm1433_vm6, %v2515_v43, %v2091_v36 }
 0x276   : > { %v2547_v50 = vsel %vm1467_vm8, %v2531_v0, %v4721_v26 }
 0x278   : > { %v4739_v24 = vpop.permute.xlu1 %2218  ;;  %2356 = vrot.lane.b32.xlu1 %v4715_v22, %s3609_s28  ;;  %v2343_v16 = vpop.permute.xlu0 %2342 }
 0x279   : > { %2292 = vrot.lane.b32.xlu0 %v1896_v17, %s3608_s26  ;;  %v2595_v48 = vsel %vm2589_vm15, %v2578_v41, %v2343_v16  ;;  %v1979_v17 = vld [vmem:[#allocation3 + $0x131] sm:$0xff]  ;;  %v2563_v21 = vsel %vm1501_vm10, %v2547_v50, %v4739_v24 }
 0x27c   : > { %v2471_v6 = vpop.permute.xlu1 %2470  ;;  %2168 = vrot.lane.b32.xlu1 %v4748_v12, %s3605_s25  ;;  %v2407_v49 = vpop.permute.xlu0 %2406 }
 0x27d   : > { %2042 = vrot.lane.b32.xlu0 %v1882_v42, %s3601_s21  ;;  %v2612_v33 = vsel %vm2606_vm1, %v2595_v48, %v2407_v49 }
 0x27e   : > { %v2629_v39 = vsel %vm2623_vm2, %v2612_v33, %v2471_v6 }
 0x27f   : > { %3509 = vmatmul.mubr.msk.f32.gmra.mxu1 %vm2649_vm5, %v2629_v39 }
 0x280   : > { %2420 = vrot.lane.b32.xlu1 %v1928_v2, %s3610_s29  ;;  %v4759_v31 = vpop.permute.xlu1 %2092  ;;  %v2029_v51 = vpop.permute.xlu0 %2028 }
 0x281   : > { %2294 = vrot.lane.b32.xlu0 %v1897_v35, %s3608_s26  ;;  %v2516_v38 = vsel %vm1399_vm3, %v1859_v20, %v2029_v51 }
 0x282   : > { %v2532_v24 = vsel %vm1433_vm6, %v2516_v38, %v4759_v31 }
 0x284   : > { %2232 = vrot.lane.b32.xlu1 %v1882_v42, %s3607_s17  ;;  %v2345_v45 = vpop.permute.xlu1 %2344  ;;  %v2281_v59 = vpop.permute.xlu0 %2280 }
 0x285   : > { %2106 = vrot.lane.b32.xlu0 %v1898_v9, %s3603_s23  ;;  %v2579_v18 = vsel %vm2572_vm14, %v2562_v61, %v2281_v59 }
 0x286   : > { %v2596_v54 = vsel %vm2589_vm15, %v2579_v18, %v2345_v45 }
 0x288   : > { %2484 = vrot.lane.b32.xlu1 %v1897_v35, %s3611_s30 }
 0x289   : > { %2358 = vrot.lane.b32.xlu0 %v4748_v12, %s3609_s28 }
 0x28c   : > { %2296 = vrot.lane.b32.xlu1 %v1898_v9, %s3608_s26 }
 0x28d   : > { %2170 = vrot.lane.b32.xlu0 %v1914_v1, %s3605_s25  ;;  %v2157_v4 = vpop.permute.xlu1 %2156 }
 0x28e   : > { %v4768_v58 = vpop.permute.xlu0 %2030  ;;  %v2548_v40 = vsel %vm1467_vm8, %v2532_v24, %v2157_v4 }
 0x290   : > { %2298 = vrot.lane.b32.xlu1 %v1946_v13, %s3608_s26 }
 0x291   : > { %2422 = vrot.lane.b32.xlu0 %v1882_v42, %s3610_s29  ;;  %v2409_v14 = vpop.permute.xlu1 %2408 }
 0x292   : > { %v2283_v10 = vpop.permute.xlu0 %2282  ;;  %v2613_v47 = vsel %vm2606_vm1, %v2596_v54, %v2409_v14 }
 0x293   : > { %v2580_v46 = vsel %vm2572_vm14, %v2563_v21, %v2283_v10 }
 0x294   : > { %2362 = vrot.lane.b32.xlu1 %v1963_v5, %s3609_s28 }
 0x295   : > { %2234 = vrot.lane.b32.xlu0 %v1930_v37, %s3607_s17  ;;  %v2221_v19 = vpop.permute.xlu1 %2220 }
 0x296   : > { %v2095_v52 = vpop.permute.xlu0 %2094  ;;  %v2564_v16 = vsel %vm1501_vm10, %v2548_v40, %v2221_v19 }
 0x298   : > { %2426 = vrot.lane.b32.xlu1 %v1979_v17, %s3610_s29 }
 0x299   : > { %2486 = vrot.lane.b32.xlu0 %v1898_v9, %s3611_s30  ;;  %v2473_v57 = vpop.permute.xlu1 %2472  ;;  %v2517_v9 = vsel %vm1399_vm3, %v4554_v25, %v4768_v58 }
 0x29a   : > { %v2347_v7 = vpop.permute.xlu0 %2346  ;;  %v2630_v8 = vsel %vm2623_vm2, %v2613_v47, %v2473_v57  ;;  %v2533_v51 = vsel %vm1433_vm6, %v2517_v9, %v2095_v52 }
 0x29b   : > { %3511 = vmatprep.mubr.msk.f32.mxu1 %vm2649_vm5, %v2630_v8  ;;  %v2597_v2 = vsel %vm2589_vm15, %v2580_v46, %v2347_v7 }
 0x29c   : > { %2490 = vrot.lane.b32.xlu1 %v1995_v55, %s3611_s30 }
 0x29d   : > { %2360 = vrot.lane.b32.xlu0 %v1914_v1, %s3609_s28  ;;  %v2223_v56 = vpop.permute.xlu1 %2222 }
 0x29e   : > { %v2159_v44 = vpop.permute.xlu0 %2158 }
 0x29f   : > { %v2549_v45 = vsel %vm1467_vm8, %v2533_v51, %v2159_v44 }
 0x2a0   : > { %v2565_v4 = vsel %vm1501_vm10, %v2549_v45, %v2223_v56 }
 0x2a1   : > { %2424 = vrot.lane.b32.xlu0 %v1930_v37, %s3610_s29  ;;  %v2475_v3 = vpop.permute.xlu1 %2474 }
 0x2a2   : > { %v2411_v23 = vpop.permute.xlu0 %2410 }
 0x2a3   : > { %v2614_v53 = vsel %vm2606_vm1, %v2597_v2, %v2411_v23 }
 0x2a4   : > { %v2631_v62 = vsel %vm2623_vm2, %v2614_v53, %v2475_v3 }
 0x2a5   : > { %2488 = vrot.lane.b32.xlu0 %v1946_v13, %s3611_s30  ;;  %3512 = vmatmul.mubr.msk.f32.gmra.mxu1 %vm2649_vm5, %v2631_v62  ;;  %v2097_v26 = vpop.permute.xlu1 %2096 }
 0x2a6   : > { %v2033_v29 = vpop.permute.xlu0 %2032 }
 0x2a7   : > { %v2518_v52 = vsel %vm1399_vm3, %v4571_v63, %v2033_v29 }
 0x2a8   : > { %v2534_v47 = vsel %vm1433_vm6, %v2518_v52, %v2097_v26 }
 0x2a9   : > { %v2349_v11 = vpop.permute.xlu1 %2348 }
 0x2aa   : > { %v2285_v30 = vpop.permute.xlu0 %2284 }
 0x2ab   : > { %v2581_v41 = vsel %vm2572_vm14, %v2564_v16, %v2285_v30 }
 0x2ac   : > { %v2598_v6 = vsel %vm2589_vm15, %v2581_v41, %v2349_v11 }
 0x2ae   : > { %v2161_v34 = vpop.permute.xlu1 %2160 }
 0x2af   : > { %v2035_v35 = vpop.permute.xlu0 %2034  ;;  %v2550_v57 = vsel %vm1467_vm8, %v2534_v47, %v2161_v34 }
 0x2b0   : > { %v2519_v63 = vsel %vm1399_vm3, %v4606_v32, %v2035_v35 }
 0x2b2   : > { %v2413_v36 = vpop.permute.xlu1 %2412 }
 0x2b3   : > { %v2287_v27 = vpop.permute.xlu0 %2286  ;;  %v2615_v49 = vsel %vm2606_vm1, %v2598_v6, %v2413_v36 }
 0x2b4   : > { %v2582_v13 = vsel %vm2572_vm14, %v2565_v4, %v2287_v27 }
 0x2b6   : > { %v2225_v42 = vpop.permute.xlu1 %2224 }
 0x2b7   : > { %v2099_v48 = vpop.permute.xlu0 %2098  ;;  %v2566_v7 = vsel %vm1501_vm10, %v2550_v57, %v2225_v42  ;;  %v4873_v57 = vld [vmem:[%s5022_s9] ss:$0 sm:$0xff] }
 0x2b8   : > { %v2535_v2 = vsel %vm1433_vm6, %v2519_v63, %v2099_v48 }
 0x2ba   : > { %v2477_v33 = vpop.permute.xlu1 %2476 }
 0x2bb   : > { %v2351_v39 = vpop.permute.xlu0 %2350  ;;  %v2632_v31 = vsel %vm2623_vm2, %v2615_v49, %v2477_v33 }
 0x2bc   : > { %3514 = vmatprep.mubr.msk.f32.mxu1 %vm2649_vm5, %v2632_v31  ;;  %v2599_v5 = vsel %vm2589_vm15, %v2582_v13, %v2351_v39 }
 0x2be   : > { %v2227_v59 = vpop.permute.xlu1 %2226 }
 0x2bf   : > { %v2163_v1 = vpop.permute.xlu0 %2162 }
 0x2c0   : > { %v2551_v3 = vsel %vm1467_vm8, %v2535_v2, %v2163_v1 }
 0x2c1   : > { %v2567_v62 = vsel %vm1501_vm10, %v2551_v3, %v2227_v59 }
 0x2c2   : > { %v2479_v14 = vpop.permute.xlu1 %2478 }
 0x2c3   : > { %v2415_v10 = vpop.permute.xlu0 %2414 }
 0x2c4   : > { %v2616_v25 = vsel %vm2606_vm1, %v2599_v5, %v2415_v10 }
 0x2c5   : > { %v2633_v58 = vsel %vm2623_vm2, %v2616_v25, %v2479_v14  ;;  %v3530_v25 = vpop.f32.mrf.mxu0 }
 0x2c6   : > { %3515 = vmatmul.mubr.msk.f32.gmra.mxu1 %vm2649_vm5, %v2633_v58  ;;  %v2101_v37 = vpop.permute.xlu1 %2100 }
 0x2c7   : > { %v2037_v15 = vpop.permute.xlu0 %2036 }
 0x2c8   : > { %v2520_v40 = vsel %vm1399_vm3, %v4640_v28, %v2037_v15 }
 0x2c9   : > { %v2536_v42 = vsel %vm1433_vm6, %v2520_v40, %v2101_v37 }
 0x2ca   : > { %v2353_v61 = vpop.permute.xlu1 %2352 }
 0x2cb   : > { %v2289_v17 = vpop.permute.xlu0 %2288 }
 0x2cc   : > { %v2583_v43 = vsel %vm2572_vm14, %v2566_v7, %v2289_v17  ;;  %v4878_v7 = vld [vmem:[%s5018_s5] ss:$0 sm:$0xff] }
 0x2cd   : > { %v2600_v56 = vsel %vm2589_vm15, %v2583_v43, %v2353_v61  ;;  %v4861_v61 = vld [vmem:[%s5021_s8] ss:$0 sm:$0xff] }
 0x2ce   : > { %v2165_v18 = vpop.permute.xlu1 %2164 }
 0x2cf   : > { %v2039_v19 = vpop.permute.xlu0 %2038  ;;  %v2552_v48 = vsel %vm1467_vm8, %v2536_v42, %v2165_v18 }
 0x2d0   : > { %v2521_v4 = vsel %vm1399_vm3, %v4679_v60, %v2039_v19  ;;  %v2991_v60 = vpop.f32.mrf.mxu0 }
 0x2d2   : > { %v2417_v54 = vpop.permute.xlu1 %2416 }
 0x2d3   : > { %v2291_v55 = vpop.permute.xlu0 %2290  ;;  %v2617_v44 = vsel %vm2606_vm1, %v2600_v56, %v2417_v54  ;;  %v4886_v56 = vld [vmem:[%s5019_s6] ss:$0 sm:$0xff] }
 0x2d4   : > { %v2584_v26 = vsel %vm2572_vm14, %v2567_v62, %v2291_v55  ;;  %v3078_v55 = vmul.f32 %v3530_v25, %v4861_v61 }
 0x2d6   : > { %v2229_v8 = vpop.permute.xlu1 %2228 }
 0x2d7   : > { %v2103_v0 = vpop.permute.xlu0 %2102  ;;  %v2568_v6 = vsel %vm1501_vm10, %v2552_v48, %v2229_v8  ;;  %v3077_v8 = vmul.f32 %v4861_v61, %v2991_v60 }
 0x2d8   : > { %v2537_v5 = vsel %vm1433_vm6, %v2521_v4, %v2103_v0 }
 0x2d9   : > { %v3100_v62 = vadd.f32 %v4873_v57, %v3077_v8 }
 0x2da   : > { %v2481_v50 = vpop.permute.xlu1 %2480 }
 0x2db   : > { %v2355_v21 = vpop.permute.xlu0 %2354  ;;  %v2634_v46 = vsel %vm2623_vm2, %v2617_v44, %v2481_v50 }
 0x2dc   : > { %3517 = vmatprep.mubr.msk.f32.mxu1 %vm2649_vm5, %v2634_v46  ;;  %v2601_v29 = vsel %vm2589_vm15, %v2584_v26, %v2355_v21  ;;  %v3101_v21 = vadd.f32 %v4873_v57, %v3078_v55 }
 0x2de   : > { %v2231_v23 = vpop.permute.xlu1 %2230 }
 0x2df   : > { %v2167_v53 = vpop.permute.xlu0 %2166 }
 0x2e0   : > { %v2553_v14 = vsel %vm1467_vm8, %v2537_v5, %v2167_v53 }
 0x2e1   : > { %v2569_v37 = vsel %vm1501_vm10, %v2553_v14, %v2231_v23 }
 0x2e2   : > { %v2483_v11 = vpop.permute.xlu1 %2482 }
 0x2e3   : > { %v2419_v30 = vpop.permute.xlu0 %2418 }
 0x2e4   : > { %v2618_v32 = vsel %vm2606_vm1, %v2601_v29, %v2419_v30 }
 0x2e5   : > { %v2635_v20 = vsel %vm2623_vm2, %v2618_v32, %v2483_v11 }
 0x2e6   : > { %3518 = vmatmul.mubr.msk.f32.gmra.mxu1 %vm2649_vm5, %v2635_v20  ;;  %v2105_v34 = vpop.permute.xlu1 %2104 }
 0x2e7   : > { %v2041_v35 = vpop.permute.xlu0 %2040 }
 0x2e8   : > { %v2522_v44 = vsel %vm1399_vm3, %v4715_v22, %v2041_v35 }
 0x2e9   : > { %v2538_v26 = vsel %vm1433_vm6, %v2522_v44, %v2105_v34 }
 0x2ea   : > { %v2357_v38 = vpop.permute.xlu1 %2356 }
 0x2eb   : > { %v2293_v36 = vpop.permute.xlu0 %2292 }
 0x2ec   : > { %v2585_v49 = vsel %vm2572_vm14, %v2568_v6, %v2293_v36 }
 0x2ed   : > { %v2602_v9 = vsel %vm2589_vm15, %v2585_v49, %v2357_v38  ;;  %v3585_v49 = vld [vmem:[#allocation2 + $0x229] ss:$2 sm:$0xff] }
 0x2ee   : > { %v2169_v27 = vpop.permute.xlu1 %2168 }
 0x2ef   : > { %v2043_v24 = vpop.permute.xlu0 %2042  ;;  %v2554_v29 = vsel %vm1467_vm8, %v2538_v26, %v2169_v27 }
 0x2f0   : > { %v2523_v47 = vsel %vm1399_vm3, %v4748_v12, %v2043_v24 }
 0x2f2   : > { %v2421_v16 = vpop.permute.xlu1 %2420 }
 0x2f3   : > { %v2295_v41 = vpop.permute.xlu0 %2294  ;;  %v2619_v31 = vsel %vm2606_vm1, %v2602_v9, %v2421_v16  ;;  %v3588_v9 = vld [vmem:[#allocation2 + $0x2b9] ss:$2 sm:$0xff] }
 0x2f4   : > { %v2586_v15 = vsel %vm2572_vm14, %v2569_v37, %v2295_v41 }
 0x2f6   : > { %v2233_v33 = vpop.permute.xlu1 %2232 }
 0x2f7   : > { %v2107_v39 = vpop.permute.xlu0 %2106  ;;  %v2570_v20 = vsel %vm1501_vm10, %v2554_v29, %v2233_v33  ;;  %v3586_v33 = vld [vmem:[#allocation2 + $0x259] ss:$2 sm:$0xff] }
 0x2f8   : > { %v2539_v43 = vsel %vm1433_vm6, %v2523_v47, %v2107_v39  ;;  %v3587_v39 = vld [vmem:[#allocation2 + $0x289] ss:$2 sm:$0xff] }
 0x2fa   : > { %v2485_v51 = vpop.permute.xlu1 %2484 }
 0x2fb   : > { %v2359_v45 = vpop.permute.xlu0 %2358  ;;  %v2636_v28 = vsel %vm2623_vm2, %v2619_v31, %v2485_v51  ;;  %v3589_v31 = vld [vmem:[#allocation2 + $0x2e9] ss:$2 sm:$0xff]  ;;  %v3590_v51 = vld [vmem:[#allocation2 + $0x319] ss:$2 sm:$0xff] }
 0x2fc   : > { %3520 = vmatprep.mubr.msk.f32.mxu1 %vm2649_vm5, %v2636_v28  ;;  %v2603_v17 = vsel %vm2589_vm15, %v2586_v15, %v2359_v45  ;;  %v3533_v45 = vpop.f32.mrf.mxu0 }
 0x2fe   : > { %v2297_v59 = vpop.permute.xlu1 %2296  ;;  %v3001_v28 = vpop.f32.mrf.mxu0 }
 0x2ff   : > { %v2171_v1 = vpop.permute.xlu0 %2170  ;;  %v2587_v35 = vsel %vm2572_vm14, %v2570_v20, %v2297_v59  ;;  %v3080_v59 = vmul.f32 %v3533_v45, %v4861_v61 }
 0x300   : > { %v2555_v0 = vsel %vm1467_vm8, %v2539_v43, %v2171_v1  ;;  %v3079_v1 = vmul.f32 %v4861_v61, %v3001_v28 }
 0x301   : > { %v3103_v5 = vadd.f32 %v4873_v57, %v3080_v59 }
 0x302   : > { %v2299_v10 = vpop.permute.xlu1 %2298 }
 0x303   : > { %v2423_v13 = vpop.permute.xlu0 %2422 }
 0x304   : > { %v2620_v18 = vsel %vm2606_vm1, %v2603_v17, %v2423_v13 }
 0x306   : > { %v2363_v19 = vpop.permute.xlu1 %2362 }
 0x307   : > { %v2235_v58 = vpop.permute.xlu0 %2234 }
 0x308   : > { %v2571_v50 = vsel %vm1501_vm10, %v2555_v0, %v2235_v58  ;;  %v3102_v58 = vadd.f32 %v4873_v57, %v3079_v1 }
 0x309   : > { %v2588_v22 = vsel %vm2572_vm14, %v2571_v50, %v2299_v10 }
 0x30a   : > { %v2427_v2 = vpop.permute.xlu1 %2426  ;;  %v2605_v34 = vsel %vm2589_vm15, %v2588_v22, %v2363_v19  ;;  %v3536_v19 = vpop.f32.mrf.mxu0 }
 0x30b   : > { %v2487_v52 = vpop.permute.xlu0 %2486  ;;  %v2622_v42 = vsel %vm2606_vm1, %v2605_v34, %v2427_v2 }
 0x30c   : > { %v2637_v54 = vsel %vm2623_vm2, %v2620_v18, %v2487_v52  ;;  %v3011_v52 = vpop.f32.mrf.mxu0 }
 0x30d   : > { %3521 = vmatmul.mubr.msk.f32.gmra.mxu1 %vm2649_vm5, %v2637_v54  ;;  %v3082_v54 = vmul.f32 %v3536_v19, %v4861_v61  ;;  %v3081_v55 = vmul.f32 %v4861_v61, %v3011_v52 }
 0x30e   : > { %v3504_v12 = vpop.f32.mrf.mxu1  ;;  %v2491_v27 = vpop.permute.xlu1 %2490 }
 0x30f   : > { %v2851_v63 = vmul.f32 %v3504_v12, %v4878_v7  ;;  %v2361_v46 = vpop.permute.xlu0 %2360  ;;  %v2639_v6 = vsel %vm2623_vm2, %v2622_v42, %v2491_v27  ;;  %v3105_v8 = vadd.f32 %v4873_v57, %v3082_v54  ;;  %v3104_v50 = vadd.f32 %v4873_v57, %v3081_v55 }
 0x310   : > { %v2764_v3 = vpop.f32.mrf.mxu1  ;;  %v2604_v24 = vsel %vm2589_vm15, %v2587_v35, %v2361_v46 }
 0x311   : > { %v2874_v23 = vadd.f32 %v4886_v56, %v2851_v63  ;;  %v2850_v53 = vmul.f32 %v4878_v7, %v2764_v3 }
 0x313   : > { %v3117_v11 = vadd.f32 %v3101_v21, %v2874_v23  ;;  %v2873_v30 = vadd.f32 %v4886_v56, %v2850_v53  ;;  %v2425_v32 = vpop.permute.xlu0 %2424  ;;  %v3539_v23 = vpop.f32.mrf.mxu0 }
 0x314   : > { %v2621_v16 = vsel %vm2606_vm1, %v2604_v24, %v2425_v32 }
 0x315   : > { %v3133_v38 = vmax.f32 %v3117_v11, 0.0  ;;  %v3116_v36 = vadd.f32 %v3100_v62, %v2873_v30  ;;  %v3021_v53 = vpop.f32.mrf.mxu0  ;;  %v3084_v62 = vmul.f32 %v3539_v23, %v4861_v61 }
 0x316   : > { %v3083_v26 = vmul.f32 %v4861_v61, %v3021_v53 }
 0x317   : > { %3149 = vst.msk [vmem:[%s4905_s14 + $0x8] sm:$0xff] %vm1399_vm3, %v3133_v38  ;;  %v3132_v40 = vmax.f32 %v3116_v36, 0.0  ;;  %v2489_v41 = vpop.permute.xlu0 %2488  ;;  %v3107_v11 = vadd.f32 %v4873_v57, %v3084_v62 }
 0x318   : > { %v2638_v48 = vsel %vm2623_vm2, %v2621_v16, %v2489_v41  ;;  %v3106_v35 = vadd.f32 %v4873_v57, %v3083_v26 }
 0x319   : > { %3148 = vst.msk [vmem:[%s4905_s14] sm:$0xff] %vm1399_vm3, %v3132_v40  ;;  %3523 = vmatprep.mubr.msk.f32.mxu1 %vm2649_vm5, %v2638_v48  ;;  %v3542_v40 = vpop.f32.mrf.mxu0 }
 0x31a   : > { %3524 = vmatmul.mubr.msk.f32.gmra.mxu1 %vm2649_vm5, %v2639_v6  ;;  %v3086_v41 = vmul.f32 %v3542_v40, %v4861_v61 }
 0x31b   : > { %3543 = vmatprep.mubr.msk.f32.mxu1 %vm368_vm0, %v3585_v49  ;;  %v3031_v16 = vpop.f32.mrf.mxu0 }
 0x31c   : > { %v3085_v42 = vmul.f32 %v4861_v61, %v3031_v16  ;;  %v3109_v49 = vadd.f32 %v4873_v57, %v3086_v41 }
 0x31e   : > { %3544 = vmatmul.mubr.msk.f32.vlgmr.msra.gmra.mxu1 %vm368_vm0, %v3586_v33 }
 0x31f   : > { %3546 = vmatprep.mubr.msk.f32.mxu1 %vm368_vm0, %v3587_v39 }
 0x322   : > { %3547 = vmatmul.mubr.msk.f32.gmra.mxu1 %vm368_vm0, %v3588_v9 }
 0x323   : > { %3549 = vmatprep.mubr.msk.f32.mxu1 %vm368_vm0, %v3589_v31  ;;  %v3108_v31 = vadd.f32 %v4873_v57, %v3085_v42 }
 0x326   : > { %3550 = vmatmul.mubr.msk.f32.gmra.mxu1 %vm368_vm0, %v3590_v51 }
 0x32e   : > { %v3507_v4 = vpop.f32.mrf.mxu1 }
 0x32f   : > { %v2853_v13 = vmul.f32 %v3507_v4, %v4878_v7 }
 0x330   : > { %v2774_v14 = vpop.f32.mrf.mxu1 }
 0x331   : > { %v2876_v10 = vadd.f32 %v4886_v56, %v2853_v13  ;;  %v2852_v25 = vmul.f32 %v4878_v7, %v2774_v14 }
 0x333   : > { %v3119_v37 = vadd.f32 %v3103_v5, %v2876_v10  ;;  %v2875_v15 = vadd.f32 %v4886_v56, %v2852_v25 }
 0x335   : > { %v3135_v17 = vmax.f32 %v3119_v37, 0.0  ;;  %v3118_v60 = vadd.f32 %v3102_v58, %v2875_v15 }
 0x337   : > { %3151 = vst.msk [vmem:[%s4905_s14 + $0x18] sm:$0xff] %vm1399_vm3, %v3135_v17  ;;  %v3134_v18 = vmax.f32 %v3118_v60, 0.0 }
 0x339   : > { %3150 = vst.msk [vmem:[%s4905_s14 + $0x10] sm:$0xff] %vm1399_vm3, %v3134_v18 }
 0x33f   : > { %v3510_v47 = vpop.f32.mrf.mxu1 }
 0x340   : > { %v2855_v43 = vmul.f32 %v3510_v47, %v4878_v7 }
 0x341   : > { %v2784_v0 = vpop.f32.mrf.mxu1 }
 0x342   : > { %v2878_v12 = vadd.f32 %v4886_v56, %v2855_v43  ;;  %v2854_v44 = vmul.f32 %v4878_v7, %v2784_v0 }
 0x344   : > { %v3121_v21 = vadd.f32 %v3105_v8, %v2878_v12  ;;  %v2877_v63 = vadd.f32 %v4886_v56, %v2854_v44 }
 0x346   : > { %v3137_v46 = vmax.f32 %v3121_v21, 0.0  ;;  %v3120_v2 = vadd.f32 %v3104_v50, %v2877_v63 }
 0x348   : > { %3153 = vst.msk [vmem:[%s4905_s14 + $0x28] sm:$0xff] %vm1399_vm3, %v3137_v46  ;;  %v3136_v3 = vmax.f32 %v3120_v2, 0.0 }
 0x34a   : > { %3152 = vst.msk [vmem:[%s4905_s14 + $0x20] sm:$0xff] %vm1399_vm3, %v3136_v3 }
 0x365   : > { %v3513_v22 = vpop.f32.mrf.mxu1 }
 0x366   : > { %v2857_v29 = vmul.f32 %v3513_v22, %v4878_v7 }
 0x367   : > { %v2794_v30 = vpop.f32.mrf.mxu1 }
 0x368   : > { %v2880_v32 = vadd.f32 %v4886_v56, %v2857_v29  ;;  %v2856_v20 = vmul.f32 %v4878_v7, %v2794_v30 }
 0x36a   : > { %v3123_v34 = vadd.f32 %v3107_v11, %v2880_v32  ;;  %v2879_v38 = vadd.f32 %v4886_v56, %v2856_v20 }
 0x36c   : > { %v3139_v36 = vmax.f32 %v3123_v34, 0.0  ;;  %v3122_v27 = vadd.f32 %v3106_v35, %v2879_v38 }
 0x36e   : > { %3155 = vst.msk [vmem:[%s4905_s14 + $0x38] sm:$0xff] %vm1399_vm3, %v3139_v36  ;;  %v3138_v24 = vmax.f32 %v3122_v27, 0.0 }
 0x370   : > { %3154 = vst.msk [vmem:[%s4905_s14 + $0x30] sm:$0xff] %vm1399_vm3, %v3138_v24 }
 0x386   : > { %v3516_v48 = vpop.f32.mrf.mxu1 }
 0x387   : > { %v2859_v6 = vmul.f32 %v3516_v48, %v4878_v7 }
 0x388   : > { %v2804_v33 = vpop.f32.mrf.mxu1 }
 0x389   : > { %v2882_v39 = vadd.f32 %v4886_v56, %v2859_v6  ;;  %v2858_v9 = vmul.f32 %v4878_v7, %v2804_v33 }
 0x38b   : > { %v3125_v51 = vadd.f32 %v3109_v49, %v2882_v39  ;;  %v2881_v45 = vadd.f32 %v4886_v56, %v2858_v9 }
 0x38d   : > { %v3141_v28 = vmax.f32 %v3125_v51, 0.0  ;;  %v3124_v59 = vadd.f32 %v3108_v31, %v2881_v45 }
 0x38f   : > { %3157 = vst.msk [vmem:[%s4905_s14 + $0x48] sm:$0xff] %vm1399_vm3, %v3141_v28  ;;  %v3140_v1 = vmax.f32 %v3124_v59, 0.0 }
 0x391   : > { %3156 = vst.msk [vmem:[%s4905_s14 + $0x40] sm:$0xff] %vm1399_vm3, %v3140_v1 }
 0x3a6   : > { %v3519_v4 = vpop.f32.mrf.mxu1 }
 0x3a7   : > { %v2861_v58 = vmul.f32 %v3519_v4, %v4878_v7 }
 0x3a8   : > { %v2814_v13 = vpop.f32.mrf.mxu1 }
 0x3a9   : > { %v2860_v15 = vmul.f32 %v4878_v7, %v2814_v13  ;;  %v2884_v19 = vadd.f32 %v4886_v56, %v2861_v58 }
 0x3ab   : > { %v2883_v43 = vadd.f32 %v4886_v56, %v2860_v15 }
 0x3cd   : > { %v3522_v5 = vpop.f32.mrf.mxu1 }
 0x3ce   : > { %v2863_v60 = vmul.f32 %v3522_v5, %v4878_v7 }
 0x3cf   : > { %v2824_v14 = vpop.f32.mrf.mxu1 }
 0x3d0   : > { %v2862_v55 = vmul.f32 %v4878_v7, %v2824_v14  ;;  %v2886_v44 = vadd.f32 %v4886_v56, %v2863_v60 }
 0x3d2   : > { %v2885_v23 = vadd.f32 %v4886_v56, %v2862_v55 }
 0x3da   : > { %v3525_v10 = vpop.f32.mrf.mxu1 }
 0x3db   : > { %v2865_v50 = vmul.f32 %v3525_v10, %v4878_v7 }
 0x3dc   : > { %v2834_v25 = vpop.f32.mrf.mxu1 }
 0x3dd   : > { %v2864_v53 = vmul.f32 %v4878_v7, %v2834_v25  ;;  %v2888_v30 = vadd.f32 %v4886_v56, %v2865_v50 }
 0x3de   : > { %v3545_v37 = vpop.f32.mrf.mxu1 }
 0x3df   : > { %v3088_v17 = vmul.f32 %v3545_v37, %v4861_v61  ;;  %v2887_v38 = vadd.f32 %v4886_v56, %v2864_v53 }
 0x3e0   : > { %v3041_v18 = vpop.f32.mrf.mxu1 }
 0x3e1   : > { %v3111_v52 = vadd.f32 %v4873_v57, %v3088_v17  ;;  %v3087_v54 = vmul.f32 %v4861_v61, %v3041_v18 }
 0x3e2   : > { %v3548_v47 = vpop.f32.mrf.mxu1 }
 0x3e3   : > { %v3127_v8 = vadd.f32 %v3111_v52, %v2884_v19  ;;  %v3110_v0 = vadd.f32 %v4873_v57, %v3087_v54  ;;  %v3090_v12 = vmul.f32 %v3548_v47, %v4861_v61 }
 0x3e4   : > { %v3051_v21 = vpop.f32.mrf.mxu1 }
 0x3e5   : > { %v3143_v63 = vmax.f32 %v3127_v8, 0.0  ;;  %v3126_v46 = vadd.f32 %v3110_v0, %v2883_v43  ;;  %v3113_v2 = vadd.f32 %v4873_v57, %v3090_v12  ;;  %v3089_v3 = vmul.f32 %v4861_v61, %v3051_v21 }
 0x3e6   : > { %v3551_v62 = vpop.f32.mrf.mxu1 }
 0x3e7   : > { %3159 = vst.msk [vmem:[%s4905_s14 + $0x58] sm:$0xff] %vm1399_vm3, %v3143_v63  ;;  %v3142_v26 = vmax.f32 %v3126_v46, 0.0  ;;  %v3129_v22 = vadd.f32 %v3113_v2, %v2886_v44  ;;  %v3112_v29 = vadd.f32 %v4873_v57, %v3089_v3  ;;  %v3092_v11 = vmul.f32 %v3551_v62, %v4861_v61 }
 0x3e8   : > { %v3061_v32 = vpop.f32.mrf.mxu1 }
 0x3e9   : > { %3158 = vst.msk [vmem:[%s4905_s14 + $0x50] sm:$0xff] %vm1399_vm3, %v3142_v26  ;;  %v3145_v20 = vmax.f32 %v3129_v22, 0.0  ;;  %v3128_v35 = vadd.f32 %v3112_v29, %v2885_v23  ;;  %v3115_v7 = vadd.f32 %v4873_v57, %v3092_v11  ;;  %v3091_v34 = vmul.f32 %v4861_v61, %v3061_v32 }
 0x3eb   : > { %3161 = vst.msk [vmem:[%s4905_s14 + $0x68] sm:$0xff] %vm1399_vm3, %v3145_v20  ;;  %v3144_v36 = vmax.f32 %v3128_v35, 0.0  ;;  %v3131_v27 = vadd.f32 %v3115_v7, %v2888_v30  ;;  %v3114_v24 = vadd.f32 %v4873_v57, %v3091_v34 }
 0x3ed   : > { %3160 = vst.msk [vmem:[%s4905_s14 + $0x60] sm:$0xff] %vm1399_vm3, %v3144_v36  ;;  %v3147_v40 = vmax.f32 %v3131_v27, 0.0  ;;  %v3130_v16 = vadd.f32 %v3114_v24, %v2887_v38 }
 0x3ef   : > { %3163 = vst.msk [vmem:[%s4905_s14 + $0x78] sm:$0xff] %vm1399_vm3, %v3147_v40  ;;  %v3146_v41 = vmax.f32 %v3130_v16, 0.0 }
 0x3f1   : > { %3162 = vst.msk [vmem:[%s4905_s14 + $0x70] sm:$0xff] %vm1399_vm3, %v3146_v41 }
 0x3f2 PF: > { %s20_s13 = sadd.s32 1, %s3597_s13  }
 0x3f3   : > { %p17_p4 = scmp.ge.s32.totalorder %s20_s13, 4  }
 0x3f5   :  { %19 = sbr.rel (!%p17_p4) target bundleno = 1 (0x1), region = 237 }

</bundles_post_ra>
